<compile_context>
chip_gen: v7x
topology: tpu7x:2x2x1
jax: 0.10.0
libtpu: 0.0.40
codegen_flags: <defaults>
</compile_context>

<pallas_src>
import collections
import functools

import numpy as np
import jax
import jax.numpy as jnp
from jax.experimental import pallas as pl
from jax.experimental.pallas import tpu as pltpu


_MAX_TILE_ROWS = 512   # ~20 KB/row of VMEM live state -> stays inside 32 MiB scoped VMEM
_ROW_MULT = 16         # bf16 sublane packing wants multiples of 16

_Meta = collections.namedtuple(
    "_Meta", ["in_feat", "in_feat_pad", "n_heads", "n_actions", "compute_dtype"])


# ----------------------------------------------------------------------------
# Small helpers
# ----------------------------------------------------------------------------
def _round_up(x, m):
    return -(-x // m) * m


def _pad2d(a, rows, cols):
    a = np.asarray(a, np.float32)
    out = np.zeros((rows, cols), np.float32)
    out[:a.shape[0], :a.shape[1]] = a
    return out


def _row_tiling(m):
    """Pad rows only to a multiple of _ROW_MULT; >=2 grid steps when possible."""
    pm = _round_up(max(m, _ROW_MULT), _ROW_MULT)
    g = -(-pm // _MAX_TILE_ROWS)
    if pm >= 2 * _ROW_MULT:
        g = max(g, 2)                      # let both v7x TensorCores have work
    tm = _round_up(-(-pm // g), _ROW_MULT)
    return tm, tm * g


# ----------------------------------------------------------------------------
# The single fused kernel: x @ W1 -> relu -> @ W2 -> relu -> @ W3 -> relu -> @ W4
# (W1 = conv1-as-dense, W2 = conv2-as-dense block-diag over net/prior cores,
#  W3 = all (core, head) fc1 columns, W4 = block fc2 with prior_scale folded in)
# ----------------------------------------------------------------------------
def _fused_forward_kernel(x_ref, w1_ref, b1_ref, w2_ref, b2_ref,
                          w3_ref, b3_ref, w4_ref, b4_ref, o_ref):
    cdt = w1_ref.dtype
    h = jnp.dot(x_ref[...], w1_ref[...], preferred_element_type=jnp.float32) + b1_ref[...]
    h = jnp.maximum(h, 0.0).astype(cdt)
    h = jnp.dot(h, w2_ref[...], preferred_element_type=jnp.float32) + b2_ref[...]
    h = jnp.maximum(h, 0.0).astype(cdt)
    h = jnp.dot(h, w3_ref[...], preferred_element_type=jnp.float32) + b3_ref[...]
    h = jnp.maximum(h, 0.0).astype(cdt)
    q = jnp.dot(h, w4_ref[...], preferred_element_type=jnp.float32) + b4_ref[...]
    o_ref[...] = q.astype(o_ref.dtype)


def _forward_ensemble(packed, x_nchw, *, meta):
    B = x_nchw.shape[0]
    # PyTorch NCHW flatten order is folded into W1's rows -> plain reshape, no transpose.
    x = x_nchw.reshape(B, -1).astype(meta.compute_dtype)
    if meta.in_feat_pad != meta.in_feat:
        x = jnp.pad(x, ((0, 0), (0, meta.in_feat_pad - meta.in_feat)))
    tm, pm = _row_tiling(B)
    if pm != B:
        x = jnp.pad(x, ((0, pm - B), (0, 0)))

    K0 = meta.in_feat_pad
    N1 = packed["w1"].shape[1]
    N2 = packed["w2"].shape[1]
    N3 = packed["w3"].shape[1]
    N4 = packed["w4"].shape[1]
    const = lambda i: (0, 0)

    q = pl.pallas_call(
        _fused_forward_kernel,
        out_shape=jax.ShapeDtypeStruct((pm, N4), jnp.float32),
        grid_spec=pltpu.PrefetchScalarGridSpec(
            num_scalar_prefetch=0,
            grid=(pm // tm,),
            in_specs=[pl.BlockSpec((tm, K0), lambda i: (i, 0)),
                      pl.BlockSpec((K0, N1), const), pl.BlockSpec((1, N1), const),
                      pl.BlockSpec((N1, N2), const), pl.BlockSpec((1, N2), const),
                      pl.BlockSpec((N2, N3), const), pl.BlockSpec((1, N3), const),
                      pl.BlockSpec((N3, N4), const), pl.BlockSpec((1, N4), const)],
            out_specs=pl.BlockSpec((tm, N4), lambda i: (i, 0))),
        compiler_params=pltpu.CompilerParams(dimension_semantics=("parallel",)),
    )(x, packed["w1"], packed["b1"], packed["w2"], packed["b2"],
      packed["w3"], packed["b3"], packed["w4"], packed["b4"])

    q = q[:B, :meta.n_heads * meta.n_actions]
    return tuple(q[:, i * meta.n_actions:(i + 1) * meta.n_actions]
                 for i in range(meta.n_heads))


# ----------------------------------------------------------------------------
# One-time parameter packing (host-side numpy; net + prior fused, convs folded
# into dense per-position matmuls, NCHW flatten orders folded in, prior_scale
# folded into the fc2 blocks).
# ----------------------------------------------------------------------------
def _pack_params(net_params, prior_params, prior_scale, img_hw, compute_dtype):
    cores = [(net_params, 1.0)]
    if prior_params is not None and prior_scale > 0.0:
        cores.append((prior_params, float(prior_scale)))
    NC = len(cores)

    c1w = np.asarray(net_params["core"]["conv1_w"])
    C1, Cin, KH, KW = c1w.shape
    C2 = np.asarray(net_params["core"]["conv2_w"]).shape[0]
    NH = len(net_params["heads"])
    FEAT, HID = np.asarray(net_params["heads"][0]["fc1_w"]).shape
    NA = np.asarray(net_params["heads"][0]["fc2_w"]).shape[1]
    H, W = img_hw
    S = 2  # stride of both convs
    OH1, OW1 = (H - KH) // S + 1, (W - KW) // S + 1
    OH2, OW2 = (OH1 - KH) // S + 1, (OW1 - KW) // S + 1
    S1, S2 = OH1 * OW1, OH2 * OW2
    assert FEAT == C2 * S2, "head fc1 size must match conv core output"

    F0 = Cin * H * W          # NCHW-flattened input
    F1 = S1 * NC * C1         # conv1 output (NHWC flatten, cores concatenated)
    F2 = S2 * NC * C2         # conv2 output (NHWC flatten, cores concatenated)
    F3 = NC * NH * HID        # all (core, head) fc1 columns
    F4 = NH * NA              # all head Q outputs (prior already folded in)

    # ---- conv1 as a dense matmul on the NCHW-flattened input -----------------
    K1 = np.zeros((Cin, KH, KW, NC * C1), np.float32)
    for n, (p, _) in enumerate(cores):
        K1[:, :, :, n * C1:(n + 1) * C1] = np.transpose(
            np.asarray(p["core"]["conv1_w"]), (1, 2, 3, 0))
    W1 = np.zeros((F0, F1), np.float32)
    c_idx = np.arange(Cin)
    for oh in range(OH1):
        for ow in range(OW1):
            col0 = (oh * OW1 + ow) * NC * C1
            for kh in range(KH):
                for kw in range(KW):
                    rows = (c_idx * H + (S * oh + kh)) * W + (S * ow + kw)
                    W1[rows, col0:col0 + NC * C1] = K1[:, kh, kw, :]
    b1 = np.tile(np.concatenate(
        [np.asarray(p["core"]["conv1_b"]).reshape(1, -1) for p, _ in cores], axis=1),
        (1, S1))

    # ---- conv2 as a dense matmul (block-diagonal over cores) -----------------
    W2 = np.zeros((F1, F2), np.float32)
    for n, (p, _) in enumerate(cores):
        K2 = np.transpose(np.asarray(p["core"]["conv2_w"]), (1, 2, 3, 0))  # (C1,KH,KW,C2)
        for oh in range(OH2):
            for ow in range(OW2):
                col0 = (oh * OW2 + ow) * NC * C2 + n * C2
                for kh in range(KH):
                    for kw in range(KW):
                        s1 = (S * oh + kh) * OW1 + (S * ow + kw)
                        rows = s1 * NC * C1 + n * C1 + np.arange(C1)
                        W2[rows, col0:col0 + C2] = K2[:, kh, kw, :]
    b2 = np.tile(np.concatenate(
        [np.asarray(p["core"]["conv2_b"]).reshape(1, -1) for p, _ in cores], axis=1),
        (1, S2))

    # ---- heads fc1: torch NCHW-flatten rows -> fused NHWC-flatten rows -------
    W3 = np.zeros((F2, F3), np.float32)
    b3 = np.zeros((1, F3), np.float32)
    t = np.arange(C2 * S2)
    t_c2, t_s2 = t // S2, t % S2
    for n, (p, _) in enumerate(cores):
        r_idx = t_s2 * NC * C2 + n * C2 + t_c2
        stack = np.concatenate([np.asarray(h["fc1_w"]) for h in p["heads"]], axis=1)
        W3[r_idx, n * NH * HID:(n + 1) * NH * HID] = stack
        b3[:, n * NH * HID:(n + 1) * NH * HID] = np.concatenate(
            [np.asarray(h["fc1_b"]).reshape(1, -1) for h in p["heads"]], axis=1)

    # ---- heads fc2: per-(core, head) blocks; prior_scale folded in ------------
    W4 = np.zeros((F3, F4), np.float32)
    b4 = np.zeros((1, F4), np.float32)
    for n, (p, scale) in enumerate(cores):
        for i, hp in enumerate(p["heads"]):
            r0 = (n * NH + i) * HID
            W4[r0:r0 + HID, i * NA:(i + 1) * NA] = scale * np.asarray(hp["fc2_w"])
            b4[:, i * NA:(i + 1) * NA] += scale * np.asarray(hp["fc2_b"]).reshape(1, -1)

    # ---- pad every matmul dim to a multiple of 128 (zeros are inert) ----------
    P0, P1, P2, P3, P4 = (_round_up(d, 128) for d in (F0, F1, F2, F3, F4))
    cdt = compute_dtype
    packed = {
        "w1": jnp.asarray(_pad2d(W1, P0, P1), cdt), "b1": jnp.asarray(_pad2d(b1, 1, P1)),
        "w2": jnp.asarray(_pad2d(W2, P1, P2), cdt), "b2": jnp.asarray(_pad2d(b2, 1, P2)),
        "w3": jnp.asarray(_pad2d(W3, P2, P3), cdt), "b3": jnp.asarray(_pad2d(b3, 1, P3)),
        "w4": jnp.asarray(_pad2d(W4, P3, P4), cdt), "b4": jnp.asarray(_pad2d(b4, 1, P4)),
    }
    meta = _Meta(in_feat=F0, in_feat_pad=P0, n_heads=NH, n_actions=NA, compute_dtype=cdt)
    return packed, meta


class NetWithPriorPallas:
    """Pallas port of NetWithPrior.forward for a net_list ensemble + fixed prior."""

    def __init__(self, net_params, prior_params, prior_scale=1.0,
                 img_hw=(16, 16), compute_dtype=jnp.bfloat16):
        self.prior_scale = float(prior_scale)
        self._packed, self._meta = _pack_params(
            net_params,
            prior_params if self.prior_scale > 0.0 else None,
            self.prior_scale, img_hw, compute_dtype)
        self._fwd = jax.jit(functools.partial(_forward_ensemble, meta=self._meta))

    def forward(self, x, k):
        # The single fused launch computes every head; selecting head k is a free
        # slice and reproduces net(x, k) + prior_scale * prior(x, k).detach() exactly.
        outs = self._fwd(self._packed, x)
        return list(outs) if k is None else outs[k]


# ----------------------------------------------------------------------------
# Deterministic synthetic parameters (matching the dqn_model ensemble layout)
# ----------------------------------------------------------------------------
def make_ensemble_params(key, in_ch, n_heads, n_actions, hidden, feat_dim):
    ks = jax.random.split(key, 4 + 4 * n_heads)

    def norm(k, shape, fan_in):
        return jax.random.normal(k, shape, jnp.float32) / jnp.sqrt(fan_in)

    core = {
        "conv1_w": norm(ks[0], (8, in_ch, 3, 3), in_ch * 9),
        "conv1_b": norm(ks[1], (1, 8), in_ch * 9),
        "conv2_w": norm(ks[2], (16, 8, 3, 3), 8 * 9),
        "conv2_b": norm(ks[3], (1, 16), 8 * 9),
    }
    heads = []
    for h in range(n_heads):
        kk = ks[4 + 4 * h: 8 + 4 * h]
        heads.append({
            "fc1_w": norm(kk[0], (feat_dim, hidden), feat_dim),
            "fc1_b": norm(kk[1], (1, hidden), feat_dim),
            "fc2_w": norm(kk[2], (hidden, n_actions), hidden),
            "fc2_b": norm(kk[3], (1, n_actions), hidden),
        })
    return {"core": core, "heads": heads}


# ----------------------------------------------------------------------------
# Pure-JAX reference (HIGHEST precision, for correctness checks)
# ----------------------------------------------------------------------------
def _ref_core(core_p, x):
    dn = ("NCHW", "OIHW", "NCHW")
    hp = jax.lax.Precision.HIGHEST
    y = jax.lax.conv_general_dilated(x, core_p["conv1_w"], (2, 2), "VALID",
                                     dimension_numbers=dn, precision=hp)
    y = jnp.maximum(y + core_p["conv1_b"].reshape(1, -1, 1, 1), 0.0)
    y = jax.lax.conv_general_dilated(y, core_p["conv2_w"], (2, 2), "VALID",
                                     dimension_numbers=dn, precision=hp)
    y = jnp.maximum(y + core_p["conv2_b"].reshape(1, -1, 1, 1), 0.0)
    return y.reshape(y.shape[0], -1)


def _ref_head(h, head_p):
    hp = jax.lax.Precision.HIGHEST
    a = jnp.maximum(jnp.dot(h, head_p["fc1_w"], precision=hp) + head_p["fc1_b"], 0.0)
    return jnp.dot(a, head_p["fc2_w"], precision=hp) + head_p["fc2_b"]


def _ref_forward(net_p, prior_p, x, k, prior_scale):
    hn = _ref_core(net_p["core"], x)
    if prior_scale > 0.0:
        hpc = _ref_core(prior_p["core"], x)
        qs = [_ref_head(hn, n) + prior_scale * _ref_head(hpc, p)
              for n, p in zip(net_p["heads"], prior_p["heads"])]
    else:
        qs = [_ref_head(hn, n) for n in net_p["heads"]]
    return qs if k is None else qs[k]


# ----------------------------------------------------------------------------
if __name__ == "__main__":
    B, C, H, W = 2, 4, 16, 16
    N_HEADS, N_ACTIONS, HIDDEN = 3, 6, 32
    FEAT = 16 * 3 * 3                     # core output: 16 ch x 3 x 3
    PRIOR_SCALE = 1.0

    key = jax.random.PRNGKey(0)
    kx, knet, kprior = jax.random.split(key, 3)
    x = jax.random.normal(kx, (B, C, H, W), jnp.float32)

    net_params = make_ensemble_params(knet, C, N_HEADS, N_ACTIONS, HIDDEN, FEAT)
    prior_params = make_ensemble_params(kprior, C, N_HEADS, N_ACTIONS, HIDDEN, FEAT)

    ref_all = _ref_forward(net_params, prior_params, x, None, PRIOR_SCALE)
    ref_k = _ref_forward(net_params, prior_params, x, 1, PRIOR_SCALE)

    # --- default (bf16 weights/activations, f32 accumulation) path -----------
    model = NetWithPriorPallas(net_params, prior_params, prior_scale=PRIOR_SCALE,
                               img_hw=(H, W))
    out_all = [jax.block_until_ready(o) for o in model.forward(x, None)]
    out_k = jax.block_until_ready(model.forward(x, 1))
    for o, r in zip(out_all, ref_all):
        assert o.shape == (B, N_ACTIONS)
        assert jnp.allclose(o, r, atol=5e-2, rtol=5e-2)      # bf16 input/weight rounding
    assert out_k.shape == (B, N_ACTIONS)
    assert jnp.allclose(out_k, ref_k, atol=5e-2, rtol=5e-2)

    # --- f32 path: tight check of the packing / fusion logic -----------------
    model_f32 = NetWithPriorPallas(net_params, prior_params, prior_scale=PRIOR_SCALE,
                                   img_hw=(H, W), compute_dtype=jnp.float32)
    out_all32 = [jax.block_until_ready(o) for o in model_f32.forward(x, None)]
    for o, r in zip(out_all32, ref_all):
        assert jnp.allclose(o, r, atol=5e-3, rtol=5e-3)

    # --- prior_scale <= 0 path (net-only ensemble) ----------------------------
    model_net_only = NetWithPriorPallas(net_params, None, prior_scale=0.0, img_hw=(H, W))
    out0 = jax.block_until_ready(model_net_only.forward(x, 0))
    ref0 = _ref_forward(net_params, None, x, 0, 0.0)
    assert jnp.allclose(out0, ref0, atol=5e-2, rtol=5e-2)

    print("KERNEL_OK")
</pallas_src>

<mosaic_0001>
module attributes {stable_mosaic.version = 11 : i64} {
  func.func @_fused_forward_kernel(%arg0: i32, %arg1: memref<16x1024xbf16, #tpu.memory_space<vmem>>, %arg2: memref<1024x896xbf16, #tpu.memory_space<vmem>>, %arg3: memref<1x896xf32, #tpu.memory_space<vmem>>, %arg4: memref<896x384xbf16, #tpu.memory_space<vmem>>, %arg5: memref<1x384xf32, #tpu.memory_space<vmem>>, %arg6: memref<384x256xbf16, #tpu.memory_space<vmem>>, %arg7: memref<1x256xf32, #tpu.memory_space<vmem>>, %arg8: memref<256x128xbf16, #tpu.memory_space<vmem>>, %arg9: memref<1x128xf32, #tpu.memory_space<vmem>>, %arg10: memref<16x128xf32, #tpu.memory_space<vmem>>) attributes {dimension_semantics = [#tpu.dimension_semantics<parallel>], iteration_bounds = array<i64: 1>, scalar_prefetch = 0 : i64, scratch_operands = 0 : i64, tpu.core_type = #tpu.core_type<tc>, window_params = [{transform_indices = @transform_0, window_bounds = array<i64: 16, 1024>}, {pipeline_mode = #tpu.pipeline_mode<synchronous>, transform_indices = @transform_1, window_bounds = array<i64: 1024, 896>}, {pipeline_mode = #tpu.pipeline_mode<synchronous>, transform_indices = @transform_2, window_bounds = array<i64: 1, 896>}, {pipeline_mode = #tpu.pipeline_mode<synchronous>, transform_indices = @transform_3, window_bounds = array<i64: 896, 384>}, {pipeline_mode = #tpu.pipeline_mode<synchronous>, transform_indices = @transform_4, window_bounds = array<i64: 1, 384>}, {pipeline_mode = #tpu.pipeline_mode<synchronous>, transform_indices = @transform_5, window_bounds = array<i64: 384, 256>}, {pipeline_mode = #tpu.pipeline_mode<synchronous>, transform_indices = @transform_6, window_bounds = array<i64: 1, 256>}, {pipeline_mode = #tpu.pipeline_mode<synchronous>, transform_indices = @transform_7, window_bounds = array<i64: 256, 128>}, {pipeline_mode = #tpu.pipeline_mode<synchronous>, transform_indices = @transform_8, window_bounds = array<i64: 1, 128>}, {transform_indices = @transform_9, window_bounds = array<i64: 16, 128>}]} {
    %c0 = arith.constant 0 : index
    %c0_0 = arith.constant 0 : index
    %0 = vector.load %arg1[%c0, %c0_0] : memref<16x1024xbf16, #tpu.memory_space<vmem>>, vector<16x1024xbf16>
    %c0_1 = arith.constant 0 : index
    %c0_2 = arith.constant 0 : index
    %1 = vector.load %arg2[%c0_1, %c0_2] : memref<1024x896xbf16, #tpu.memory_space<vmem>>, vector<1024x896xbf16>
    %cst = arith.constant dense<0.000000e+00> : vector<16x896xf32>
    %2 = tpu.matmul %0, %1, %cst {dimension_numbers = #tpu.dot_dimension_numbers<[1], [0], [0], [1], [0, 0, 1, 1], [], []>} : vector<16x1024xbf16>, vector<1024x896xbf16>, vector<16x896xf32> -> vector<16x896xf32>
    %c0_3 = arith.constant 0 : index
    %c0_4 = arith.constant 0 : index
    %3 = vector.load %arg3[%c0_3, %c0_4] : memref<1x896xf32, #tpu.memory_space<vmem>>, vector<1x896xf32>
    %4 = vector.broadcast %3 : vector<1x896xf32> to vector<16x896xf32>
    %5 = arith.addf %2, %4 : vector<16x896xf32>
    %cst_5 = arith.constant 0.000000e+00 : f32
    %6 = vector.broadcast %cst_5 : f32 to vector<16x896xf32>
    %7 = arith.maximumf %5, %6 : vector<16x896xf32>
    %8 = arith.truncf %7 : vector<16x896xf32> to vector<16x896xbf16>
    %c0_6 = arith.constant 0 : index
    %c0_7 = arith.constant 0 : index
    %9 = vector.load %arg4[%c0_6, %c0_7] : memref<896x384xbf16, #tpu.memory_space<vmem>>, vector<896x384xbf16>
    %cst_8 = arith.constant dense<0.000000e+00> : vector<16x384xf32>
    %10 = tpu.matmul %8, %9, %cst_8 {dimension_numbers = #tpu.dot_dimension_numbers<[1], [0], [0], [1], [0, 0, 1, 1], [], []>} : vector<16x896xbf16>, vector<896x384xbf16>, vector<16x384xf32> -> vector<16x384xf32>
    %c0_9 = arith.constant 0 : index
    %c0_10 = arith.constant 0 : index
    %11 = vector.load %arg5[%c0_9, %c0_10] : memref<1x384xf32, #tpu.memory_space<vmem>>, vector<1x384xf32>
    %12 = vector.broadcast %11 : vector<1x384xf32> to vector<16x384xf32>
    %13 = arith.addf %10, %12 : vector<16x384xf32>
    %cst_11 = arith.constant 0.000000e+00 : f32
    %14 = vector.broadcast %cst_11 : f32 to vector<16x384xf32>
    %15 = arith.maximumf %13, %14 : vector<16x384xf32>
    %16 = arith.truncf %15 : vector<16x384xf32> to vector<16x384xbf16>
    %c0_12 = arith.constant 0 : index
    %c0_13 = arith.constant 0 : index
    %17 = vector.load %arg6[%c0_12, %c0_13] : memref<384x256xbf16, #tpu.memory_space<vmem>>, vector<384x256xbf16>
    %cst_14 = arith.constant dense<0.000000e+00> : vector<16x256xf32>
    %18 = tpu.matmul %16, %17, %cst_14 {dimension_numbers = #tpu.dot_dimension_numbers<[1], [0], [0], [1], [0, 0, 1, 1], [], []>} : vector<16x384xbf16>, vector<384x256xbf16>, vector<16x256xf32> -> vector<16x256xf32>
    %c0_15 = arith.constant 0 : index
    %c0_16 = arith.constant 0 : index
    %19 = vector.load %arg7[%c0_15, %c0_16] : memref<1x256xf32, #tpu.memory_space<vmem>>, vector<1x256xf32>
    %20 = vector.broadcast %19 : vector<1x256xf32> to vector<16x256xf32>
    %21 = arith.addf %18, %20 : vector<16x256xf32>
    %cst_17 = arith.constant 0.000000e+00 : f32
    %22 = vector.broadcast %cst_17 : f32 to vector<16x256xf32>
    %23 = arith.maximumf %21, %22 : vector<16x256xf32>
    %24 = arith.truncf %23 : vector<16x256xf32> to vector<16x256xbf16>
    %c0_18 = arith.constant 0 : index
    %c0_19 = arith.constant 0 : index
    %25 = vector.load %arg8[%c0_18, %c0_19] : memref<256x128xbf16, #tpu.memory_space<vmem>>, vector<256x128xbf16>
    %cst_20 = arith.constant dense<0.000000e+00> : vector<16x128xf32>
    %26 = tpu.matmul %24, %25, %cst_20 {dimension_numbers = #tpu.dot_dimension_numbers<[1], [0], [0], [1], [0, 0, 1, 1], [], []>} : vector<16x256xbf16>, vector<256x128xbf16>, vector<16x128xf32> -> vector<16x128xf32>
    %c0_21 = arith.constant 0 : index
    %c0_22 = arith.constant 0 : index
    %27 = vector.load %arg9[%c0_21, %c0_22] : memref<1x128xf32, #tpu.memory_space<vmem>>, vector<1x128xf32>
    %28 = vector.broadcast %27 : vector<1x128xf32> to vector<16x128xf32>
    %29 = arith.addf %26, %28 : vector<16x128xf32>
    %c0_23 = arith.constant 0 : index
    %c0_24 = arith.constant 0 : index
    %30 = vector.load %arg10[%c0_23, %c0_24] : memref<16x128xf32, #tpu.memory_space<vmem>>, vector<16x128xf32>
    tpu.vector_store %arg10[%c0_23, %c0_24], %29 {strides = array<i32>} : memref<16x128xf32, #tpu.memory_space<vmem>>, vector<16x128xf32>,
    return
  }
  func.func @transform_0(%arg0: i32) -> (i32, i32) {
    %c0_i32 = arith.constant 0 : i32
    %c0_i32_0 = arith.constant 0 : i32
    return %arg0, %c0_i32 : i32, i32
  }
  func.func @transform_1(%arg0: i32) -> (i32, i32) {
    %c0_i32 = arith.constant 0 : i32
    %c0_i32_0 = arith.constant 0 : i32
    %c0_i32_1 = arith.constant 0 : i32
    return %c0_i32, %c0_i32_0 : i32, i32
  }
  func.func @transform_2(%arg0: i32) -> (i32, i32) {
    %c0_i32 = arith.constant 0 : i32
    %c0_i32_0 = arith.constant 0 : i32
    %c0_i32_1 = arith.constant 0 : i32
    return %c0_i32, %c0_i32_0 : i32, i32
  }
  func.func @transform_3(%arg0: i32) -> (i32, i32) {
    %c0_i32 = arith.constant 0 : i32
    %c0_i32_0 = arith.constant 0 : i32
    %c0_i32_1 = arith.constant 0 : i32
    return %c0_i32, %c0_i32_0 : i32, i32
  }
  func.func @transform_4(%arg0: i32) -> (i32, i32) {
    %c0_i32 = arith.constant 0 : i32
    %c0_i32_0 = arith.constant 0 : i32
    %c0_i32_1 = arith.constant 0 : i32
    return %c0_i32, %c0_i32_0 : i32, i32
  }
  func.func @transform_5(%arg0: i32) -> (i32, i32) {
    %c0_i32 = arith.constant 0 : i32
    %c0_i32_0 = arith.constant 0 : i32
    %c0_i32_1 = arith.constant 0 : i32
    return %c0_i32, %c0_i32_0 : i32, i32
  }
  func.func @transform_6(%arg0: i32) -> (i32, i32) {
    %c0_i32 = arith.constant 0 : i32
    %c0_i32_0 = arith.constant 0 : i32
    %c0_i32_1 = arith.constant 0 : i32
    return %c0_i32, %c0_i32_0 : i32, i32
  }
  func.func @transform_7(%arg0: i32) -> (i32, i32) {
    %c0_i32 = arith.constant 0 : i32
    %c0_i32_0 = arith.constant 0 : i32
    %c0_i32_1 = arith.constant 0 : i32
    return %c0_i32, %c0_i32_0 : i32, i32
  }
  func.func @transform_8(%arg0: i32) -> (i32, i32) {
    %c0_i32 = arith.constant 0 : i32
    %c0_i32_0 = arith.constant 0 : i32
    %c0_i32_1 = arith.constant 0 : i32
    return %c0_i32, %c0_i32_0 : i32, i32
  }
  func.func @transform_9(%arg0: i32) -> (i32, i32) {
    %c0_i32 = arith.constant 0 : i32
    %c0_i32_0 = arith.constant 0 : i32
    return %arg0, %c0_i32 : i32, i32
  }
}

</mosaic_0001>

<bundles_post_ra>
// kernel: _forward_ensemble.1
= control target key start
LH: loop header
LB: loop body
LE: loop exit
PB: predicated region body
PF: predicated region fallthrough
CT: control target
= control target key end

     0   :  { %14 = vsyncpa [#allocation3], 0  ;;  %s8286_s0 = inlined_call_operand.vmem [shape: bf16[16,1024], index: 0, kind: input, shape index: {}]   ;;  %s8287_s1 = inlined_call_operand.hbm [shape: bf16[1024,896], index: 1, kind: input, shape index: {}]   ;;  %s8288_s2 = inlined_call_operand.hbm [shape: f32[1,896], index: 2, kind: input, shape index: {}]   ;;  %s8289_s3 = inlined_call_operand.hbm [shape: bf16[896,384], index: 3, kind: input, shape index: {}]   ;;  %s8290_s4 = inlined_call_operand.hbm [shape: f32[1,384], index: 4, kind: input, shape index: {}]   ;;  %s8291_s5 = inlined_call_operand.hbm [shape: bf16[384,256], index: 5, kind: input, shape index: {}]   ;;  %s8292_s6 = inlined_call_operand.hbm [shape: f32[1,256], index: 6, kind: input, shape index: {}]   ;;  %s8293_s7 = inlined_call_operand.hbm [shape: bf16[256,128], index: 7, kind: input, shape index: {}]   ;;  %s8294_s8 = inlined_call_operand.hbm [shape: f32[1,128], index: 8, kind: input, shape index: {}]   ;;  %s8295_s9 = inlined_call_operand.vmem [shape: f32[16,128], index: 9, kind: output, shape index: {}]  }
   0x1   :  { %15 = vsyncpa [#allocation5], 0 }
   0x2   :  { %16 = vsyncpa [#allocation8], 0 }
   0x3   :  { %17 = vsyncpa [#allocation11], 0 }
   0x4   :  { %18 = vsyncpa [#allocation14], 0  ;;  %s7920_s30 = smov [#allocation4]   ;;  %s7921_s11 = smov [#allocation7]  }
   0x5   :  { %s39_s10 = sshll.u32 %s7920_s30, 4  ;;  %s61_s12 = sshll.u32 %s7921_s11, 4  ;;  %s40_s10 = int_to_ptr.vmem [resolvable:$true] %s39_s10  ;;  %s62_s12 = int_to_ptr.vmem [resolvable:$true] %s61_s12 }
   0x6   :  { %s7734_s15 = scalar_lea.hbm %s8288_s2, 112 }
   0x7   :  { %p7735_p0 = scmp.ne.s32.totalorder %s8288_s2, %s7734_s15  ;;  %p7738_p1 = scmp.lt.u32.totalorder %s7734_s15, %s8288_s2 }
   0x9   :  { %p7740_p2 = pnand %p7738_p1, %p7735_p0 }
   0xb   :  { %7743 = shalt.err (!%p7740_p2)
}
   0xc   :  { %s7744_s20 = scalar_lea.vmem %s40_s10, 112  ;;  %s7748_s21 = scalar_lea.vmem %s40_s10, 128 }
   0xd   :  { %p7745_p3 = scmp.ne.s32.totalorder %s40_s10, %s7744_s20  ;;  %p7749_p4 = scmp.lt.s32.totalorder %s40_s10, %s40_s10 }
   0xe   :  { %p7750_p5 = scmp.lt.s32.totalorder %s7748_s21, %s7744_s20 }
  0x10   :  { %p7751_p6 = por %p7750_p5, %p7749_p4 }
  0x12   :  { %p7752_p7 = pnand %p7751_p6, %p7745_p3 }
  0x14   :  { %7755 = shalt.err (!%p7752_p7)
}
  0x15   :  { %42 = dma.hbm_to_vmem [thread:$0]  %s8288_s2, 112, %s40_s10, [#allocation5]  }
  0x16   :  { %s7756_s26 = scalar_lea.hbm %s8290_s4, 48 }
  0x17   :  { %p7757_p8 = scmp.ne.s32.totalorder %s8290_s4, %s7756_s26  ;;  %p7760_p9 = scmp.lt.u32.totalorder %s7756_s26, %s8290_s4 }
  0x19   :  { %p7762_p10 = pnand %p7760_p9, %p7757_p8 }
  0x1b   :  { %7765 = shalt.err (!%p7762_p10)
}
  0x1c   :  { %s7766_s11 = scalar_lea.vmem %s62_s12, 48  ;;  %s7770_s13 = scalar_lea.vmem %s62_s12, 64 }
  0x1d   :  { %p7767_p11 = scmp.ne.s32.totalorder %s62_s12, %s7766_s11  ;;  %p7771_p12 = scmp.lt.s32.totalorder %s62_s12, %s62_s12 }
  0x1e   :  { %p7772_p13 = scmp.lt.s32.totalorder %s7770_s13, %s7766_s11 }
  0x20   :  { %p7773_p0 = por %p7772_p13, %p7771_p12 }
  0x22   :  { %p7774_p1 = pnand %p7773_p0, %p7767_p11 }
  0x24   :  { %7777 = shalt.err (!%p7774_p1)
}
  0x25   :  { %64 = dma.hbm_to_vmem [thread:$0]  %s8290_s4, 48, %s62_s12, [#allocation8]  }
  0x26   :  { %s7922_s14 = smov [#allocation10]   ;;  %s7923_s16 = smov [#allocation2]  }
  0x27   :  { %s83_s15 = sshll.u32 %s7922_s14, 4  ;;  %s26_s17 = sshll.u32 %s7923_s16, 4  ;;  %s84_s15 = int_to_ptr.vmem [resolvable:$true] %s83_s15  ;;  %s8013_s17 = int_to_ptr.vmem [resolvable:$true] %s26_s17 }
  0x28   :  { %s7778_s20 = scalar_lea.hbm %s8292_s6, 32 }
  0x29   :  { %p7779_p2 = scmp.ne.s32.totalorder %s8292_s6, %s7778_s20  ;;  %p7782_p3 = scmp.lt.u32.totalorder %s7778_s20, %s8292_s6 }
  0x2b   :  { %p7784_p4 = pnand %p7782_p3, %p7779_p2 }
  0x2d   :  { %7787 = shalt.err (!%p7784_p4)
}
  0x2e   :  { %s7788_s4 = scalar_lea.vmem %s84_s15, 32  ;;  %p7793_p6 = scmp.lt.s32.totalorder %s84_s15, %s84_s15 }
  0x2f   :  { %p7789_p5 = scmp.ne.s32.totalorder %s84_s15, %s7788_s4  ;;  %p7794_p7 = scmp.lt.s32.totalorder %s7788_s4, %s7788_s4 }
  0x31   :  { %p7795_p8 = por %p7794_p7, %p7793_p6 }
  0x33   :  { %p7796_p9 = pnand %p7795_p8, %p7789_p5 }
  0x35   :  { %7799 = shalt.err (!%p7796_p9)
}
  0x36   :  { %86 = dma.hbm_to_vmem [thread:$0]  %s8292_s6, 32, %s84_s15, [#allocation11]  }
  0x37   :  { %s7800_s28 = scalar_lea.hbm %s8287_s1, 57344 }
  0x38   :  { %p7801_p10 = scmp.ne.s32.totalorder %s8287_s1, %s7800_s28  ;;  %p7804_p11 = scmp.lt.u32.totalorder %s7800_s28, %s8287_s1 }
  0x3a   :  { %p7806_p12 = pnand %p7804_p11, %p7801_p10 }
  0x3c   :  { %7809 = shalt.err (!%p7806_p12)
}
  0x3d   :  { %s7810_s2 = scalar_lea.vmem %s8013_s17, 57344  ;;  %p7815_p0 = scmp.lt.s32.totalorder %s8013_s17, %s8013_s17 }
  0x3e   :  { %p7811_p13 = scmp.ne.s32.totalorder %s8013_s17, %s7810_s2  ;;  %p7816_p1 = scmp.lt.s32.totalorder %s7810_s2, %s7810_s2 }
  0x40   :  { %p7817_p2 = por %p7816_p1, %p7815_p0 }
  0x42   :  { %p7818_p3 = pnand %p7817_p2, %p7811_p13 }
  0x44   :  { %7821 = shalt.err (!%p7818_p3)
}
  0x45   :  { %s7924_s6 = smov 448   ;;  %s7925_s10 = smov 28  }
  0x46   :  { %32 = dma.hbm_to_vmem [thread:$0]  %s8287_s1, 57344, %s8013_s17, [#allocation3], %s7924_s6, %s7924_s6, %s7925_s10  }
  0x47   :  { %s7926_s16 = smov [#allocation6]   ;;  %s7822_s21 = scalar_lea.hbm %s8289_s3, 21504 }
  0x48   :  { %s48_s18 = sshll.u32 %s7926_s16, 4  ;;  %p7823_p4 = scmp.ne.s32.totalorder %s8289_s3, %s7822_s21  ;;  %s49_s18 = int_to_ptr.vmem [resolvable:$true] %s48_s18 }
  0x49   :  { %p7826_p5 = scmp.lt.u32.totalorder %s7822_s21, %s8289_s3 }
  0x4b   :  { %p7828_p6 = pnand %p7826_p5, %p7823_p4 }
  0x4d   :  { %7831 = shalt.err (!%p7828_p6)
}
  0x4e   :  { %s7832_s12 = scalar_lea.vmem %s49_s18, 21504  ;;  %p7837_p8 = scmp.lt.s32.totalorder %s49_s18, %s49_s18 }
  0x4f   :  { %p7833_p7 = scmp.ne.s32.totalorder %s49_s18, %s7832_s12  ;;  %p7838_p9 = scmp.lt.s32.totalorder %s7832_s12, %s7832_s12 }
  0x51   :  { %p7839_p10 = por %p7838_p9, %p7837_p8 }
  0x53   :  { %p7840_p11 = pnand %p7839_p10, %p7833_p7 }
  0x55   :  { %7843 = shalt.err (!%p7840_p11)
}
  0x56   :  { %s7927_s1 = smov 192   ;;  %s7928_s17 = smov 12  }
  0x57   :  { %54 = dma.hbm_to_vmem [thread:$0]  %s8289_s3, 21504, %s49_s18, [#allocation5], %s7927_s1, %s7927_s1, %s7928_s17  }
  0x58   :  { %s7929_s27 = smov [#allocation9]   ;;  %s7844_s11 = scalar_lea.hbm %s8291_s5, 6144 }
  0x59   :  { %s70_s28 = sshll.u32 %s7929_s27, 4  ;;  %p7845_p12 = scmp.ne.s32.totalorder %s8291_s5, %s7844_s11  ;;  %s71_s28 = int_to_ptr.vmem [resolvable:$true] %s70_s28 }
  0x5a   :  { %p7848_p13 = scmp.lt.u32.totalorder %s7844_s11, %s8291_s5 }
  0x5c   :  { %p7850_p0 = pnand %p7848_p13, %p7845_p12 }
  0x5e   :  { %7853 = shalt.err (!%p7850_p0)
}
  0x5f   :  { %s7854_s14 = scalar_lea.vmem %s71_s28, 6144  ;;  %p7859_p2 = scmp.lt.s32.totalorder %s71_s28, %s71_s28 }
  0x60   :  { %p7855_p1 = scmp.ne.s32.totalorder %s71_s28, %s7854_s14  ;;  %p7860_p3 = scmp.lt.s32.totalorder %s7854_s14, %s7854_s14 }
  0x62   :  { %p7861_p4 = por %p7860_p3, %p7859_p2 }
  0x64   :  { %p7862_p5 = pnand %p7861_p4, %p7855_p1 }
  0x66   :  { %7865 = shalt.err (!%p7862_p5)
}
  0x67   :  { %s7930_s3 = smov 128   ;;  %s7931_s15 = smov 8  }
  0x68   :  { %76 = dma.hbm_to_vmem [thread:$0]  %s8291_s5, 6144, %s71_s28, [#allocation8], %s7930_s3, %s7930_s3, %s7931_s15  }
  0x69   :  { %s7932_s19 = smov [#allocation12]   ;;  %s7866_s23 = scalar_lea.hbm %s8293_s7, 2048 }
  0x6a   :  { %s92_s20 = sshll.u32 %s7932_s19, 4  ;;  %p7867_p6 = scmp.ne.s32.totalorder %s8293_s7, %s7866_s23  ;;  %s93_s20 = int_to_ptr.vmem [resolvable:$true] %s92_s20 }
  0x6b   :  { %p7870_p7 = scmp.lt.u32.totalorder %s7866_s23, %s8293_s7 }
  0x6d   :  { %p7872_p8 = pnand %p7870_p7, %p7867_p6 }
  0x6f   :  { %7875 = shalt.err (!%p7872_p8)
}
  0x70   :  { %s7876_s17 = scalar_lea.vmem %s93_s20, 2048  ;;  %p7881_p10 = scmp.lt.s32.totalorder %s93_s20, %s93_s20 }
  0x71   :  { %p7877_p9 = scmp.ne.s32.totalorder %s93_s20, %s7876_s17  ;;  %p7882_p11 = scmp.lt.s32.totalorder %s7876_s17, %s7876_s17 }
  0x73   :  { %p7883_p12 = por %p7882_p11, %p7881_p10 }
  0x75   :  { %p7884_p13 = pnand %p7883_p12, %p7877_p9 }
  0x77   :  { %7887 = shalt.err (!%p7884_p13)
}
  0x78   :  { %s7933_s5 = smov 64   ;;  %s7934_s25 = smov 4  }
  0x79   :  { %98 = dma.hbm_to_vmem [thread:$0]  %s8293_s7, 2048, %s93_s20, [#allocation11], %s7933_s5, %s7933_s5, %s7934_s25  }
  0x7a   :  { %s7935_s28 = smov [#allocation13]   ;;  %s7888_s13 = scalar_lea.hbm %s8294_s8, 16 }
  0x7b   :  { %s105_s29 = sshll.u32 %s7935_s28, 4  ;;  %p7889_p0 = scmp.ne.s32.totalorder %s8294_s8, %s7888_s13  ;;  %s106_s29 = int_to_ptr.vmem [resolvable:$true] %s105_s29 }
  0x7c   :  { %p7892_p1 = scmp.lt.u32.totalorder %s7888_s13, %s8294_s8 }
  0x7e   :  { %p7894_p2 = pnand %p7892_p1, %p7889_p0 }
  0x80   :  { %7897 = shalt.err (!%p7894_p2)
}
  0x81   :  { %s7898_s3 = scalar_lea.vmem %s106_s29, 16  ;;  %s7902_s7 = scalar_lea.vmem %s106_s29, 32 }
  0x82   :  { %p7899_p3 = scmp.ne.s32.totalorder %s106_s29, %s7898_s3  ;;  %p7903_p4 = scmp.lt.s32.totalorder %s106_s29, %s106_s29 }
  0x83   :  { %p7904_p5 = scmp.lt.s32.totalorder %s7902_s7, %s7898_s3 }
  0x85   :  { %p7905_p6 = por %p7904_p5, %p7903_p4 }
  0x87   :  { %p7906_p7 = pnand %p7905_p6, %p7899_p3 }
  0x89   :  { %7909 = shalt.err (!%p7906_p7)
}
  0x8a   :  { %108 = dma.hbm_to_vmem [thread:$0]  %s8294_s8, 16, %s106_s29, [#allocation14]  }
  0x8b   :  { %7910 = dma.done.wait [#allocation3], 57344  }
  0x8c   :  { %7911 = vsyncadd [#allocation3], 4294909952 }
  0x8d   :  { %7912 = dma.done.wait [#allocation5], 21616  }
  0x8e   :  { %7913 = vsyncadd [#allocation5], 4294945680 }
  0x8f   :  { %7914 = dma.done.wait [#allocation8], 6192  }
  0x90   :  { %7915 = vsyncadd [#allocation8], 4294961104 }
  0x91   :  { %7916 = dma.done.wait [#allocation11], 2080  }
  0x92   :  { %7917 = vsyncadd [#allocation11], 4294965216 }
  0x93   :  { %7918 = dma.done.wait [#allocation14], 16  }
  0x94   :  { %7919 = vsyncadd [#allocation14], 4294967280  ;;  %v6782_v0 = vld [vmem:[#allocation2 + $0x4] ss:$28 sps:$4 sm:$0xff]   ;;  %v6784_v1 = vld [vmem:[#allocation2 + $0xc] ss:$28 sps:$4 sm:$0xff]  }
  0x95   :  { %3035 = vmatprep.subr.bf16.mxu0 %v6782_v0  ;;  %v6786_v2 = vld [vmem:[#allocation2] ss:$28 sps:$4 sm:$0xff]   ;;  %v6787_v3 = vld [vmem:[#allocation2 + $0x8] ss:$28 sps:$4 sm:$0xff]   ;;  %3207 = vmatprep.subr.bf16.mxu1 %v6784_v1  ;;  %v6792_v6 = vld [vmem:[#allocation2 + $0x38] ss:$28 sps:$4 sm:$0xff]  }
  0x96   :  { %v6788_v4 = vld [vmem:[#allocation2 + $0x3c] ss:$28 sps:$4 sm:$0xff]   ;;  %3036 = vmatpush1.bf16.msra.mxu0 %v6786_v2  ;;  %3208 = vmatpush1.bf16.msra.mxu1 %v6787_v3  ;;  %v6790_v5 = vld [vmem:[#allocation2 + $0x44] ss:$28 sps:$4 sm:$0xff]   ;;  %v6794_v8 = vld [vmem:[#allocation2 + $0x74] ss:$28 sps:$4 sm:$0xff]  }
  0x97   :  { %3037 = vmatprep.subr.bf16.mxu0 %v6788_v4  ;;  %v6793_v7 = vld [vmem:[#allocation2 + $0x40] ss:$28 sps:$4 sm:$0xff]   ;;  %3209 = vmatprep.subr.bf16.mxu1 %v6790_v5  ;;  %v6798_v10 = vld [vmem:[#allocation2 + $0x70] ss:$28 sps:$4 sm:$0xff]   ;;  %v6799_v11 = vld [vmem:[#allocation2 + $0x78] ss:$28 sps:$4 sm:$0xff]  }
  0x98   :  { %v6796_v9 = vld [vmem:[#allocation2 + $0x7c] ss:$28 sps:$4 sm:$0xff]   ;;  %v6800_v12 = vld [vmem:[#allocation2 + $0xac] ss:$28 sps:$4 sm:$0xff]   ;;  %v6802_v13 = vld [vmem:[#allocation2 + $0xb4] ss:$28 sps:$4 sm:$0xff]  }
  0x99   :  { %v6804_v14 = vld [vmem:[#allocation2 + $0xa8] ss:$28 sps:$4 sm:$0xff]   ;;  %v6805_v15 = vld [vmem:[#allocation2 + $0xb0] ss:$28 sps:$4 sm:$0xff]   ;;  %v6810_v18 = vld [vmem:[#allocation2 + $0xe0] ss:$28 sps:$4 sm:$0xff]  }
  0x9a   :  { %3038 = vmatpush1.bf16.msra.mxu0 %v6792_v6  ;;  %3210 = vmatpush1.bf16.msra.mxu1 %v6793_v7  ;;  %v6806_v16 = vld [vmem:[#allocation2 + $0xe4] ss:$28 sps:$4 sm:$0xff]   ;;  %v6808_v17 = vld [vmem:[#allocation2 + $0xec] ss:$28 sps:$4 sm:$0xff]   ;;  %v6812_v20 = vld [vmem:[#allocation2 + $0x11c] ss:$28 sps:$4 sm:$0xff]  }
  0x9b   :  { %3039 = vmatprep.subr.bf16.mxu0 %v6794_v8  ;;  %3211 = vmatprep.subr.bf16.mxu1 %v6796_v9  ;;  %v6811_v19 = vld [vmem:[#allocation2 + $0xe8] ss:$28 sps:$4 sm:$0xff]   ;;  %v6816_v22 = vld [vmem:[#allocation2 + $0x118] ss:$28 sps:$4 sm:$0xff]   ;;  %v6817_v23 = vld [vmem:[#allocation2 + $0x120] ss:$28 sps:$4 sm:$0xff]  }
  0x9c   :  { %v6814_v21 = vld [vmem:[#allocation2 + $0x124] ss:$28 sps:$4 sm:$0xff]   ;;  %v6818_v24 = vld [vmem:[#allocation2 + $0x154] ss:$28 sps:$4 sm:$0xff]   ;;  %v6820_v25 = vld [vmem:[#allocation2 + $0x15c] ss:$28 sps:$4 sm:$0xff]  }
  0x9d   :  { %v6822_v26 = vld [vmem:[#allocation2 + $0x150] ss:$28 sps:$4 sm:$0xff]   ;;  %v6823_v27 = vld [vmem:[#allocation2 + $0x158] ss:$28 sps:$4 sm:$0xff]   ;;  %v6828_v30 = vld [vmem:[#allocation2 + $0x188] ss:$28 sps:$4 sm:$0xff]  }
  0x9e   :  { %3040 = vmatpush1.bf16.msra.mxu0 %v6798_v10  ;;  %3212 = vmatpush1.bf16.msra.mxu1 %v6799_v11  ;;  %v6824_v28 = vld [vmem:[#allocation2 + $0x18c] ss:$28 sps:$4 sm:$0xff]   ;;  %v6826_v29 = vld [vmem:[#allocation2 + $0x194] ss:$28 sps:$4 sm:$0xff]   ;;  %v6830_v32 = vld [vmem:[#allocation2 + $0x1c4] ss:$28 sps:$4 sm:$0xff]  }
  0x9f   :  { %3041 = vmatprep.subr.bf16.mxu0 %v6800_v12  ;;  %3213 = vmatprep.subr.bf16.mxu1 %v6802_v13  ;;  %v6829_v31 = vld [vmem:[#allocation2 + $0x190] ss:$28 sps:$4 sm:$0xff]   ;;  %v6834_v34 = vld [vmem:[#allocation2 + $0x1c0] ss:$28 sps:$4 sm:$0xff]   ;;  %v6835_v35 = vld [vmem:[#allocation2 + $0x1c8] ss:$28 sps:$4 sm:$0xff]  }
  0xa0   :  { %v6832_v33 = vld [vmem:[#allocation2 + $0x1cc] ss:$28 sps:$4 sm:$0xff]   ;;  %v6836_v36 = vld [vmem:[#allocation2 + $0x1fc] ss:$28 sps:$4 sm:$0xff]   ;;  %v6838_v37 = vld [vmem:[#allocation2 + $0x204] ss:$28 sps:$4 sm:$0xff]  }
  0xa1   :  { %v6840_v38 = vld [vmem:[#allocation2 + $0x1f8] ss:$28 sps:$4 sm:$0xff]   ;;  %v6841_v39 = vld [vmem:[#allocation2 + $0x200] ss:$28 sps:$4 sm:$0xff]   ;;  %v6846_v42 = vld [vmem:[#allocation2 + $0x230] ss:$28 sps:$4 sm:$0xff]  }
  0xa2   :  { %3042 = vmatpush1.bf16.msra.mxu0 %v6804_v14  ;;  %3214 = vmatpush1.bf16.msra.mxu1 %v6805_v15  ;;  %v6842_v40 = vld [vmem:[#allocation2 + $0x234] ss:$28 sps:$4 sm:$0xff]   ;;  %v6844_v41 = vld [vmem:[#allocation2 + $0x23c] ss:$28 sps:$4 sm:$0xff]   ;;  %v6848_v44 = vld [vmem:[#allocation2 + $0x26c] ss:$28 sps:$4 sm:$0xff]  }
  0xa3   :  { %3043 = vmatprep.subr.bf16.mxu0 %v6806_v16  ;;  %3215 = vmatprep.subr.bf16.mxu1 %v6808_v17  ;;  %v6847_v43 = vld [vmem:[#allocation2 + $0x238] ss:$28 sps:$4 sm:$0xff]   ;;  %v134_v46 = vld [vmem:[%s8286_s0] sm:$0xff]  ;;  %v6853_v49 = vld [vmem:[#allocation2 + $0x270] ss:$28 sps:$4 sm:$0xff]   ;;  %vm7938_vm0 = vmmov 0  }
  0xa4   :  { %v6850_v45 = vld [vmem:[#allocation2 + $0x274] ss:$28 sps:$4 sm:$0xff]   ;;  %v138_v47 = vld [vmem:[%s8286_s0 + $0x20] sm:$0xff]  ;;  %v6856_v52 = vld [vmem:[#allocation2 + $0x2ac] ss:$28 sps:$4 sm:$0xff]  }
  0xa5   :  { %v6852_v48 = vld [vmem:[#allocation2 + $0x268] ss:$28 sps:$4 sm:$0xff]   ;;  %v8098_v50 = vcombine.high %v134_v46, %v138_v47  ;;  %v6858_v53 = vld [vmem:[#allocation2 + $0x2a0] ss:$28 sps:$4 sm:$0xff]   ;;  %v6864_v57 = vld [vmem:[#allocation2 + $0x2d8] ss:$28 sps:$4 sm:$0xff]   ;;  %v8102_v5 = vcombine.low %v134_v46, %v138_v47 }
  0xa6   :  { %3044 = vmatpush1.bf16.msra.mxu0 %v6810_v18  ;;  %3216 = vmatpush1.bf16.msra.mxu1 %v6811_v19  ;;  %v6854_v51 = vld [vmem:[#allocation2 + $0x2a4] ss:$28 sps:$4 sm:$0xff]   ;;  %v6860_v55 = vld [vmem:[#allocation2 + $0x2dc] ss:$28 sps:$4 sm:$0xff]   ;;  %v6866_v59 = vld [vmem:[#allocation2 + $0x314] ss:$28 sps:$4 sm:$0xff]  }
  0xa7   :  { %3045 = vmatprep.subr.bf16.mxu0 %v6812_v20  ;;  %3217 = vmatprep.subr.bf16.mxu1 %v6814_v21  ;;  %v6859_v54 = vld [vmem:[#allocation2 + $0x2a8] ss:$28 sps:$4 sm:$0xff]   ;;  %v6865_v58 = vld [vmem:[#allocation2 + $0x2e0] ss:$28 sps:$4 sm:$0xff]   ;;  %v6870_v61 = vld [vmem:[#allocation2 + $0x310] ss:$28 sps:$4 sm:$0xff]  }
  0xa8   :  { %3067 = vmatprep.mubr.bf16.mxu0 %v8098_v50  ;;  %3239 = vmatprep.mubr.bf16.mxu1 %v8098_v50  ;;  %v6862_v56 = vld [vmem:[#allocation2 + $0x2e4] ss:$28 sps:$4 sm:$0xff]   ;;  %v6868_v60 = vld [vmem:[#allocation2 + $0x31c] ss:$28 sps:$4 sm:$0xff]   ;;  %v6872_v63 = vld [vmem:[#allocation2 + $0x34c] ss:$28 sps:$4 sm:$0xff]  }
  0xa9   :  { %v6871_v62 = vld [vmem:[#allocation2 + $0x318] ss:$28 sps:$4 sm:$0xff]   ;;  %v6876_v1 = vld [vmem:[#allocation2 + $0x348] ss:$28 sps:$4 sm:$0xff]   ;;  %v6877_v2 = vld [vmem:[#allocation2 + $0x350] ss:$28 sps:$4 sm:$0xff]  }
  0xaa   :  { %3046 = vmatpush1.bf16.msra.mxu0 %v6816_v22  ;;  %3218 = vmatpush1.bf16.msra.mxu1 %v6817_v23  ;;  %v6874_v0 = vld [vmem:[#allocation2 + $0x354] ss:$28 sps:$4 sm:$0xff]   ;;  %v6880_v3 = vld [vmem:[#allocation2 + $0x384] ss:$28 sps:$4 sm:$0xff]   ;;  %v6883_v4 = vld [vmem:[#allocation2 + $0x38c] ss:$28 sps:$4 sm:$0xff]  }
  0xab   :  { %3047 = vmatprep.subr.bf16.mxu0 %v6818_v24  ;;  %3219 = vmatprep.subr.bf16.mxu1 %v6820_v25  ;;  %v6878_v6 = vld [vmem:[#allocation2 + $0x380] ss:$28 sps:$4 sm:$0xff]   ;;  %v6881_v7 = vld [vmem:[#allocation2 + $0x388] ss:$28 sps:$4 sm:$0xff]   ;;  %v6884_v10 = vld [vmem:[#allocation2 + $0x3b8] ss:$28 sps:$4 sm:$0xff]  }
  0xac   :  { %v6886_v8 = vld [vmem:[#allocation2 + $0x3bc] ss:$28 sps:$4 sm:$0xff]   ;;  %v6889_v9 = vld [vmem:[#allocation2 + $0x3c4] ss:$28 sps:$4 sm:$0xff]   ;;  %v6892_v12 = vld [vmem:[#allocation2 + $0x3f4] ss:$28 sps:$4 sm:$0xff]  }
  0xad   :  { %v6887_v11 = vld [vmem:[#allocation2 + $0x3c0] ss:$28 sps:$4 sm:$0xff]   ;;  %v6890_v14 = vld [vmem:[#allocation2 + $0x3f0] ss:$28 sps:$4 sm:$0xff]   ;;  %v6893_v15 = vld [vmem:[#allocation2 + $0x3f8] ss:$28 sps:$4 sm:$0xff]  }
  0xae   :  { %3048 = vmatpush1.bf16.msra.mxu0 %v6822_v26  ;;  %3220 = vmatpush1.bf16.msra.mxu1 %v6823_v27  ;;  %v6895_v13 = vld [vmem:[#allocation2 + $0x3fc] ss:$28 sps:$4 sm:$0xff]   ;;  %v6898_v16 = vld [vmem:[#allocation2 + $0x42c] ss:$28 sps:$4 sm:$0xff]   ;;  %v6901_v17 = vld [vmem:[#allocation2 + $0x434] ss:$28 sps:$4 sm:$0xff]  }
  0xaf   :  { %3049 = vmatprep.subr.bf16.mxu0 %v6824_v28  ;;  %3221 = vmatprep.subr.bf16.mxu1 %v6826_v29  ;;  %v6896_v18 = vld [vmem:[#allocation2 + $0x428] ss:$28 sps:$4 sm:$0xff]   ;;  %v6899_v19 = vld [vmem:[#allocation2 + $0x430] ss:$28 sps:$4 sm:$0xff]   ;;  %v6902_v22 = vld [vmem:[#allocation2 + $0x460] ss:$28 sps:$4 sm:$0xff]  }
  0xb0   :  { %v6904_v20 = vld [vmem:[#allocation2 + $0x464] ss:$28 sps:$4 sm:$0xff]   ;;  %v6907_v21 = vld [vmem:[#allocation2 + $0x46c] ss:$28 sps:$4 sm:$0xff]   ;;  %v6910_v24 = vld [vmem:[#allocation2 + $0x49c] ss:$28 sps:$4 sm:$0xff]  }
  0xb1   :  { %v6905_v23 = vld [vmem:[#allocation2 + $0x468] ss:$28 sps:$4 sm:$0xff]   ;;  %v6908_v26 = vld [vmem:[#allocation2 + $0x498] ss:$28 sps:$4 sm:$0xff]   ;;  %v6911_v27 = vld [vmem:[#allocation2 + $0x4a0] ss:$28 sps:$4 sm:$0xff]  }
  0xb2   :  { %3050 = vmatpush1.bf16.msra.mxu0 %v6828_v30  ;;  %3222 = vmatpush1.bf16.msra.mxu1 %v6829_v31  ;;  %v6913_v25 = vld [vmem:[#allocation2 + $0x4a4] ss:$28 sps:$4 sm:$0xff]   ;;  %v6916_v28 = vld [vmem:[#allocation2 + $0x4d4] ss:$28 sps:$4 sm:$0xff]   ;;  %v6919_v29 = vld [vmem:[#allocation2 + $0x4dc] ss:$28 sps:$4 sm:$0xff]  }
  0xb3   :  { %3051 = vmatprep.subr.bf16.mxu0 %v6830_v32  ;;  %3223 = vmatprep.subr.bf16.mxu1 %v6832_v33  ;;  %v8109_v30 = vld [vmem:[%s8286_s0 + $0x8] sm:$0xff]  ;;  %v6917_v33 = vld [vmem:[#allocation2 + $0x4d8] ss:$28 sps:$4 sm:$0xff]   ;;  %v6935_v46 = vld [vmem:[#allocation2 + $0x580] ss:$28 sps:$4 sm:$0xff]  }
  0xb4   :  { %v8114_v31 = vld [vmem:[%s8286_s0 + $0x28] sm:$0xff]  ;;  %v6940_v47 = vld [vmem:[#allocation2 + $0x5b4] ss:$28 sps:$4 sm:$0xff]  }
  0xb5   :  { %v6914_v32 = vld [vmem:[#allocation2 + $0x4d0] ss:$28 sps:$4 sm:$0xff]  }
  0xb6   :  { %3052 = vmatpush1.bf16.msra.mxu0 %v6834_v34  ;;  %3224 = vmatpush1.bf16.msra.mxu1 %v6835_v35  ;;  %v8118_v34 = vcombine.high %v8109_v30, %v8114_v31  ;;  %v6922_v35 = vld [vmem:[#allocation2 + $0x50c] ss:$28 sps:$4 sm:$0xff]  }
  0xb7   :  { %3053 = vmatprep.subr.bf16.mxu0 %v6836_v36  ;;  %3225 = vmatprep.subr.bf16.mxu1 %v6838_v37  ;;  %v6925_v36 = vld [vmem:[#allocation2 + $0x514] ss:$28 sps:$4 sm:$0xff]   ;;  %v6920_v37 = vld [vmem:[#allocation2 + $0x508] ss:$28 sps:$4 sm:$0xff]  }
  0xba   :  { %3054 = vmatpush1.bf16.msra.mxu0 %v6840_v38  ;;  %3226 = vmatpush1.bf16.msra.mxu1 %v6841_v39  ;;  %v6923_v38 = vld [vmem:[#allocation2 + $0x510] ss:$28 sps:$4 sm:$0xff]   ;;  %v6928_v39 = vld [vmem:[#allocation2 + $0x544] ss:$28 sps:$4 sm:$0xff]  }
  0xbb   :  { %3055 = vmatprep.subr.bf16.mxu0 %v6842_v40  ;;  %3227 = vmatprep.subr.bf16.mxu1 %v6844_v41  ;;  %v6931_v40 = vld [vmem:[#allocation2 + $0x54c] ss:$28 sps:$4 sm:$0xff]   ;;  %v6926_v41 = vld [vmem:[#allocation2 + $0x540] ss:$28 sps:$4 sm:$0xff]  }
  0xbe   :  { %3056 = vmatpush1.bf16.msra.mxu0 %v6846_v42  ;;  %3228 = vmatpush1.bf16.msra.mxu1 %v6847_v43  ;;  %v6929_v42 = vld [vmem:[#allocation2 + $0x548] ss:$28 sps:$4 sm:$0xff]   ;;  %v6934_v43 = vld [vmem:[#allocation2 + $0x57c] ss:$28 sps:$4 sm:$0xff]  }
  0xbf   :  { %3057 = vmatprep.subr.bf16.mxu0 %v6848_v44  ;;  %3229 = vmatprep.subr.bf16.mxu1 %v6850_v45  ;;  %v6937_v44 = vld [vmem:[#allocation2 + $0x584] ss:$28 sps:$4 sm:$0xff]   ;;  %v6932_v45 = vld [vmem:[#allocation2 + $0x578] ss:$28 sps:$4 sm:$0xff]  }
  0xc2   :  { %3058 = vmatpush1.bf16.msra.mxu0 %v6852_v48  ;;  %3230 = vmatpush1.bf16.msra.mxu1 %v6853_v49  ;;  %v6943_v48 = vld [vmem:[#allocation2 + $0x5bc] ss:$28 sps:$4 sm:$0xff]   ;;  %v6938_v49 = vld [vmem:[#allocation2 + $0x5b0] ss:$28 sps:$4 sm:$0xff]  }
  0xc3   :  { %3059 = vmatprep.subr.bf16.mxu0 %v6854_v51  ;;  %3231 = vmatprep.subr.bf16.mxu1 %v6856_v52  ;;  %v6941_v51 = vld [vmem:[#allocation2 + $0x5b8] ss:$28 sps:$4 sm:$0xff]   ;;  %v6946_v52 = vld [vmem:[#allocation2 + $0x5ec] ss:$28 sps:$4 sm:$0xff]  }
  0xc6   :  { %3060 = vmatpush1.bf16.msra.mxu0 %v6858_v53  ;;  %3232 = vmatpush1.bf16.msra.mxu1 %v6859_v54  ;;  %v6949_v53 = vld [vmem:[#allocation2 + $0x5f4] ss:$28 sps:$4 sm:$0xff]   ;;  %v6944_v54 = vld [vmem:[#allocation2 + $0x5e8] ss:$28 sps:$4 sm:$0xff]  }
  0xc7   :  { %3061 = vmatprep.subr.bf16.mxu0 %v6860_v55  ;;  %3233 = vmatprep.subr.bf16.mxu1 %v6862_v56  ;;  %v6947_v55 = vld [vmem:[#allocation2 + $0x5f0] ss:$28 sps:$4 sm:$0xff]   ;;  %v6952_v56 = vld [vmem:[#allocation2 + $0x624] ss:$28 sps:$4 sm:$0xff]  }
  0xca   :  { %3062 = vmatpush1.bf16.msra.mxu0 %v6864_v57  ;;  %3234 = vmatpush1.bf16.msra.mxu1 %v6865_v58  ;;  %v6955_v57 = vld [vmem:[#allocation2 + $0x62c] ss:$28 sps:$4 sm:$0xff]   ;;  %v6950_v58 = vld [vmem:[#allocation2 + $0x620] ss:$28 sps:$4 sm:$0xff]  }
  0xcb   :  { %3063 = vmatprep.subr.bf16.mxu0 %v6866_v59  ;;  %3235 = vmatprep.subr.bf16.mxu1 %v6868_v60  ;;  %v6953_v59 = vld [vmem:[#allocation2 + $0x628] ss:$28 sps:$4 sm:$0xff]   ;;  %v6958_v60 = vld [vmem:[#allocation2 + $0x65c] ss:$28 sps:$4 sm:$0xff]  }
  0xce   :  { %3064 = vmatpush1.bf16.msra.mxu0 %v6870_v61  ;;  %3236 = vmatpush1.bf16.msra.mxu1 %v6871_v62  ;;  %v6961_v61 = vld [vmem:[#allocation2 + $0x664] ss:$28 sps:$4 sm:$0xff]   ;;  %v6956_v62 = vld [vmem:[#allocation2 + $0x658] ss:$28 sps:$4 sm:$0xff]  }
  0xcf   :  { %3065 = vmatprep.subr.bf16.mxu0 %v6872_v63  ;;  %3237 = vmatprep.subr.bf16.mxu1 %v6874_v0  ;;  %v6959_v63 = vld [vmem:[#allocation2 + $0x660] ss:$28 sps:$4 sm:$0xff]   ;;  %v6964_v0 = vld [vmem:[#allocation2 + $0x694] ss:$28 sps:$4 sm:$0xff]  }
  0xd2   :  { %3066 = vmatpush1.bf16.msra.mxu0 %v6876_v1  ;;  %3238 = vmatpush1.bf16.msra.mxu1 %v6877_v2  ;;  %v6967_v1 = vld [vmem:[#allocation2 + $0x69c] ss:$28 sps:$4 sm:$0xff]   ;;  %v6962_v2 = vld [vmem:[#allocation2 + $0x690] ss:$28 sps:$4 sm:$0xff]  }
  0xd3   :  { %3078 = vmatprep.subr.bf16.mxu0 %v6880_v3  ;;  %3250 = vmatprep.subr.bf16.mxu1 %v6883_v4  ;;  %v6965_v3 = vld [vmem:[#allocation2 + $0x698] ss:$28 sps:$4 sm:$0xff]   ;;  %v6970_v4 = vld [vmem:[#allocation2 + $0x6cc] ss:$28 sps:$4 sm:$0xff]  }
  0xd5   :  { %3068 = vmatmul.mubr.bf16.vlgmr.msra.gmra.mrb[0].mxu0 %v8102_v5  ;;  %3240 = vmatmul.mubr.bf16.vlgmr.msra.gmra.mrb[0].mxu1 %v8102_v5 }
  0xd6   :  { %3079 = vmatpush1.bf16.msra.mxu0 %v6878_v6  ;;  %3251 = vmatpush1.bf16.msra.mxu1 %v6881_v7  ;;  %v6973_v6 = vld [vmem:[#allocation2 + $0x6d4] ss:$28 sps:$4 sm:$0xff]   ;;  %v6968_v7 = vld [vmem:[#allocation2 + $0x6c8] ss:$28 sps:$4 sm:$0xff]  }
  0xd7   :  { %3080 = vmatprep.subr.bf16.mxu0 %v6886_v8  ;;  %3252 = vmatprep.subr.bf16.mxu1 %v6889_v9  ;;  %v6971_v8 = vld [vmem:[#allocation2 + $0x6d0] ss:$28 sps:$4 sm:$0xff]   ;;  %v6976_v9 = vld [vmem:[#allocation2 + $0x704] ss:$28 sps:$4 sm:$0xff]  }
  0xd8   :  { %3110 = vmatprep.mubr.bf16.mxu0 %v8118_v34  ;;  %3282 = vmatprep.mubr.bf16.mxu1 %v8118_v34 }
  0xda   :  { %3081 = vmatpush1.bf16.msra.mxu0 %v6884_v10  ;;  %3253 = vmatpush1.bf16.msra.mxu1 %v6887_v11  ;;  %v6979_v10 = vld [vmem:[#allocation2 + $0x70c] ss:$28 sps:$4 sm:$0xff]   ;;  %v6974_v11 = vld [vmem:[#allocation2 + $0x700] ss:$28 sps:$4 sm:$0xff]  }
  0xdb   :  { %3082 = vmatprep.subr.bf16.mxu0 %v6892_v12  ;;  %3254 = vmatprep.subr.bf16.mxu1 %v6895_v13  ;;  %v6977_v12 = vld [vmem:[#allocation2 + $0x708] ss:$28 sps:$4 sm:$0xff]   ;;  %v8124_v13 = vcombine.low %v8109_v30, %v8114_v31  ;;  %v6998_v31 = vld [vmem:[#allocation2 + $0x7e0] ss:$28 sps:$4 sm:$0xff]  }
  0xdc   :  { %v7003_v30 = vld [vmem:[#allocation2 + $0x7ec] ss:$28 sps:$4 sm:$0xff]  }
  0xde   :  { %3083 = vmatpush1.bf16.msra.mxu0 %v6890_v14  ;;  %3255 = vmatpush1.bf16.msra.mxu1 %v6893_v15  ;;  %v6982_v14 = vld [vmem:[#allocation2 + $0x73c] ss:$28 sps:$4 sm:$0xff]   ;;  %v6985_v15 = vld [vmem:[#allocation2 + $0x744] ss:$28 sps:$4 sm:$0xff]  }
  0xdf   :  { %3084 = vmatprep.subr.bf16.mxu0 %v6898_v16  ;;  %3256 = vmatprep.subr.bf16.mxu1 %v6901_v17  ;;  %v8129_v16 = vld [vmem:[%s8286_s0 + $0x10] sm:$0xff] }
  0xe0   :  { %v8134_v17 = vld [vmem:[%s8286_s0 + $0x30] sm:$0xff] }
  0xe2   :  { %3085 = vmatpush1.bf16.msra.mxu0 %v6896_v18  ;;  %3257 = vmatpush1.bf16.msra.mxu1 %v6899_v19  ;;  %v8138_v18 = vcombine.high %v8129_v16, %v8134_v17  ;;  %v6980_v19 = vld [vmem:[#allocation2 + $0x738] ss:$28 sps:$4 sm:$0xff]  }
  0xe3   :  { %3086 = vmatprep.subr.bf16.mxu0 %v6904_v20  ;;  %3258 = vmatprep.subr.bf16.mxu1 %v6907_v21  ;;  %v6983_v20 = vld [vmem:[#allocation2 + $0x740] ss:$28 sps:$4 sm:$0xff]   ;;  %v6988_v21 = vld [vmem:[#allocation2 + $0x774] ss:$28 sps:$4 sm:$0xff]  }
  0xe6   :  { %3087 = vmatpush1.bf16.msra.mxu0 %v6902_v22  ;;  %3259 = vmatpush1.bf16.msra.mxu1 %v6905_v23  ;;  %v6991_v22 = vld [vmem:[#allocation2 + $0x77c] ss:$28 sps:$4 sm:$0xff]   ;;  %v6986_v23 = vld [vmem:[#allocation2 + $0x770] ss:$28 sps:$4 sm:$0xff]  }
  0xe7   :  { %3088 = vmatprep.subr.bf16.mxu0 %v6910_v24  ;;  %3260 = vmatprep.subr.bf16.mxu1 %v6913_v25  ;;  %v6989_v24 = vld [vmem:[#allocation2 + $0x778] ss:$28 sps:$4 sm:$0xff]   ;;  %v6994_v25 = vld [vmem:[#allocation2 + $0x7ac] ss:$28 sps:$4 sm:$0xff]  }
  0xea   :  { %3089 = vmatpush1.bf16.msra.mxu0 %v6908_v26  ;;  %3261 = vmatpush1.bf16.msra.mxu1 %v6911_v27  ;;  %v6997_v26 = vld [vmem:[#allocation2 + $0x7b4] ss:$28 sps:$4 sm:$0xff]   ;;  %v6992_v27 = vld [vmem:[#allocation2 + $0x7a8] ss:$28 sps:$4 sm:$0xff]  }
  0xeb   :  { %3090 = vmatprep.subr.bf16.mxu0 %v6916_v28  ;;  %3262 = vmatprep.subr.bf16.mxu1 %v6919_v29  ;;  %v6995_v28 = vld [vmem:[#allocation2 + $0x7b0] ss:$28 sps:$4 sm:$0xff]   ;;  %v7000_v29 = vld [vmem:[#allocation2 + $0x7e4] ss:$28 sps:$4 sm:$0xff]  }
  0xee   :  { %3091 = vmatpush1.bf16.msra.mxu0 %v6914_v32  ;;  %3263 = vmatpush1.bf16.msra.mxu1 %v6917_v33  ;;  %v7001_v32 = vld [vmem:[#allocation2 + $0x7e8] ss:$28 sps:$4 sm:$0xff]   ;;  %v7006_v33 = vld [vmem:[#allocation2 + $0x81c] ss:$28 sps:$4 sm:$0xff]  }
  0xef   :  { %3092 = vmatprep.subr.bf16.mxu0 %v6922_v35  ;;  %3264 = vmatprep.subr.bf16.mxu1 %v6925_v36  ;;  %v7009_v35 = vld [vmem:[#allocation2 + $0x824] ss:$28 sps:$4 sm:$0xff]   ;;  %v7004_v36 = vld [vmem:[#allocation2 + $0x818] ss:$28 sps:$4 sm:$0xff]  }
  0xf2   :  { %3093 = vmatpush1.bf16.msra.mxu0 %v6920_v37  ;;  %3265 = vmatpush1.bf16.msra.mxu1 %v6923_v38  ;;  %v7007_v37 = vld [vmem:[#allocation2 + $0x820] ss:$28 sps:$4 sm:$0xff]   ;;  %v7012_v38 = vld [vmem:[#allocation2 + $0x854] ss:$28 sps:$4 sm:$0xff]  }
  0xf3   :  { %3094 = vmatprep.subr.bf16.mxu0 %v6928_v39  ;;  %3266 = vmatprep.subr.bf16.mxu1 %v6931_v40  ;;  %v7015_v39 = vld [vmem:[#allocation2 + $0x85c] ss:$28 sps:$4 sm:$0xff]   ;;  %v7010_v40 = vld [vmem:[#allocation2 + $0x850] ss:$28 sps:$4 sm:$0xff]  }
  0xf6   :  { %3095 = vmatpush1.bf16.msra.mxu0 %v6926_v41  ;;  %3267 = vmatpush1.bf16.msra.mxu1 %v6929_v42  ;;  %v7013_v41 = vld [vmem:[#allocation2 + $0x858] ss:$28 sps:$4 sm:$0xff]   ;;  %v7018_v42 = vld [vmem:[#allocation2 + $0x88c] ss:$28 sps:$4 sm:$0xff]  }
  0xf7   :  { %3096 = vmatprep.subr.bf16.mxu0 %v6934_v43  ;;  %3268 = vmatprep.subr.bf16.mxu1 %v6937_v44  ;;  %v7021_v43 = vld [vmem:[#allocation2 + $0x894] ss:$28 sps:$4 sm:$0xff]   ;;  %v7016_v44 = vld [vmem:[#allocation2 + $0x888] ss:$28 sps:$4 sm:$0xff]  }
  0xfa   :  { %3097 = vmatpush1.bf16.msra.mxu0 %v6932_v45  ;;  %3269 = vmatpush1.bf16.msra.mxu1 %v6935_v46  ;;  %v7019_v45 = vld [vmem:[#allocation2 + $0x890] ss:$28 sps:$4 sm:$0xff]   ;;  %v7024_v46 = vld [vmem:[#allocation2 + $0x8c4] ss:$28 sps:$4 sm:$0xff]  }
  0xfb   :  { %3098 = vmatprep.subr.bf16.mxu0 %v6940_v47  ;;  %3270 = vmatprep.subr.bf16.mxu1 %v6943_v48  ;;  %v7027_v47 = vld [vmem:[#allocation2 + $0x8cc] ss:$28 sps:$4 sm:$0xff]   ;;  %v7022_v48 = vld [vmem:[#allocation2 + $0x8c0] ss:$28 sps:$4 sm:$0xff]  }
  0xfe   :  { %3099 = vmatpush1.bf16.msra.mxu0 %v6938_v49  ;;  %3271 = vmatpush1.bf16.msra.mxu1 %v6941_v51  ;;  %v7025_v49 = vld [vmem:[#allocation2 + $0x8c8] ss:$28 sps:$4 sm:$0xff]   ;;  %v7030_v51 = vld [vmem:[#allocation2 + $0x8fc] ss:$28 sps:$4 sm:$0xff]  }
  0xff   :  { %3100 = vmatprep.subr.bf16.mxu0 %v6946_v52  ;;  %3272 = vmatprep.subr.bf16.mxu1 %v6949_v53  ;;  %v7033_v52 = vld [vmem:[#allocation2 + $0x904] ss:$28 sps:$4 sm:$0xff]   ;;  %v7028_v53 = vld [vmem:[#allocation2 + $0x8f8] ss:$28 sps:$4 sm:$0xff]  }
 0x102   :  { %3101 = vmatpush1.bf16.msra.mxu0 %v6944_v54  ;;  %3273 = vmatpush1.bf16.msra.mxu1 %v6947_v55  ;;  %v7031_v54 = vld [vmem:[#allocation2 + $0x900] ss:$28 sps:$4 sm:$0xff]   ;;  %v7036_v55 = vld [vmem:[#allocation2 + $0x934] ss:$28 sps:$4 sm:$0xff]  }
 0x103   :  { %3102 = vmatprep.subr.bf16.mxu0 %v6952_v56  ;;  %3274 = vmatprep.subr.bf16.mxu1 %v6955_v57  ;;  %v7039_v56 = vld [vmem:[#allocation2 + $0x93c] ss:$28 sps:$4 sm:$0xff]   ;;  %v7034_v57 = vld [vmem:[#allocation2 + $0x930] ss:$28 sps:$4 sm:$0xff]  }
 0x106   :  { %3103 = vmatpush1.bf16.msra.mxu0 %v6950_v58  ;;  %3275 = vmatpush1.bf16.msra.mxu1 %v6953_v59  ;;  %v7037_v58 = vld [vmem:[#allocation2 + $0x938] ss:$28 sps:$4 sm:$0xff]   ;;  %v7042_v59 = vld [vmem:[#allocation2 + $0x96c] ss:$28 sps:$4 sm:$0xff]  }
 0x107   :  { %3104 = vmatprep.subr.bf16.mxu0 %v6958_v60  ;;  %3276 = vmatprep.subr.bf16.mxu1 %v6961_v61  ;;  %v7045_v60 = vld [vmem:[#allocation2 + $0x974] ss:$28 sps:$4 sm:$0xff]   ;;  %v7040_v61 = vld [vmem:[#allocation2 + $0x968] ss:$28 sps:$4 sm:$0xff]  }
 0x10a   :  { %3105 = vmatpush1.bf16.msra.mxu0 %v6956_v62  ;;  %3277 = vmatpush1.bf16.msra.mxu1 %v6959_v63  ;;  %v7043_v62 = vld [vmem:[#allocation2 + $0x970] ss:$28 sps:$4 sm:$0xff]   ;;  %v7048_v63 = vld [vmem:[#allocation2 + $0x9a4] ss:$28 sps:$4 sm:$0xff]  }
 0x10b   :  { %3106 = vmatprep.subr.bf16.mxu0 %v6964_v0  ;;  %3278 = vmatprep.subr.bf16.mxu1 %v6967_v1  ;;  %v7051_v0 = vld [vmem:[#allocation2 + $0x9ac] ss:$28 sps:$4 sm:$0xff]   ;;  %v7046_v1 = vld [vmem:[#allocation2 + $0x9a0] ss:$28 sps:$4 sm:$0xff]  }
 0x10e   :  { %3107 = vmatpush1.bf16.msra.mxu0 %v6962_v2  ;;  %3279 = vmatpush1.bf16.msra.mxu1 %v6965_v3  ;;  %v7049_v2 = vld [vmem:[#allocation2 + $0x9a8] ss:$28 sps:$4 sm:$0xff]   ;;  %v7054_v3 = vld [vmem:[#allocation2 + $0x9dc] ss:$28 sps:$4 sm:$0xff]  }
 0x10f   :  { %3108 = vmatprep.subr.bf16.mxu0 %v6970_v4  ;;  %3280 = vmatprep.subr.bf16.mxu1 %v6973_v6  ;;  %v7057_v4 = vld [vmem:[#allocation2 + $0x9e4] ss:$28 sps:$4 sm:$0xff]   ;;  %v7052_v6 = vld [vmem:[#allocation2 + $0x9d8] ss:$28 sps:$4 sm:$0xff]  }
 0x112   :  { %3109 = vmatpush1.bf16.msra.mxu0 %v6968_v7  ;;  %3281 = vmatpush1.bf16.msra.mxu1 %v6971_v8  ;;  %v7055_v7 = vld [vmem:[#allocation2 + $0x9e0] ss:$28 sps:$4 sm:$0xff]   ;;  %v7060_v8 = vld [vmem:[#allocation2 + $0xa14] ss:$28 sps:$4 sm:$0xff]  }
 0x113   :  { %3121 = vmatprep.subr.bf16.mxu0 %v6976_v9  ;;  %3293 = vmatprep.subr.bf16.mxu1 %v6979_v10  ;;  %v7063_v9 = vld [vmem:[#allocation2 + $0xa1c] ss:$28 sps:$4 sm:$0xff]   ;;  %v7058_v10 = vld [vmem:[#allocation2 + $0xa10] ss:$28 sps:$4 sm:$0xff]  }
 0x115   :  { %3111 = vmatmul.mubr.bf16.vlgmr.msra.gmra.mrb[0].mxu0 %v8124_v13  ;;  %3283 = vmatmul.mubr.bf16.vlgmr.msra.gmra.mrb[0].mxu1 %v8124_v13 }
 0x116   :  { %3122 = vmatpush1.bf16.msra.mxu0 %v6974_v11  ;;  %3294 = vmatpush1.bf16.msra.mxu1 %v6977_v12  ;;  %v7061_v11 = vld [vmem:[#allocation2 + $0xa18] ss:$28 sps:$4 sm:$0xff]   ;;  %v7066_v12 = vld [vmem:[#allocation2 + $0xa4c] ss:$28 sps:$4 sm:$0xff]  }
 0x117   :  { %3123 = vmatprep.subr.bf16.mxu0 %v6982_v14  ;;  %3295 = vmatprep.subr.bf16.mxu1 %v6985_v15  ;;  %v7069_v14 = vld [vmem:[#allocation2 + $0xa54] ss:$28 sps:$4 sm:$0xff]   ;;  %v7064_v15 = vld [vmem:[#allocation2 + $0xa48] ss:$28 sps:$4 sm:$0xff]  }
 0x118   :  { %3153 = vmatprep.mubr.bf16.mxu0 %v8138_v18  ;;  %3325 = vmatprep.mubr.bf16.mxu1 %v8138_v18 }
 0x11a   :  { %3124 = vmatpush1.bf16.msra.mxu0 %v6980_v19  ;;  %3296 = vmatpush1.bf16.msra.mxu1 %v6983_v20  ;;  %v7067_v19 = vld [vmem:[#allocation2 + $0xa50] ss:$28 sps:$4 sm:$0xff]   ;;  %v7072_v20 = vld [vmem:[#allocation2 + $0xa84] ss:$28 sps:$4 sm:$0xff]  }
 0x11b   :  { %3125 = vmatprep.subr.bf16.mxu0 %v6988_v21  ;;  %3297 = vmatprep.subr.bf16.mxu1 %v6991_v22  ;;  %v7075_v21 = vld [vmem:[#allocation2 + $0xa8c] ss:$28 sps:$4 sm:$0xff]   ;;  %v7070_v22 = vld [vmem:[#allocation2 + $0xa80] ss:$28 sps:$4 sm:$0xff]  }
 0x11e   :  { %3126 = vmatpush1.bf16.msra.mxu0 %v6986_v23  ;;  %3298 = vmatpush1.bf16.msra.mxu1 %v6989_v24  ;;  %v8147_v23 = vld [vmem:[%s8286_s0 + $0x18] sm:$0xff]  ;;  %v8151_v24 = vcombine.low %v8129_v16, %v8134_v17  ;;  %v7084_v17 = vld [vmem:[#allocation2 + $0xaf4] ss:$28 sps:$4 sm:$0xff]  }
 0x11f   :  { %3127 = vmatprep.subr.bf16.mxu0 %v6994_v25  ;;  %3299 = vmatprep.subr.bf16.mxu1 %v6997_v26  ;;  %v8156_v25 = vld [vmem:[%s8286_s0 + $0x38] sm:$0xff]  ;;  %v7073_v26 = vld [vmem:[#allocation2 + $0xa88] ss:$28 sps:$4 sm:$0xff]  }
 0x120   :  { %v7079_v16 = vld [vmem:[#allocation2 + $0xac0] ss:$28 sps:$4 sm:$0xff]  }
 0x122   :  { %3128 = vmatpush1.bf16.msra.mxu0 %v6992_v27  ;;  %3300 = vmatpush1.bf16.msra.mxu1 %v6995_v28  ;;  %v7078_v27 = vld [vmem:[#allocation2 + $0xabc] ss:$28 sps:$4 sm:$0xff]   ;;  %v7081_v28 = vld [vmem:[#allocation2 + $0xac4] ss:$28 sps:$4 sm:$0xff]  }
 0x123   :  { %3129 = vmatprep.subr.bf16.mxu0 %v7000_v29  ;;  %3301 = vmatprep.subr.bf16.mxu1 %v7003_v30  ;;  %v7076_v29 = vld [vmem:[#allocation2 + $0xab8] ss:$28 sps:$4 sm:$0xff]   ;;  %v8160_v30 = vcombine.high %v8147_v23, %v8156_v25 }
 0x126   :  { %3130 = vmatpush1.bf16.msra.mxu0 %v6998_v31  ;;  %3302 = vmatpush1.bf16.msra.mxu1 %v7001_v32  ;;  %v7087_v31 = vld [vmem:[#allocation2 + $0xafc] ss:$28 sps:$4 sm:$0xff]   ;;  %v7082_v32 = vld [vmem:[#allocation2 + $0xaf0] ss:$28 sps:$4 sm:$0xff]  }
 0x127   :  { %3131 = vmatprep.subr.bf16.mxu0 %v7006_v33  ;;  %3303 = vmatprep.subr.bf16.mxu1 %v7009_v35  ;;  %v7085_v33 = vld [vmem:[#allocation2 + $0xaf8] ss:$28 sps:$4 sm:$0xff]   ;;  %v7090_v35 = vld [vmem:[#allocation2 + $0xb2c] ss:$28 sps:$4 sm:$0xff]  }
 0x12a   :  { %3132 = vmatpush1.bf16.msra.mxu0 %v7004_v36  ;;  %3304 = vmatpush1.bf16.msra.mxu1 %v7007_v37  ;;  %v7093_v36 = vld [vmem:[#allocation2 + $0xb34] ss:$28 sps:$4 sm:$0xff]   ;;  %v7088_v37 = vld [vmem:[#allocation2 + $0xb28] ss:$28 sps:$4 sm:$0xff]  }
 0x12b   :  { %3133 = vmatprep.subr.bf16.mxu0 %v7012_v38  ;;  %3305 = vmatprep.subr.bf16.mxu1 %v7015_v39  ;;  %v7091_v38 = vld [vmem:[#allocation2 + $0xb30] ss:$28 sps:$4 sm:$0xff]   ;;  %v7096_v39 = vld [vmem:[#allocation2 + $0xb64] ss:$28 sps:$4 sm:$0xff]  }
 0x12e   :  { %3134 = vmatpush1.bf16.msra.mxu0 %v7010_v40  ;;  %3306 = vmatpush1.bf16.msra.mxu1 %v7013_v41  ;;  %v7099_v40 = vld [vmem:[#allocation2 + $0xb6c] ss:$28 sps:$4 sm:$0xff]   ;;  %v7094_v41 = vld [vmem:[#allocation2 + $0xb60] ss:$28 sps:$4 sm:$0xff]  }
 0x12f   :  { %3135 = vmatprep.subr.bf16.mxu0 %v7018_v42  ;;  %3307 = vmatprep.subr.bf16.mxu1 %v7021_v43  ;;  %v7097_v42 = vld [vmem:[#allocation2 + $0xb68] ss:$28 sps:$4 sm:$0xff]   ;;  %v7102_v43 = vld [vmem:[#allocation2 + $0xb9c] ss:$28 sps:$4 sm:$0xff]  }
 0x132   :  { %3136 = vmatpush1.bf16.msra.mxu0 %v7016_v44  ;;  %3308 = vmatpush1.bf16.msra.mxu1 %v7019_v45  ;;  %v7105_v44 = vld [vmem:[#allocation2 + $0xba4] ss:$28 sps:$4 sm:$0xff]   ;;  %v7100_v45 = vld [vmem:[#allocation2 + $0xb98] ss:$28 sps:$4 sm:$0xff]  }
 0x133   :  { %3137 = vmatprep.subr.bf16.mxu0 %v7024_v46  ;;  %3309 = vmatprep.subr.bf16.mxu1 %v7027_v47  ;;  %v7103_v46 = vld [vmem:[#allocation2 + $0xba0] ss:$28 sps:$4 sm:$0xff]   ;;  %v7108_v47 = vld [vmem:[#allocation2 + $0xbd4] ss:$28 sps:$4 sm:$0xff]  }
 0x136   :  { %3138 = vmatpush1.bf16.msra.mxu0 %v7022_v48  ;;  %3310 = vmatpush1.bf16.msra.mxu1 %v7025_v49  ;;  %v7111_v48 = vld [vmem:[#allocation2 + $0xbdc] ss:$28 sps:$4 sm:$0xff]   ;;  %v7106_v49 = vld [vmem:[#allocation2 + $0xbd0] ss:$28 sps:$4 sm:$0xff]  }
 0x137   :  { %3139 = vmatprep.subr.bf16.mxu0 %v7030_v51  ;;  %3311 = vmatprep.subr.bf16.mxu1 %v7033_v52  ;;  %v7109_v51 = vld [vmem:[#allocation2 + $0xbd8] ss:$28 sps:$4 sm:$0xff]   ;;  %v7114_v52 = vld [vmem:[#allocation2 + $0xc0c] ss:$28 sps:$4 sm:$0xff]  }
 0x13a   :  { %3140 = vmatpush1.bf16.msra.mxu0 %v7028_v53  ;;  %3312 = vmatpush1.bf16.msra.mxu1 %v7031_v54  ;;  %v7117_v53 = vld [vmem:[#allocation2 + $0xc14] ss:$28 sps:$4 sm:$0xff]   ;;  %v7112_v54 = vld [vmem:[#allocation2 + $0xc08] ss:$28 sps:$4 sm:$0xff]  }
 0x13b   :  { %3141 = vmatprep.subr.bf16.mxu0 %v7036_v55  ;;  %3313 = vmatprep.subr.bf16.mxu1 %v7039_v56  ;;  %v7115_v55 = vld [vmem:[#allocation2 + $0xc10] ss:$28 sps:$4 sm:$0xff]   ;;  %v7120_v56 = vld [vmem:[#allocation2 + $0xc44] ss:$28 sps:$4 sm:$0xff]  }
 0x13e   :  { %3142 = vmatpush1.bf16.msra.mxu0 %v7034_v57  ;;  %3314 = vmatpush1.bf16.msra.mxu1 %v7037_v58  ;;  %v7123_v57 = vld [vmem:[#allocation2 + $0xc4c] ss:$28 sps:$4 sm:$0xff]   ;;  %v7118_v58 = vld [vmem:[#allocation2 + $0xc40] ss:$28 sps:$4 sm:$0xff]  }
 0x13f   :  { %3143 = vmatprep.subr.bf16.mxu0 %v7042_v59  ;;  %3315 = vmatprep.subr.bf16.mxu1 %v7045_v60  ;;  %v7121_v59 = vld [vmem:[#allocation2 + $0xc48] ss:$28 sps:$4 sm:$0xff]   ;;  %v7126_v60 = vld [vmem:[#allocation2 + $0xc7c] ss:$28 sps:$4 sm:$0xff]  }
 0x142   :  { %3144 = vmatpush1.bf16.msra.mxu0 %v7040_v61  ;;  %3316 = vmatpush1.bf16.msra.mxu1 %v7043_v62  ;;  %v7129_v61 = vld [vmem:[#allocation2 + $0xc84] ss:$28 sps:$4 sm:$0xff]   ;;  %v7124_v62 = vld [vmem:[#allocation2 + $0xc78] ss:$28 sps:$4 sm:$0xff]  }
 0x143   :  { %3145 = vmatprep.subr.bf16.mxu0 %v7048_v63  ;;  %3317 = vmatprep.subr.bf16.mxu1 %v7051_v0  ;;  %v7127_v63 = vld [vmem:[#allocation2 + $0xc80] ss:$28 sps:$4 sm:$0xff]   ;;  %v7132_v0 = vld [vmem:[#allocation2 + $0xcb4] ss:$28 sps:$4 sm:$0xff]  }
 0x146   :  { %3146 = vmatpush1.bf16.msra.mxu0 %v7046_v1  ;;  %3318 = vmatpush1.bf16.msra.mxu1 %v7049_v2  ;;  %v7135_v1 = vld [vmem:[#allocation2 + $0xcbc] ss:$28 sps:$4 sm:$0xff]   ;;  %v7130_v2 = vld [vmem:[#allocation2 + $0xcb0] ss:$28 sps:$4 sm:$0xff]  }
 0x147   :  { %3147 = vmatprep.subr.bf16.mxu0 %v7054_v3  ;;  %3319 = vmatprep.subr.bf16.mxu1 %v7057_v4  ;;  %v7133_v3 = vld [vmem:[#allocation2 + $0xcb8] ss:$28 sps:$4 sm:$0xff]   ;;  %v7138_v4 = vld [vmem:[#allocation2 + $0xcec] ss:$28 sps:$4 sm:$0xff]  }
 0x14a   :  { %3148 = vmatpush1.bf16.msra.mxu0 %v7052_v6  ;;  %3320 = vmatpush1.bf16.msra.mxu1 %v7055_v7  ;;  %v7141_v6 = vld [vmem:[#allocation2 + $0xcf4] ss:$28 sps:$4 sm:$0xff]   ;;  %v7136_v7 = vld [vmem:[#allocation2 + $0xce8] ss:$28 sps:$4 sm:$0xff]  }
 0x14b   :  { %3149 = vmatprep.subr.bf16.mxu0 %v7060_v8  ;;  %3321 = vmatprep.subr.bf16.mxu1 %v7063_v9  ;;  %v7139_v8 = vld [vmem:[#allocation2 + $0xcf0] ss:$28 sps:$4 sm:$0xff]   ;;  %v7144_v9 = vld [vmem:[#allocation2 + $0xd24] ss:$28 sps:$4 sm:$0xff]  }
 0x14e   :  { %3150 = vmatpush1.bf16.msra.mxu0 %v7058_v10  ;;  %3322 = vmatpush1.bf16.msra.mxu1 %v7061_v11  ;;  %v7147_v10 = vld [vmem:[#allocation2 + $0xd2c] ss:$28 sps:$4 sm:$0xff]   ;;  %v7142_v11 = vld [vmem:[#allocation2 + $0xd20] ss:$28 sps:$4 sm:$0xff]  }
 0x14f   :  { %3151 = vmatprep.subr.bf16.mxu0 %v7066_v12  ;;  %3323 = vmatprep.subr.bf16.mxu1 %v7069_v14  ;;  %v7145_v12 = vld [vmem:[#allocation2 + $0xd28] ss:$28 sps:$4 sm:$0xff]   ;;  %v7150_v14 = vld [vmem:[#allocation2 + $0xd5c] ss:$28 sps:$4 sm:$0xff]  }
 0x152   :  { %3152 = vmatpush1.bf16.msra.mxu0 %v7064_v15  ;;  %3324 = vmatpush1.bf16.msra.mxu1 %v7067_v19  ;;  %v7153_v15 = vld [vmem:[#allocation2 + $0xd64] ss:$28 sps:$4 sm:$0xff]   ;;  %v7148_v19 = vld [vmem:[#allocation2 + $0xd58] ss:$28 sps:$4 sm:$0xff]  }
 0x153   :  { %3164 = vmatprep.subr.bf16.mxu0 %v7072_v20  ;;  %3336 = vmatprep.subr.bf16.mxu1 %v7075_v21  ;;  %v7151_v20 = vld [vmem:[#allocation2 + $0xd60] ss:$28 sps:$4 sm:$0xff]   ;;  %v7156_v21 = vld [vmem:[#allocation2 + $0xd94] ss:$28 sps:$4 sm:$0xff]  }
 0x155   :  { %3154 = vmatmul.mubr.bf16.vlgmr.msra.gmra.mrb[0].mxu0 %v8151_v24  ;;  %3326 = vmatmul.mubr.bf16.vlgmr.msra.gmra.mrb[0].mxu1 %v8151_v24 }
 0x156   :  { %3165 = vmatpush1.bf16.msra.mxu0 %v7070_v22  ;;  %3337 = vmatpush1.bf16.msra.mxu1 %v7073_v26  ;;  %v7159_v22 = vld [vmem:[#allocation2 + $0xd9c] ss:$28 sps:$4 sm:$0xff]   ;;  %v7154_v26 = vld [vmem:[#allocation2 + $0xd90] ss:$28 sps:$4 sm:$0xff]  }
 0x157   :  { %3166 = vmatprep.subr.bf16.mxu0 %v7078_v27  ;;  %3338 = vmatprep.subr.bf16.mxu1 %v7081_v28  ;;  %v7157_v27 = vld [vmem:[#allocation2 + $0xd98] ss:$28 sps:$4 sm:$0xff]   ;;  %v7162_v28 = vld [vmem:[#allocation2 + $0xdcc] ss:$28 sps:$4 sm:$0xff]  }
 0x158   :  { %3196 = vmatprep.mubr.bf16.mxu0 %v8160_v30  ;;  %3368 = vmatprep.mubr.bf16.mxu1 %v8160_v30 }
 0x15a   :  { %3167 = vmatpush1.bf16.msra.mxu0 %v7076_v29  ;;  %3339 = vmatpush1.bf16.msra.mxu1 %v7079_v16  ;;  %v7165_v29 = vld [vmem:[#allocation2 + $0xdd4] ss:$28 sps:$4 sm:$0xff]   ;;  %v7160_v16 = vld [vmem:[#allocation2 + $0xdc8] ss:$28 sps:$4 sm:$0xff]  }
 0x15b   :  { %3168 = vmatprep.subr.bf16.mxu0 %v7084_v17  ;;  %3340 = vmatprep.subr.bf16.mxu1 %v7087_v31  ;;  %v7163_v17 = vld [vmem:[#allocation2 + $0xdd0] ss:$28 sps:$4 sm:$0xff]  }
 0x15c   :  { %v7168_v31 = vld [vmem:[#allocation2 + $0x14] ss:$28 sps:$4 sm:$0xff]  }
 0x15e   :  { %3169 = vmatpush1.bf16.msra.mxu0 %v7082_v32  ;;  %3341 = vmatpush1.bf16.msra.mxu1 %v7085_v33  ;;  %v7190_v32 = vld [vmem:[#allocation2 + $0x1d8] ss:$28 sps:$4 sm:$0xff]   ;;  %v7166_v33 = vld [vmem:[#allocation2 + $0x10] ss:$28 sps:$4 sm:$0xff]  }
 0x15f   :  { %3170 = vmatprep.subr.bf16.mxu0 %v7090_v35  ;;  %3342 = vmatprep.subr.bf16.mxu1 %v7093_v36  ;;  %v8168_v35 = vcombine.low %v8147_v23, %v8156_v25  ;;  %v7171_v36 = vld [vmem:[#allocation2 + $0x4c] ss:$28 sps:$4 sm:$0xff]   ;;  %v7172_v25 = vld [vmem:[#allocation2 + $0x80] ss:$28 sps:$4 sm:$0xff]  }
 0x160   :  { %v7200_v23 = vld [vmem:[#allocation2 + $0x248] ss:$28 sps:$4 sm:$0xff]  }
 0x162   :  { %3171 = vmatpush1.bf16.msra.mxu0 %v7088_v37  ;;  %3343 = vmatpush1.bf16.msra.mxu1 %v7091_v38  ;;  %v7191_v37 = vld [vmem:[#allocation2 + $0x18] ss:$28 sps:$4 sm:$0xff]   ;;  %v7195_v38 = vld [vmem:[#allocation2 + $0x210] ss:$28 sps:$4 sm:$0xff]  }
 0x163   :  { %3172 = vmatprep.subr.bf16.mxu0 %v7096_v39  ;;  %3344 = vmatprep.subr.bf16.mxu1 %v7099_v40  ;;  %v7169_v39 = vld [vmem:[#allocation2 + $0x48] ss:$28 sps:$4 sm:$0xff]  }
 0x164   :  { %v7174_v40 = vld [vmem:[#allocation2 + $0x84] ss:$28 sps:$4 sm:$0xff]  }
 0x166   :  { %3173 = vmatpush1.bf16.msra.mxu0 %v7094_v41  ;;  %3345 = vmatpush1.bf16.msra.mxu1 %v7097_v42  ;;  %v7196_v41 = vld [vmem:[#allocation2 + $0x50] ss:$28 sps:$4 sm:$0xff]   ;;  %v7177_v42 = vld [vmem:[#allocation2 + $0xbc] ss:$28 sps:$4 sm:$0xff]  }
 0x167   :  { %3174 = vmatprep.subr.bf16.mxu0 %v7102_v43  ;;  %3346 = vmatprep.subr.bf16.mxu1 %v7105_v44  ;;  %v7201_v43 = vld [vmem:[#allocation2 + $0x88] ss:$28 sps:$4 sm:$0xff]   ;;  %v7205_v44 = vld [vmem:[#allocation2 + $0x280] ss:$28 sps:$4 sm:$0xff]  }
 0x16a   :  { %3175 = vmatpush1.bf16.msra.mxu0 %v7100_v45  ;;  %3347 = vmatpush1.bf16.msra.mxu1 %v7103_v46  ;;  %v7175_v45 = vld [vmem:[#allocation2 + $0xb8] ss:$28 sps:$4 sm:$0xff]  }
 0x16b   :  { %3176 = vmatprep.subr.bf16.mxu0 %v7108_v47  ;;  %3348 = vmatprep.subr.bf16.mxu1 %v7111_v48  ;;  %v7180_v46 = vld [vmem:[#allocation2 + $0xf4] ss:$28 sps:$4 sm:$0xff]   ;;  %v7206_v47 = vld [vmem:[#allocation2 + $0xc0] ss:$28 sps:$4 sm:$0xff]  }
 0x16c   :  { %v7210_v48 = vld [vmem:[#allocation2 + $0x2b8] ss:$28 sps:$4 sm:$0xff]  }
 0x16e   :  { %3177 = vmatpush1.bf16.msra.mxu0 %v7106_v49  ;;  %3349 = vmatpush1.bf16.msra.mxu1 %v7109_v51  ;;  %v7178_v49 = vld [vmem:[#allocation2 + $0xf0] ss:$28 sps:$4 sm:$0xff]  }
 0x16f   :  { %3178 = vmatprep.subr.bf16.mxu0 %v7114_v52  ;;  %3350 = vmatprep.subr.bf16.mxu1 %v7117_v53  ;;  %v7183_v51 = vld [vmem:[#allocation2 + $0x12c] ss:$28 sps:$4 sm:$0xff]  }
 0x170   :  { %v7215_v52 = vld [vmem:[#allocation2 + $0x2f0] ss:$28 sps:$4 sm:$0xff]   ;;  %v7181_v53 = vld [vmem:[#allocation2 + $0x128] ss:$28 sps:$4 sm:$0xff]  }
 0x172   :  { %3179 = vmatpush1.bf16.msra.mxu0 %v7112_v54  ;;  %3351 = vmatpush1.bf16.msra.mxu1 %v7115_v55  ;;  %v7186_v54 = vld [vmem:[#allocation2 + $0x164] ss:$28 sps:$4 sm:$0xff]   ;;  %v7216_v55 = vld [vmem:[#allocation2 + $0x130] ss:$28 sps:$4 sm:$0xff]  }
 0x173   :  { %3180 = vmatprep.subr.bf16.mxu0 %v7120_v56  ;;  %3352 = vmatprep.subr.bf16.mxu1 %v7123_v57  ;;  %v7220_v56 = vld [vmem:[#allocation2 + $0x328] ss:$28 sps:$4 sm:$0xff]   ;;  %v7184_v57 = vld [vmem:[#allocation2 + $0x160] ss:$28 sps:$4 sm:$0xff]  }
 0x176   :  { %3181 = vmatpush1.bf16.msra.mxu0 %v7118_v58  ;;  %3353 = vmatpush1.bf16.msra.mxu1 %v7121_v59  ;;  %v7189_v58 = vld [vmem:[#allocation2 + $0x19c] ss:$28 sps:$4 sm:$0xff]   ;;  %v7221_v59 = vld [vmem:[#allocation2 + $0x168] ss:$28 sps:$4 sm:$0xff]  }
 0x177   :  { %3182 = vmatprep.subr.bf16.mxu0 %v7126_v60  ;;  %3354 = vmatprep.subr.bf16.mxu1 %v7129_v61  ;;  %v7225_v60 = vld [vmem:[#allocation2 + $0x360] ss:$28 sps:$4 sm:$0xff]   ;;  %v7187_v61 = vld [vmem:[#allocation2 + $0x198] ss:$28 sps:$4 sm:$0xff]  }
 0x17a   :  { %3183 = vmatpush1.bf16.msra.mxu0 %v7124_v62  ;;  %3355 = vmatpush1.bf16.msra.mxu1 %v7127_v63  ;;  %v7194_v62 = vld [vmem:[#allocation2 + $0x1d4] ss:$28 sps:$4 sm:$0xff]   ;;  %v7226_v63 = vld [vmem:[#allocation2 + $0x1a0] ss:$28 sps:$4 sm:$0xff]  }
 0x17b   :  { %3184 = vmatprep.subr.bf16.mxu0 %v7132_v0  ;;  %3356 = vmatprep.subr.bf16.mxu1 %v7135_v1  ;;  %v7230_v0 = vld [vmem:[#allocation2 + $0x558] ss:$28 sps:$4 sm:$0xff]   ;;  %v7192_v1 = vld [vmem:[#allocation2 + $0x1d0] ss:$28 sps:$4 sm:$0xff]  }
 0x17e   :  { %3185 = vmatpush1.bf16.msra.mxu0 %v7130_v2  ;;  %3357 = vmatpush1.bf16.msra.mxu1 %v7133_v3  ;;  %v7199_v2 = vld [vmem:[#allocation2 + $0x20c] ss:$28 sps:$4 sm:$0xff]   ;;  %v7231_v3 = vld [vmem:[#allocation2 + $0x398] ss:$28 sps:$4 sm:$0xff]  }
 0x17f   :  { %3186 = vmatprep.subr.bf16.mxu0 %v7138_v4  ;;  %3358 = vmatprep.subr.bf16.mxu1 %v7141_v6  ;;  %v7235_v4 = vld [vmem:[#allocation2 + $0x590] ss:$28 sps:$4 sm:$0xff]   ;;  %v7197_v6 = vld [vmem:[#allocation2 + $0x208] ss:$28 sps:$4 sm:$0xff]  }
 0x182   :  { %3187 = vmatpush1.bf16.msra.mxu0 %v7136_v7  ;;  %3359 = vmatpush1.bf16.msra.mxu1 %v7139_v8  ;;  %v7204_v7 = vld [vmem:[#allocation2 + $0x244] ss:$28 sps:$4 sm:$0xff]   ;;  %v7236_v8 = vld [vmem:[#allocation2 + $0x3d0] ss:$28 sps:$4 sm:$0xff]  }
 0x183   :  { %3188 = vmatprep.subr.bf16.mxu0 %v7144_v9  ;;  %3360 = vmatprep.subr.bf16.mxu1 %v7147_v10  ;;  %v7240_v9 = vld [vmem:[#allocation2 + $0x5c8] ss:$28 sps:$4 sm:$0xff]   ;;  %v7202_v10 = vld [vmem:[#allocation2 + $0x240] ss:$28 sps:$4 sm:$0xff]  }
 0x186   :  { %3189 = vmatpush1.bf16.msra.mxu0 %v7142_v11  ;;  %3361 = vmatpush1.bf16.msra.mxu1 %v7145_v12  ;;  %v7209_v11 = vld [vmem:[#allocation2 + $0x27c] ss:$28 sps:$4 sm:$0xff]   ;;  %v7241_v12 = vld [vmem:[#allocation2 + $0x408] ss:$28 sps:$4 sm:$0xff]  }
 0x187   :  { %3190 = vmatprep.subr.bf16.mxu0 %v7150_v14  ;;  %3362 = vmatprep.subr.bf16.mxu1 %v7153_v15  ;;  %v7245_v14 = vld [vmem:[#allocation2 + $0x600] ss:$28 sps:$4 sm:$0xff]   ;;  %v7207_v15 = vld [vmem:[#allocation2 + $0x278] ss:$28 sps:$4 sm:$0xff]  }
 0x18a   :  { %3191 = vmatpush1.bf16.msra.mxu0 %v7148_v19  ;;  %3363 = vmatpush1.bf16.msra.mxu1 %v7151_v20  ;;  %v7214_v19 = vld [vmem:[#allocation2 + $0x2b4] ss:$28 sps:$4 sm:$0xff]   ;;  %v7246_v20 = vld [vmem:[#allocation2 + $0x440] ss:$28 sps:$4 sm:$0xff]  }
 0x18b   :  { %3192 = vmatprep.subr.bf16.mxu0 %v7156_v21  ;;  %3364 = vmatprep.subr.bf16.mxu1 %v7159_v22  ;;  %v7250_v21 = vld [vmem:[#allocation2 + $0x638] ss:$28 sps:$4 sm:$0xff]   ;;  %v7212_v22 = vld [vmem:[#allocation2 + $0x2b0] ss:$28 sps:$4 sm:$0xff]  }
 0x18e   :  { %3193 = vmatpush1.bf16.msra.mxu0 %v7154_v26  ;;  %3365 = vmatpush1.bf16.msra.mxu1 %v7157_v27  ;;  %v7219_v26 = vld [vmem:[#allocation2 + $0x2ec] ss:$28 sps:$4 sm:$0xff]   ;;  %v7251_v27 = vld [vmem:[#allocation2 + $0x478] ss:$28 sps:$4 sm:$0xff]  }
 0x18f   :  { %3194 = vmatprep.subr.bf16.mxu0 %v7162_v28  ;;  %3366 = vmatprep.subr.bf16.mxu1 %v7165_v29  ;;  %v7255_v28 = vld [vmem:[#allocation2 + $0x670] ss:$28 sps:$4 sm:$0xff]   ;;  %v7217_v29 = vld [vmem:[#allocation2 + $0x2e8] ss:$28 sps:$4 sm:$0xff]  }
 0x192   :  { %3195 = vmatpush1.bf16.msra.mxu0 %v7160_v16  ;;  %3367 = vmatpush1.bf16.msra.mxu1 %v7163_v17  ;;  %v7224_v16 = vld [vmem:[#allocation2 + $0x324] ss:$28 sps:$4 sm:$0xff]   ;;  %v7256_v17 = vld [vmem:[#allocation2 + $0x4b0] ss:$28 sps:$4 sm:$0xff]  }
 0x193   :  { %3379 = vmatprep.subr.bf16.mxu0 %v7168_v31  ;;  %6486 = vmatprep.subr.bf16.mxu1 %v7190_v32  ;;  %v7260_v31 = vld [vmem:[#allocation2 + $0x6a8] ss:$28 sps:$4 sm:$0xff]   ;;  %v7222_v32 = vld [vmem:[#allocation2 + $0x320] ss:$28 sps:$4 sm:$0xff]  }
 0x195   :  { %3197 = vmatmul.mubr.bf16.vlgmr.msra.gmra.mrb[0].mxu0 %v8168_v35  ;;  %3369 = vmatmul.mubr.bf16.vlgmr.msra.gmra.mrb[0].mxu1 %v8168_v35 }
 0x196   :  { %3380 = vmatpush1.bf16.msra.mxu0 %v7166_v33  ;;  %6487 = vmatpush3.bf16.msra.mxu1 %v7191_v37  ;;  %v7229_v33 = vld [vmem:[#allocation2 + $0x35c] ss:$28 sps:$4 sm:$0xff]  }
 0x197   :  { %3381 = vmatprep.subr.bf16.mxu0 %v7171_v36  ;;  %6488 = vmatprep.subr.bf16.mxu1 %v7195_v38  ;;  %v7261_v36 = vld [vmem:[#allocation2 + $0x4e8] ss:$28 sps:$4 sm:$0xff]   ;;  %v7265_v37 = vld [vmem:[#allocation2 + $0x6e0] ss:$28 sps:$4 sm:$0xff]   ;;  %v7227_v38 = vld [vmem:[#allocation2 + $0x358] ss:$28 sps:$4 sm:$0xff]  }
 0x198   :  { %3583 = vmatprep.mubr.bf16.mxu1 %v8098_v50  ;;  %3411 = vmatprep.mubr.bf16.mxu0 %v8098_v50  ;;  %v7211_v50 = vld [vmem:[#allocation2 + $0xf8] ss:$28 sps:$4 sm:$0xff]  }
 0x19a   :  { %3382 = vmatpush1.bf16.msra.mxu0 %v7169_v39  ;;  %6489 = vmatpush3.bf16.msra.mxu1 %v7196_v41  ;;  %v7234_v39 = vld [vmem:[#allocation2 + $0x394] ss:$28 sps:$4 sm:$0xff]  }
 0x19b   :  { %3383 = vmatprep.subr.bf16.mxu0 %v7174_v40  ;;  %6490 = vmatprep.subr.bf16.mxu1 %v7200_v23  ;;  %v7266_v40 = vld [vmem:[#allocation2 + $0x520] ss:$28 sps:$4 sm:$0xff]   ;;  %v7270_v41 = vld [vmem:[#allocation2 + $0x8d8] ss:$28 sps:$4 sm:$0xff]   ;;  %v7232_v23 = vld [vmem:[#allocation2 + $0x390] ss:$28 sps:$4 sm:$0xff]  }
 0x19e   :  { %3384 = vmatpush1.bf16.msra.mxu0 %v7172_v25  ;;  %6491 = vmatpush3.bf16.msra.mxu1 %v7201_v43  ;;  %v7239_v25 = vld [vmem:[#allocation2 + $0x3cc] ss:$28 sps:$4 sm:$0xff]  }
 0x19f   :  { %3385 = vmatprep.subr.bf16.mxu0 %v7177_v42  ;;  %6492 = vmatprep.subr.bf16.mxu1 %v7205_v44  ;;  %v7271_v42 = vld [vmem:[#allocation2 + $0x718] ss:$28 sps:$4 sm:$0xff]   ;;  %v7275_v43 = vld [vmem:[#allocation2 + $0x910] ss:$28 sps:$4 sm:$0xff]   ;;  %v7237_v44 = vld [vmem:[#allocation2 + $0x3c8] ss:$28 sps:$4 sm:$0xff]  }
 0x1a2   :  { %3386 = vmatpush1.bf16.msra.mxu0 %v7175_v45  ;;  %6493 = vmatpush3.bf16.msra.mxu1 %v7206_v47  ;;  %v7244_v45 = vld [vmem:[#allocation2 + $0x404] ss:$28 sps:$4 sm:$0xff]  }
 0x1a3   :  { %3387 = vmatprep.subr.bf16.mxu0 %v7180_v46  ;;  %6494 = vmatprep.subr.bf16.mxu1 %v7210_v48  ;;  %v7276_v46 = vld [vmem:[#allocation2 + $0x750] ss:$28 sps:$4 sm:$0xff]   ;;  %v7280_v47 = vld [vmem:[#allocation2 + $0x948] ss:$28 sps:$4 sm:$0xff]   ;;  %v7242_v48 = vld [vmem:[#allocation2 + $0x400] ss:$28 sps:$4 sm:$0xff]  }
 0x1a6   :  { %3388 = vmatpush1.bf16.msra.mxu0 %v7178_v49  ;;  %6495 = vmatpush3.bf16.msra.mxu1 %v7211_v50  ;;  %v7249_v49 = vld [vmem:[#allocation2 + $0x43c] ss:$28 sps:$4 sm:$0xff]   ;;  %v7281_v50 = vld [vmem:[#allocation2 + $0x788] ss:$28 sps:$4 sm:$0xff]  }
 0x1a7   :  { %3389 = vmatprep.subr.bf16.mxu0 %v7183_v51  ;;  %6496 = vmatprep.subr.bf16.mxu1 %v7215_v52  ;;  %v7285_v51 = vld [vmem:[#allocation2 + $0x980] ss:$28 sps:$4 sm:$0xff]   ;;  %v7254_v52 = vld [vmem:[#allocation2 + $0x474] ss:$28 sps:$4 sm:$0xff]  }
 0x1aa   :  { %3390 = vmatpush1.bf16.msra.mxu0 %v7181_v53  ;;  %6497 = vmatpush3.bf16.msra.mxu1 %v7216_v55  ;;  %v7286_v53 = vld [vmem:[#allocation2 + $0x7c0] ss:$28 sps:$4 sm:$0xff]   ;;  %v7252_v55 = vld [vmem:[#allocation2 + $0x470] ss:$28 sps:$4 sm:$0xff]  }
 0x1ab   :  { %3391 = vmatprep.subr.bf16.mxu0 %v7186_v54  ;;  %6498 = vmatprep.subr.bf16.mxu1 %v7220_v56  ;;  %v7290_v54 = vld [vmem:[#allocation2 + $0x9b8] ss:$28 sps:$4 sm:$0xff]   ;;  %v7259_v56 = vld [vmem:[#allocation2 + $0x4ac] ss:$28 sps:$4 sm:$0xff]  }
 0x1ae   :  { %3392 = vmatpush1.bf16.msra.mxu0 %v7184_v57  ;;  %6499 = vmatpush3.bf16.msra.mxu1 %v7221_v59  ;;  %v7295_v57 = vld [vmem:[#allocation2 + $0x9f0] ss:$28 sps:$4 sm:$0xff]   ;;  %v7264_v59 = vld [vmem:[#allocation2 + $0x4e4] ss:$28 sps:$4 sm:$0xff]  }
 0x1af   :  { %3393 = vmatprep.subr.bf16.mxu0 %v7189_v58  ;;  %6500 = vmatprep.subr.bf16.mxu1 %v7225_v60  ;;  %v7257_v58 = vld [vmem:[#allocation2 + $0x4a8] ss:$28 sps:$4 sm:$0xff]   ;;  %v7296_v60 = vld [vmem:[#allocation2 + $0x830] ss:$28 sps:$4 sm:$0xff]  }
 0x1b2   :  { %3394 = vmatpush1.bf16.msra.mxu0 %v7187_v61  ;;  %6501 = vmatpush3.bf16.msra.mxu1 %v7226_v63  ;;  %v7300_v61 = vld [vmem:[#allocation2 + $0xa28] ss:$28 sps:$4 sm:$0xff]   ;;  %v7269_v63 = vld [vmem:[#allocation2 + $0x51c] ss:$28 sps:$4 sm:$0xff]  }
 0x1b3   :  { %3395 = vmatprep.subr.bf16.mxu0 %v7194_v62  ;;  %6508 = vmatprep.subr.bf16.mxu1 %v7230_v0  ;;  %v7262_v62 = vld [vmem:[#allocation2 + $0x4e0] ss:$28 sps:$4 sm:$0xff]   ;;  %v7301_v0 = vld [vmem:[#allocation2 + $0x868] ss:$28 sps:$4 sm:$0xff]  }
 0x1b5   :  { %3584 = vmatmul.mubr.bf16.vlgmr.msra.gmra.mrb[4].mxu1 %v8102_v5 }
 0x1b6   :  { %3396 = vmatpush1.bf16.msra.mxu0 %v7192_v1  ;;  %6509 = vmatpush3.bf16.msra.mxu1 %v7231_v3  ;;  %v7305_v1 = vld [vmem:[#allocation2 + $0xa60] ss:$28 sps:$4 sm:$0xff]   ;;  %v7274_v3 = vld [vmem:[#allocation2 + $0x554] ss:$28 sps:$4 sm:$0xff]  }
 0x1b7   :  { %3397 = vmatprep.subr.bf16.mxu0 %v7199_v2  ;;  %6510 = vmatprep.subr.bf16.mxu1 %v7235_v4  ;;  %v7267_v2 = vld [vmem:[#allocation2 + $0x518] ss:$28 sps:$4 sm:$0xff]   ;;  %v7306_v4 = vld [vmem:[#allocation2 + $0x8a0] ss:$28 sps:$4 sm:$0xff]  }
 0x1b8   :  { %3624 = vmatprep.mubr.bf16.mxu1 %v8118_v34 }
 0x1ba   :  { %3398 = vmatpush1.bf16.msra.mxu0 %v7197_v6  ;;  %6511 = vmatpush3.bf16.msra.mxu1 %v7236_v8  ;;  %v7310_v6 = vld [vmem:[#allocation2 + $0xc58] ss:$28 sps:$4 sm:$0xff]  }
 0x1bb   :  { %3399 = vmatprep.subr.bf16.mxu0 %v7204_v7  ;;  %6512 = vmatprep.subr.bf16.mxu1 %v7240_v9  ;;  %v7272_v7 = vld [vmem:[#allocation2 + $0x550] ss:$28 sps:$4 sm:$0xff]   ;;  %v7311_v8 = vld [vmem:[#allocation2 + $0xa98] ss:$28 sps:$4 sm:$0xff]  }
 0x1bc   :  { %v7279_v9 = vld [vmem:[#allocation2 + $0x58c] ss:$28 sps:$4 sm:$0xff]  }
 0x1be   :  { %3400 = vmatpush1.bf16.msra.mxu0 %v7202_v10  ;;  %6513 = vmatpush3.bf16.msra.mxu1 %v7241_v12  ;;  %v7315_v10 = vld [vmem:[#allocation2 + $0xc90] ss:$28 sps:$4 sm:$0xff]   ;;  %v7284_v12 = vld [vmem:[#allocation2 + $0x5c4] ss:$28 sps:$4 sm:$0xff]  }
 0x1bf   :  { %3401 = vmatprep.subr.bf16.mxu0 %v7209_v11  ;;  %6514 = vmatprep.subr.bf16.mxu1 %v7245_v14  ;;  %v7277_v11 = vld [vmem:[#allocation2 + $0x588] ss:$28 sps:$4 sm:$0xff]   ;;  %v7316_v14 = vld [vmem:[#allocation2 + $0xad0] ss:$28 sps:$4 sm:$0xff]  }
 0x1c2   :  { %3402 = vmatpush1.bf16.msra.mxu0 %v7207_v15  ;;  %6515 = vmatpush3.bf16.msra.mxu1 %v7246_v20  ;;  %v7320_v15 = vld [vmem:[#allocation2 + $0xcc8] ss:$28 sps:$4 sm:$0xff]   ;;  %v7289_v20 = vld [vmem:[#allocation2 + $0x5fc] ss:$28 sps:$4 sm:$0xff]  }
 0x1c3   :  { %3403 = vmatprep.subr.bf16.mxu0 %v7214_v19  ;;  %6516 = vmatprep.subr.bf16.mxu1 %v7250_v21  ;;  %v7282_v19 = vld [vmem:[#allocation2 + $0x5c0] ss:$28 sps:$4 sm:$0xff]   ;;  %v7321_v21 = vld [vmem:[#allocation2 + $0xb08] ss:$28 sps:$4 sm:$0xff]  }
 0x1c6   :  { %3404 = vmatpush1.bf16.msra.mxu0 %v7212_v22  ;;  %6517 = vmatpush3.bf16.msra.mxu1 %v7251_v27  ;;  %v7325_v22 = vld [vmem:[#allocation2 + $0xd00] ss:$28 sps:$4 sm:$0xff]   ;;  %v7294_v27 = vld [vmem:[#allocation2 + $0x634] ss:$28 sps:$4 sm:$0xff]  }
 0x1c7   :  { %3405 = vmatprep.subr.bf16.mxu0 %v7219_v26  ;;  %6518 = vmatprep.subr.bf16.mxu1 %v7255_v28  ;;  %v7287_v26 = vld [vmem:[#allocation2 + $0x5f8] ss:$28 sps:$4 sm:$0xff]   ;;  %v7326_v28 = vld [vmem:[#allocation2 + $0xb40] ss:$28 sps:$4 sm:$0xff]  }
 0x1ca   :  { %3406 = vmatpush1.bf16.msra.mxu0 %v7217_v29  ;;  %6519 = vmatpush3.bf16.msra.mxu1 %v7256_v17  ;;  %v7330_v29 = vld [vmem:[#allocation2 + $0xd38] ss:$28 sps:$4 sm:$0xff]   ;;  %v7299_v17 = vld [vmem:[#allocation2 + $0x66c] ss:$28 sps:$4 sm:$0xff]  }
 0x1cb   :  { %3407 = vmatprep.subr.bf16.mxu0 %v7224_v16  ;;  %6520 = vmatprep.subr.bf16.mxu1 %v7260_v31  ;;  %v7292_v16 = vld [vmem:[#allocation2 + $0x630] ss:$28 sps:$4 sm:$0xff]   ;;  %v7331_v31 = vld [vmem:[#allocation2 + $0xb78] ss:$28 sps:$4 sm:$0xff]  }
 0x1ce   :  { %3408 = vmatpush1.bf16.msra.mxu0 %v7222_v32  ;;  %6521 = vmatpush3.bf16.msra.mxu1 %v7261_v36  ;;  %v7335_v32 = vld [vmem:[#allocation2 + $0xd70] ss:$28 sps:$4 sm:$0xff]   ;;  %v7304_v36 = vld [vmem:[#allocation2 + $0x6a4] ss:$28 sps:$4 sm:$0xff]  }
 0x1cf   :  { %3409 = vmatprep.subr.bf16.mxu0 %v7229_v33  ;;  %6522 = vmatprep.subr.bf16.mxu1 %v7265_v37  ;;  %v7297_v33 = vld [vmem:[#allocation2 + $0x668] ss:$28 sps:$4 sm:$0xff]   ;;  %v7336_v37 = vld [vmem:[#allocation2 + $0xbb0] ss:$28 sps:$4 sm:$0xff]  }
 0x1d2   :  { %3410 = vmatpush1.bf16.msra.mxu0 %v7227_v38  ;;  %6523 = vmatpush3.bf16.msra.mxu1 %v7266_v40  ;;  %v7340_v38 = vld [vmem:[#allocation2 + $0xda8] ss:$28 sps:$4 sm:$0xff]   ;;  %v7309_v40 = vld [vmem:[#allocation2 + $0x6dc] ss:$28 sps:$4 sm:$0xff]  }
 0x1d3   :  { %3422 = vmatprep.subr.bf16.mxu0 %v7234_v39  ;;  %6530 = vmatprep.subr.bf16.mxu1 %v7270_v41  ;;  %v7302_v39 = vld [vmem:[#allocation2 + $0x6a0] ss:$28 sps:$4 sm:$0xff]   ;;  %v7341_v41 = vld [vmem:[#allocation2 + $0xbe8] ss:$28 sps:$4 sm:$0xff]  }
 0x1d5   :  { %3412 = vmatmul.mubr.bf16.vlgmr.msra.gmra.mrb[4].mxu0 %v8102_v5  ;;  %3625 = vmatmul.mubr.bf16.vlgmr.msra.gmra.mrb[8].mxu1 %v8124_v13  ;;  %v7247_v5 = vld [vmem:[#allocation2 + $0x438] ss:$28 sps:$4 sm:$0xff]  }
 0x1d6   :  { %3423 = vmatpush1.bf16.msra.mxu0 %v7232_v23  ;;  %6531 = vmatpush3.bf16.msra.mxu1 %v7271_v42  ;;  %v7345_v23 = vld [vmem:[#allocation2 + $0xde0] ss:$28 sps:$4 sm:$0xff]   ;;  %v7314_v42 = vld [vmem:[#allocation2 + $0x714] ss:$28 sps:$4 sm:$0xff]  }
 0x1d7   :  { %3424 = vmatprep.subr.bf16.mxu0 %v7239_v25  ;;  %6532 = vmatprep.subr.bf16.mxu1 %v7275_v43  ;;  %v7307_v25 = vld [vmem:[#allocation2 + $0x6d8] ss:$28 sps:$4 sm:$0xff]   ;;  %v7346_v43 = vld [vmem:[#allocation2 + $0xc20] ss:$28 sps:$4 sm:$0xff]  }
 0x1d8   :  { %3665 = vmatprep.mubr.bf16.mxu1 %v8138_v18  ;;  %3454 = vmatprep.mubr.bf16.mxu0 %v8118_v34  ;;  %v7291_v34 = vld [vmem:[#allocation2 + $0x7f8] ss:$28 sps:$4 sm:$0xff]  }
 0x1da   :  { %3425 = vmatpush1.bf16.msra.mxu0 %v7237_v44  ;;  %6533 = vmatpush3.bf16.msra.mxu1 %v7276_v46  ;;  %v7352_v44 = vld [vmem:[#allocation6 + $0x4] ss:$12 sps:$4 sm:$0xff]  }
 0x1db   :  { %3426 = vmatprep.subr.bf16.mxu0 %v7244_v45  ;;  %6534 = vmatprep.subr.bf16.mxu1 %v7280_v47  ;;  %v7312_v45 = vld [vmem:[#allocation2 + $0x710] ss:$28 sps:$4 sm:$0xff]   ;;  %v7350_v47 = vld [vmem:[#allocation6] ss:$12 sps:$4 sm:$0xff]  }
 0x1dc   :  { %v7319_v46 = vld [vmem:[#allocation2 + $0x74c] ss:$28 sps:$4 sm:$0xff]  }
 0x1de   :  { %3427 = vmatpush1.bf16.msra.mxu0 %v7242_v48  ;;  %6535 = vmatpush3.bf16.msra.mxu1 %v7281_v50  ;;  %v7358_v48 = vld [vmem:[#allocation6 + $0x1c] ss:$12 sps:$4 sm:$0xff]  }
 0x1df   :  { %3428 = vmatprep.subr.bf16.mxu0 %v7249_v49  ;;  %6536 = vmatprep.subr.bf16.mxu1 %v7285_v51  ;;  %v7317_v49 = vld [vmem:[#allocation2 + $0x748] ss:$28 sps:$4 sm:$0xff]   ;;  %v7356_v51 = vld [vmem:[#allocation6 + $0x18] ss:$12 sps:$4 sm:$0xff]  }
 0x1e0   :  { %v7324_v50 = vld [vmem:[#allocation2 + $0x784] ss:$28 sps:$4 sm:$0xff]  }
 0x1e2   :  { %3429 = vmatpush1.bf16.msra.mxu0 %v7247_v5  ;;  %6537 = vmatpush3.bf16.msra.mxu1 %v7286_v53  ;;  %v7364_v5 = vld [vmem:[#allocation6 + $0x34] ss:$12 sps:$4 sm:$0xff]   ;;  %v7362_v53 = vld [vmem:[#allocation6 + $0x30] ss:$12 sps:$4 sm:$0xff]  }
 0x1e3   :  { %3430 = vmatprep.subr.bf16.mxu0 %v7254_v52  ;;  %6538 = vmatprep.subr.bf16.mxu1 %v7290_v54  ;;  %v7322_v52 = vld [vmem:[#allocation2 + $0x780] ss:$28 sps:$4 sm:$0xff]  }
 0x1e4   :  { %v7329_v54 = vld [vmem:[#allocation2 + $0x7bc] ss:$28 sps:$4 sm:$0xff]  }
 0x1e6   :  { %3431 = vmatpush1.bf16.msra.mxu0 %v7252_v55  ;;  %6539 = vmatpush3.bf16.msra.mxu1 %v7291_v34  ;;  %v7370_v55 = vld [vmem:[#allocation6 + $0x4c] ss:$12 sps:$4 sm:$0xff]  }
 0x1e7   :  { %3432 = vmatprep.subr.bf16.mxu0 %v7259_v56  ;;  %6540 = vmatprep.subr.bf16.mxu1 %v7295_v57  ;;  %v7368_v56 = vld [vmem:[#allocation6 + $0x48] ss:$12 sps:$4 sm:$0xff]   ;;  %v7376_v57 = vld [vmem:[#allocation6 + $0x64] ss:$12 sps:$4 sm:$0xff]  }
 0x1e8   :  { %v7334_v34 = vld [vmem:[#allocation2 + $0x7f4] ss:$28 sps:$4 sm:$0xff]  }
 0x1ea   :  { %3433 = vmatpush1.bf16.msra.mxu0 %v7257_v58  ;;  %6541 = vmatpush3.bf16.msra.mxu1 %v7296_v60  ;;  %v7332_v58 = vld [vmem:[#allocation2 + $0x7f0] ss:$28 sps:$4 sm:$0xff]  }
 0x1eb   :  { %3434 = vmatprep.subr.bf16.mxu0 %v7264_v59  ;;  %6542 = vmatprep.subr.bf16.mxu1 %v7300_v61  ;;  %v7374_v59 = vld [vmem:[#allocation6 + $0x60] ss:$12 sps:$4 sm:$0xff]   ;;  %v7382_v61 = vld [vmem:[#allocation6 + $0x7c] ss:$12 sps:$4 sm:$0xff]  }
 0x1ec   :  { %v7339_v60 = vld [vmem:[#allocation2 + $0x82c] ss:$28 sps:$4 sm:$0xff]  }
 0x1ee   :  { %3435 = vmatpush1.bf16.msra.mxu0 %v7262_v62  ;;  %6543 = vmatpush3.bf16.msra.mxu1 %v7301_v0  ;;  %v7380_v62 = vld [vmem:[#allocation6 + $0x78] ss:$12 sps:$4 sm:$0xff]   ;;  %v7388_v0 = vld [vmem:[#allocation6 + $0x94] ss:$12 sps:$4 sm:$0xff]  }
 0x1ef   :  { %3436 = vmatprep.subr.bf16.mxu0 %v7269_v63  ;;  %6544 = vmatprep.subr.bf16.mxu1 %v7305_v1  ;;  %v7344_v63 = vld [vmem:[#allocation2 + $0x864] ss:$28 sps:$4 sm:$0xff]  }
 0x1f0   :  { %v7342_v1 = vld [vmem:[#allocation2 + $0x860] ss:$28 sps:$4 sm:$0xff]  }
 0x1f2   :  { %3437 = vmatpush1.bf16.msra.mxu0 %v7267_v2  ;;  %6545 = vmatpush3.bf16.msra.mxu1 %v7306_v4  ;;  %v7386_v2 = vld [vmem:[#allocation6 + $0x90] ss:$12 sps:$4 sm:$0xff]   ;;  %v7394_v4 = vld [vmem:[#allocation6 + $0xac] ss:$12 sps:$4 sm:$0xff]  }
 0x1f3   :  { %3438 = vmatprep.subr.bf16.mxu0 %v7274_v3  ;;  %6552 = vmatprep.subr.bf16.mxu1 %v7310_v6  ;;  %v7349_v3 = vld [vmem:[#allocation2 + $0x89c] ss:$28 sps:$4 sm:$0xff]  }
 0x1f4   :  { %v7347_v6 = vld [vmem:[#allocation2 + $0x898] ss:$28 sps:$4 sm:$0xff]  }
 0x1f5   :  { %3666 = vmatmul.mubr.bf16.vlgmr.msra.gmra.mrb[12].mxu1 %v8151_v24 }
 0x1f6   :  { %3439 = vmatpush1.bf16.msra.mxu0 %v7272_v7  ;;  %6553 = vmatpush3.bf16.msra.mxu1 %v7311_v8  ;;  %v7392_v7 = vld [vmem:[#allocation6 + $0xa8] ss:$12 sps:$4 sm:$0xff]  }
 0x1f7   :  { %3440 = vmatprep.subr.bf16.mxu0 %v7279_v9  ;;  %6554 = vmatprep.subr.bf16.mxu1 %v7315_v10  ;;  %v7355_v8 = vld [vmem:[#allocation2 + $0x8d4] ss:$28 sps:$4 sm:$0xff]   ;;  %v7400_v9 = vld [vmem:[#allocation6 + $0xc4] ss:$12 sps:$4 sm:$0xff]  }
 0x1f8   :  { %3706 = vmatprep.mubr.bf16.mxu1 %v8160_v30  ;;  %v7353_v10 = vld [vmem:[#allocation2 + $0x8d0] ss:$28 sps:$4 sm:$0xff]  }
 0x1fa   :  { %3441 = vmatpush1.bf16.msra.mxu0 %v7277_v11  ;;  %6555 = vmatpush3.bf16.msra.mxu1 %v7316_v14  ;;  %v7398_v11 = vld [vmem:[#allocation6 + $0xc0] ss:$12 sps:$4 sm:$0xff]   ;;  %v7406_v14 = vld [vmem:[#allocation6 + $0xdc] ss:$12 sps:$4 sm:$0xff]  }
 0x1fb   :  { %3442 = vmatprep.subr.bf16.mxu0 %v7284_v12  ;;  %6556 = vmatprep.subr.bf16.mxu1 %v7320_v15  ;;  %v7361_v12 = vld [vmem:[#allocation2 + $0x90c] ss:$28 sps:$4 sm:$0xff]  }
 0x1fc   :  { %v7359_v15 = vld [vmem:[#allocation2 + $0x908] ss:$28 sps:$4 sm:$0xff]  }
 0x1fe   :  { %3443 = vmatpush1.bf16.msra.mxu0 %v7282_v19  ;;  %6557 = vmatpush3.bf16.msra.mxu1 %v7321_v21  ;;  %v7367_v19 = vld [vmem:[#allocation2 + $0x944] ss:$28 sps:$4 sm:$0xff]   ;;  %v7412_v21 = vld [vmem:[#allocation6 + $0xf4] ss:$12 sps:$4 sm:$0xff]  }
 0x1ff   :  { %3444 = vmatprep.subr.bf16.mxu0 %v7289_v20  ;;  %6558 = vmatprep.subr.bf16.mxu1 %v7325_v22  ;;  %v7404_v20 = vld [vmem:[#allocation6 + $0xd8] ss:$12 sps:$4 sm:$0xff]  }
 0x200   :  { %v7365_v22 = vld [vmem:[#allocation2 + $0x940] ss:$28 sps:$4 sm:$0xff]  }
 0x202   :  { %3445 = vmatpush1.bf16.msra.mxu0 %v7287_v26  ;;  %6559 = vmatpush3.bf16.msra.mxu1 %v7326_v28  ;;  %v7373_v26 = vld [vmem:[#allocation2 + $0x97c] ss:$28 sps:$4 sm:$0xff]   ;;  %v7418_v28 = vld [vmem:[#allocation6 + $0x10c] ss:$12 sps:$4 sm:$0xff]  }
 0x203   :  { %3446 = vmatprep.subr.bf16.mxu0 %v7294_v27  ;;  %6560 = vmatprep.subr.bf16.mxu1 %v7330_v29  ;;  %v7410_v27 = vld [vmem:[#allocation6 + $0xf0] ss:$12 sps:$4 sm:$0xff]  }
 0x204   :  { %v7371_v29 = vld [vmem:[#allocation2 + $0x978] ss:$28 sps:$4 sm:$0xff]  }
 0x206   :  { %3447 = vmatpush1.bf16.msra.mxu0 %v7292_v16  ;;  %6561 = vmatpush3.bf16.msra.mxu1 %v7331_v31  ;;  %v7379_v16 = vld [vmem:[#allocation2 + $0x9b4] ss:$28 sps:$4 sm:$0xff]   ;;  %v7424_v31 = vld [vmem:[#allocation6 + $0x124] ss:$12 sps:$4 sm:$0xff]  }
 0x207   :  { %3448 = vmatprep.subr.bf16.mxu0 %v7299_v17  ;;  %6562 = vmatprep.subr.bf16.mxu1 %v7335_v32  ;;  %v7416_v17 = vld [vmem:[#allocation6 + $0x108] ss:$12 sps:$4 sm:$0xff]  }
 0x208   :  { %v7377_v32 = vld [vmem:[#allocation2 + $0x9b0] ss:$28 sps:$4 sm:$0xff]  }
 0x20a   :  { %3449 = vmatpush1.bf16.msra.mxu0 %v7297_v33  ;;  %6563 = vmatpush3.bf16.msra.mxu1 %v7336_v37  ;;  %v7385_v33 = vld [vmem:[#allocation2 + $0x9ec] ss:$28 sps:$4 sm:$0xff]   ;;  %v7430_v37 = vld [vmem:[#allocation6 + $0x13c] ss:$12 sps:$4 sm:$0xff]  }
 0x20b   :  { %3450 = vmatprep.subr.bf16.mxu0 %v7304_v36  ;;  %6564 = vmatprep.subr.bf16.mxu1 %v7340_v38  ;;  %v7422_v36 = vld [vmem:[#allocation6 + $0x120] ss:$12 sps:$4 sm:$0xff]  }
 0x20c   :  { %v7383_v38 = vld [vmem:[#allocation2 + $0x9e8] ss:$28 sps:$4 sm:$0xff]  }
 0x20e   :  { %3451 = vmatpush1.bf16.msra.mxu0 %v7302_v39  ;;  %6565 = vmatpush3.bf16.msra.mxu1 %v7341_v41  ;;  %v7391_v39 = vld [vmem:[#allocation2 + $0xa24] ss:$28 sps:$4 sm:$0xff]   ;;  %v7436_v41 = vld [vmem:[#allocation6 + $0x154] ss:$12 sps:$4 sm:$0xff]  }
 0x20f   :  { %3452 = vmatprep.subr.bf16.mxu0 %v7309_v40  ;;  %6566 = vmatprep.subr.bf16.mxu1 %v7345_v23  ;;  %v7428_v40 = vld [vmem:[#allocation6 + $0x138] ss:$12 sps:$4 sm:$0xff]  }
 0x210   :  { %v7389_v23 = vld [vmem:[#allocation2 + $0xa20] ss:$28 sps:$4 sm:$0xff]  }
 0x212   :  { %3453 = vmatpush1.bf16.msra.mxu0 %v7307_v25  ;;  %6567 = vmatpush3.bf16.msra.mxu1 %v7346_v43  ;;  %v7397_v25 = vld [vmem:[#allocation2 + $0xa5c] ss:$28 sps:$4 sm:$0xff]   ;;  %v7442_v43 = vld [vmem:[#allocation6 + $0x16c] ss:$12 sps:$4 sm:$0xff]  }
 0x213   :  { %3465 = vmatprep.subr.bf16.mxu0 %v7314_v42  ;;  %4873 = vmatprep.subr.bf16.mxu1 %v7352_v44  ;;  %v7434_v42 = vld [vmem:[#allocation6 + $0x150] ss:$12 sps:$4 sm:$0xff]  }
 0x214   :  { %v7395_v44 = vld [vmem:[#allocation2 + $0xa58] ss:$28 sps:$4 sm:$0xff]  }
 0x215   :  { %3455 = vmatmul.mubr.bf16.vlgmr.msra.gmra.mrb[4].mxu0 %v8124_v13  ;;  %3707 = vmatmul.mubr.bf16.vlgmr.msra.gmra.mrb[16].mxu1 %v8168_v35  ;;  %v7327_v13 = vld [vmem:[#allocation2 + $0x7b8] ss:$28 sps:$4 sm:$0xff]  }
 0x216   :  { %3466 = vmatpush1.bf16.msra.mxu0 %v7312_v45  ;;  %4874 = vmatpush1.bf16.msra.mxu1 %v7350_v47  ;;  %v7403_v45 = vld [vmem:[#allocation2 + $0xa94] ss:$28 sps:$4 sm:$0xff]   ;;  %v7448_v47 = vld [vmem:[#allocation6 + $0x184] ss:$12 sps:$4 sm:$0xff]  }
 0x217   :  { %3467 = vmatprep.subr.bf16.mxu0 %v7319_v46  ;;  %4875 = vmatprep.subr.bf16.mxu1 %v7358_v48  ;;  %v7440_v46 = vld [vmem:[#allocation6 + $0x168] ss:$12 sps:$4 sm:$0xff]  }
 0x218   :  { %3497 = vmatprep.mubr.bf16.mxu0 %v8138_v18  ;;  %v7337_v18 = vld [vmem:[#allocation2 + $0x828] ss:$28 sps:$4 sm:$0xff]   ;;  %v7401_v48 = vld [vmem:[#allocation2 + $0xa90] ss:$28 sps:$4 sm:$0xff]  }
 0x21a   :  { %3468 = vmatpush1.bf16.msra.mxu0 %v7317_v49  ;;  %4876 = vmatpush1.bf16.msra.mxu1 %v7356_v51  ;;  %v7409_v49 = vld [vmem:[#allocation2 + $0xacc] ss:$28 sps:$4 sm:$0xff]   ;;  %v7415_v51 = vld [vmem:[#allocation2 + $0xb04] ss:$28 sps:$4 sm:$0xff]  }
 0x21b   :  { %3469 = vmatprep.subr.bf16.mxu0 %v7324_v50  ;;  %4877 = vmatprep.subr.bf16.mxu1 %v7364_v5  ;;  %v7407_v50 = vld [vmem:[#allocation2 + $0xac8] ss:$28 sps:$4 sm:$0xff]   ;;  %v656_v5 = vlaneseq }
 0x21e   :  { %3470 = vmatpush1.bf16.msra.mxu0 %v7322_v52  ;;  %4878 = vmatpush1.bf16.msra.mxu1 %v7362_v53  ;;  %v7413_v52 = vld [vmem:[#allocation2 + $0xb00] ss:$28 sps:$4 sm:$0xff]  }
 0x21f   :  { %3471 = vmatprep.subr.bf16.mxu0 %v7329_v54  ;;  %4879 = vmatprep.subr.bf16.mxu1 %v7370_v55  ;;  %v7421_v53 = vld [vmem:[#allocation2 + $0xb3c] ss:$28 sps:$4 sm:$0xff]   ;;  %v8187_v54 = vshrl.u32 %v656_v5, 7 }
 0x220   :  { %v7419_v55 = vld [vmem:[#allocation2 + $0xb38] ss:$28 sps:$4 sm:$0xff]   ;;  %v7464_v5 = vld [vmem:[#allocation6 + $0x1c8] ss:$12 sps:$4 sm:$0xff]  }
 0x222   :  { %3472 = vmatpush1.bf16.msra.mxu0 %v7327_v13  ;;  %4880 = vmatpush1.bf16.msra.mxu1 %v7368_v56  ;;  %v7427_v13 = vld [vmem:[#allocation2 + $0xb74] ss:$28 sps:$4 sm:$0xff]   ;;  %v8190_v56 = vsub.s32 0, %v8187_v54 }
 0x223   :  { %3473 = vmatprep.subr.bf16.mxu0 %v7334_v34  ;;  %4881 = vmatprep.subr.bf16.mxu1 %v7376_v57  ;;  %v7425_v34 = vld [vmem:[#allocation2 + $0xb70] ss:$28 sps:$4 sm:$0xff]   ;;  %v8196_v57 = vsub.s32 1, %v8187_v54 }
 0x226   :  { %3474 = vmatpush1.bf16.msra.mxu0 %v7332_v58  ;;  %4882 = vmatpush1.bf16.msra.mxu1 %v7374_v59  ;;  %v670_v58 = vsub.s32 3, %v8187_v54  ;;  %v7433_v59 = vld [vmem:[#allocation2 + $0xbac] ss:$28 sps:$4 sm:$0xff]  }
 0x227   :  { %3475 = vmatprep.subr.bf16.mxu0 %v7339_v60  ;;  %4883 = vmatprep.subr.bf16.mxu1 %v7382_v61 }
 0x22a   :  { %3476 = vmatpush1.bf16.msra.mxu0 %v7337_v18  ;;  %4884 = vmatpush1.bf16.msra.mxu1 %v7380_v62 }
 0x22b   :  { %3477 = vmatprep.subr.bf16.mxu0 %v7344_v63  ;;  %4885 = vmatprep.subr.bf16.mxu1 %v7388_v0  ;;  %v7431_v63 = vld [vmem:[#allocation2 + $0xba8] ss:$28 sps:$4 sm:$0xff]  }
 0x22c   :  { %v7439_v0 = vld [vmem:[#allocation2 + $0xbe4] ss:$28 sps:$4 sm:$0xff]  }
 0x22e   :  { %3478 = vmatpush1.bf16.msra.mxu0 %v7342_v1  ;;  %4886 = vmatpush1.bf16.msra.mxu1 %v7386_v2 }
 0x22f   :  { %3479 = vmatprep.subr.bf16.mxu0 %v7349_v3  ;;  %4887 = vmatprep.subr.bf16.mxu1 %v7394_v4 }
 0x232   :  { %3480 = vmatpush1.bf16.msra.mxu0 %v7347_v6  ;;  %4888 = vmatpush1.bf16.msra.mxu1 %v7392_v7 }
 0x233   :  { %3481 = vmatprep.subr.bf16.mxu0 %v7355_v8  ;;  %4889 = vmatprep.subr.bf16.mxu1 %v7400_v9 }
 0x236   :  { %3482 = vmatpush1.bf16.msra.mxu0 %v7353_v10  ;;  %4890 = vmatpush1.bf16.msra.mxu1 %v7398_v11 }
 0x237   :  { %3483 = vmatprep.subr.bf16.mxu0 %v7361_v12  ;;  %4891 = vmatprep.subr.bf16.mxu1 %v7406_v14  ;;  %v7437_v12 = vld [vmem:[#allocation2 + $0xbe0] ss:$28 sps:$4 sm:$0xff]  }
 0x23a   :  { %3484 = vmatpush1.bf16.msra.mxu0 %v7359_v15  ;;  %4892 = vmatpush1.bf16.msra.mxu1 %v7404_v20 }
 0x23b   :  { %3485 = vmatprep.subr.bf16.mxu0 %v7367_v19  ;;  %4893 = vmatprep.subr.bf16.mxu1 %v7412_v21  ;;  %v7445_v21 = vld [vmem:[#allocation2 + $0xc1c] ss:$28 sps:$4 sm:$0xff]  }
 0x23e   :  { %3486 = vmatpush1.bf16.msra.mxu0 %v7365_v22  ;;  %4894 = vmatpush1.bf16.msra.mxu1 %v7410_v27 }
 0x23f   :  { %3487 = vmatprep.subr.bf16.mxu0 %v7373_v26  ;;  %4895 = vmatprep.subr.bf16.mxu1 %v7418_v28 }
 0x242   :  { %3488 = vmatpush1.bf16.msra.mxu0 %v7371_v29  ;;  %4896 = vmatpush1.bf16.msra.mxu1 %v7416_v17 }
 0x243   :  { %3489 = vmatprep.subr.bf16.mxu0 %v7379_v16  ;;  %4897 = vmatprep.subr.bf16.mxu1 %v7424_v31 }
 0x246   :  { %3490 = vmatpush1.bf16.msra.mxu0 %v7377_v32  ;;  %4898 = vmatpush1.bf16.msra.mxu1 %v7422_v36  ;;  %v7443_v36 = vld [vmem:[#allocation2 + $0xc18] ss:$28 sps:$4 sm:$0xff]  }
 0x247   :  { %3491 = vmatprep.subr.bf16.mxu0 %v7385_v33  ;;  %4899 = vmatprep.subr.bf16.mxu1 %v7430_v37 }
 0x24a   :  { %3492 = vmatpush1.bf16.msra.mxu0 %v7383_v38  ;;  %4900 = vmatpush1.bf16.msra.mxu1 %v7428_v40 }
 0x24b   :  { %3493 = vmatprep.subr.bf16.mxu0 %v7391_v39  ;;  %4901 = vmatprep.subr.bf16.mxu1 %v7436_v41  ;;  %v7451_v39 = vld [vmem:[#allocation2 + $0xc54] ss:$28 sps:$4 sm:$0xff]  }
 0x24e   :  { %3494 = vmatpush1.bf16.msra.mxu0 %v7389_v23  ;;  %4902 = vmatpush1.bf16.msra.mxu1 %v7434_v42  ;;  %v7446_v23 = vld [vmem:[#allocation6 + $0x180] ss:$12 sps:$4 sm:$0xff]   ;;  %v7449_v42 = vld [vmem:[#allocation2 + $0xc50] ss:$28 sps:$4 sm:$0xff]  }
 0x24f   :  { %3495 = vmatprep.subr.bf16.mxu0 %v7397_v25  ;;  %4903 = vmatprep.subr.bf16.mxu1 %v7442_v43  ;;  %v7454_v25 = vld [vmem:[#allocation6 + $0x19c] ss:$12 sps:$4 sm:$0xff]   ;;  %v7457_v43 = vld [vmem:[#allocation2 + $0xc8c] ss:$28 sps:$4 sm:$0xff]  }
 0x252   :  { %3496 = vmatpush1.bf16.msra.mxu0 %v7395_v44  ;;  %4904 = vmatpush1.bf16.msra.mxu1 %v7440_v46  ;;  %v7452_v44 = vld [vmem:[#allocation6 + $0x198] ss:$12 sps:$4 sm:$0xff]   ;;  %v7455_v46 = vld [vmem:[#allocation2 + $0xc88] ss:$28 sps:$4 sm:$0xff]  }
 0x253   :  { %3508 = vmatprep.subr.bf16.mxu0 %v7403_v45  ;;  %4916 = vmatprep.subr.bf16.mxu1 %v7448_v47  ;;  %v7460_v45 = vld [vmem:[#allocation6 + $0x1b4] ss:$12 sps:$4 sm:$0xff]   ;;  %v7463_v47 = vld [vmem:[#allocation2 + $0xcc4] ss:$28 sps:$4 sm:$0xff]  }
 0x255   :  { %3498 = vmatmul.mubr.bf16.vlgmr.msra.gmra.mrb[4].mxu0 %v8151_v24  ;;  %v666_v24 = vsub.s32 2, %v8187_v54 }
 0x256   :  { %3509 = vmatpush1.bf16.msra.mxu0 %v7401_v48  ;;  %3540 = vmatprep.mubr.bf16.mxu0 %v8160_v30  ;;  %v8193_v30 = vld [vmem:[#allocation4] sm:$0xff] }
 0x257   :  { %3510 = vmatprep.subr.bf16.mxu0 %v7409_v49  ;;  %v659_v60 = vrot.slane %v8193_v30, %v8190_v56  ;;  %v667_v61 = vrot.slane %v8193_v30, %v666_v24  ;;  %v663_v18 = vrot.slane %v8193_v30, %v8196_v57  ;;  %v671_v62 = vrot.slane %v8193_v30, %v670_v58  ;;  %v7458_v48 = vld [vmem:[#allocation6 + $0x1b0] ss:$12 sps:$4 sm:$0xff]   ;;  %v7466_v49 = vld [vmem:[#allocation6 + $0x1cc] ss:$12 sps:$4 sm:$0xff]   ;;  %v7473_v58 = vld [vmem:[#allocation2 + $0xd30] ss:$28 sps:$4 sm:$0xff]  }
 0x25a   :  { %3511 = vmatpush1.bf16.msra.mxu0 %v7407_v50  ;;  %v7461_v50 = vld [vmem:[#allocation2 + $0xcc0] ss:$28 sps:$4 sm:$0xff]  }
 0x25b   :  { %3512 = vmatprep.subr.bf16.mxu0 %v7415_v51  ;;  %v7469_v51 = vld [vmem:[#allocation2 + $0xcfc] ss:$28 sps:$4 sm:$0xff]  }
 0x25e   :  { %3513 = vmatpush1.bf16.msra.mxu0 %v7413_v52  ;;  %v7472_v52 = vld [vmem:[#allocation6 + $0x1e4] ss:$12 sps:$4 sm:$0xff]  }
 0x25f   :  { %3514 = vmatprep.subr.bf16.mxu0 %v7421_v53  ;;  %v7467_v53 = vld [vmem:[#allocation2 + $0xcf8] ss:$28 sps:$4 sm:$0xff]  }
 0x262   :  { %3515 = vmatpush1.bf16.msra.mxu0 %v7419_v55  ;;  %v7475_v55 = vld [vmem:[#allocation2 + $0xd34] ss:$28 sps:$4 sm:$0xff]  }
 0x263   :  { %3516 = vmatprep.subr.bf16.mxu0 %v7427_v13  ;;  %v7470_v13 = vld [vmem:[#allocation6 + $0x1e0] ss:$12 sps:$4 sm:$0xff]  }
 0x266   :  { %3517 = vmatpush1.bf16.msra.mxu0 %v7425_v34  ;;  %v7478_v34 = vld [vmem:[#allocation6 + $0x1fc] ss:$12 sps:$4 sm:$0xff]  }
 0x267   :  { %3518 = vmatprep.subr.bf16.mxu0 %v7433_v59  ;;  %v7481_v59 = vld [vmem:[#allocation2 + $0xd6c] ss:$28 sps:$4 sm:$0xff]  }
 0x268   :  { %v3198_v1 = vpop.f32.mrb[0].mxu0  ;;  %v3370_v2 = vpop.f32.mrb[0].mxu1 }
 0x269   :  { %v6691_v3 = vadd.f32 %v3198_v1, %v659_v60  ;;  %v6695_v4 = vadd.f32 %v3370_v2, %v667_v61  ;;  %v3200_v6 = vpop.f32.mrb[1].mxu0  ;;  %v3372_v7 = vpop.f32.mrb[1].mxu1  ;;  %v7490_v1 = vld [vmem:[#allocation6 + $0x22c] ss:$12 sps:$4 sm:$0xff]  }
 0x26a   :  { %v6692_v8 = vadd.f32 %v3200_v6, %v663_v18  ;;  %v6696_v9 = vadd.f32 %v3372_v7, %v671_v62  ;;  %v3202_v10 = vpop.f32.mrb[2].mxu0  ;;  %v3374_v11 = vpop.f32.mrb[2].mxu1  ;;  %3519 = vmatpush1.bf16.msra.mxu0 %v7431_v63  ;;  %v7482_v63 = vld [vmem:[#allocation6 + $0x210] ss:$12 sps:$4 sm:$0xff]  }
 0x26b   :  { %v6693_v14 = vadd.f32 %v3202_v10, %v659_v60  ;;  %v6697_v15 = vadd.f32 %v3374_v11, %v667_v61  ;;  %v3204_v19 = vpop.f32.mrb[3].mxu0  ;;  %v3376_v20 = vpop.f32.mrb[3].mxu1  ;;  %3520 = vmatprep.subr.bf16.mxu0 %v7439_v0  ;;  %v3715_v27 = vmax.f32 %v6691_v3, 0.0  ;;  %v3717_v28 = vmax.f32 %v6695_v4, 0.0  ;;  %v7476_v60 = vld [vmem:[#allocation6 + $0x1f8] ss:$12 sps:$4 sm:$0xff]  }
 0x26c   :  { %v6694_v22 = vadd.f32 %v3204_v19, %v663_v18  ;;  %v6698_v26 = vadd.f32 %v3376_v20, %v671_v62  ;;  %v3716_v17 = vmax.f32 %v6692_v8, 0.0  ;;  %v3718_v31 = vmax.f32 %v6696_v9, 0.0  ;;  %v7484_v61 = vld [vmem:[#allocation6 + $0x214] ss:$12 sps:$4 sm:$0xff]   ;;  %v7487_v62 = vld [vmem:[#allocation2 + $0xda4] ss:$28 sps:$4 sm:$0xff]  }
 0x26d   :  { %v3722_v29 = vmax.f32 %v6693_v14, 0.0  ;;  %v3724_v16 = vmax.f32 %v6697_v15, 0.0  ;;  %v7479_v18 = vld [vmem:[#allocation2 + $0xd68] ss:$28 sps:$4 sm:$0xff]   ;;  %v7485_v3 = vld [vmem:[#allocation2 + $0xda0] ss:$28 sps:$4 sm:$0xff]  }
 0x26e   :  { %v3723_v32 = vmax.f32 %v6694_v22, 0.0  ;;  %v3725_v33 = vmax.f32 %v6698_v26, 0.0  ;;  %3521 = vmatpush1.bf16.msra.mxu0 %v7437_v12  ;;  %v7493_v7 = vld [vmem:[#allocation2 + $0xddc] ss:$28 sps:$4 sm:$0xff]   ;;  %v7494_v15 = vld [vmem:[#allocation6 + $0x240] ss:$12 sps:$4 sm:$0xff]  }
 0x26f   :  { %v8207_v37 = vpack.c.bf16 %v3722_v29, %v3715_v27  ;;  %v8209_v38 = vpack.c.bf16 %v3724_v16, %v3717_v28  ;;  %3522 = vmatprep.subr.bf16.mxu0 %v7445_v21  ;;  %v7488_v9 = vld [vmem:[#allocation6 + $0x228] ss:$12 sps:$4 sm:$0xff]   ;;  %v7496_v11 = vld [vmem:[#allocation6 + $0x244] ss:$12 sps:$4 sm:$0xff]   ;;  %v7502_v21 = vld [vmem:[#allocation6 + $0xe0] ss:$12 sps:$4 sm:$0xff]  }
 0x270   :  { %v8211_v40 = vpack.c.bf16 %v3723_v32, %v3716_v17  ;;  %v8213_v41 = vpack.c.bf16 %v3725_v33, %v3718_v31  ;;  %v7491_v12 = vld [vmem:[#allocation2 + $0xdd8] ss:$28 sps:$4 sm:$0xff]   ;;  %v7497_v14 = vld [vmem:[#allocation6 + $0xc8] ss:$12 sps:$4 sm:$0xff]   ;;  %v7498_v22 = vld [vmem:[#allocation6 + $0x258] ss:$12 sps:$4 sm:$0xff]  }
 0x271   :  { %v7500_v19 = vld [vmem:[#allocation6 + $0x25c] ss:$12 sps:$4 sm:$0xff]   ;;  %v7505_v26 = vld [vmem:[#allocation6 + $0x274] ss:$12 sps:$4 sm:$0xff]   ;;  %v7507_v28 = vld [vmem:[#allocation6 + $0xf8] ss:$12 sps:$4 sm:$0xff]  }
 0x272   :  { %3523 = vmatpush1.bf16.msra.mxu0 %v7443_v36  ;;  %4905 = vmatprep.mubr.bf16.mxu1 %v8211_v40  ;;  %v7501_v20 = vld [vmem:[#allocation6 + $0x8] ss:$12 sps:$4 sm:$0xff]   ;;  %v7506_v27 = vld [vmem:[#allocation6 + $0x20] ss:$12 sps:$4 sm:$0xff]   ;;  %v7503_v29 = vld [vmem:[#allocation6 + $0x270] ss:$12 sps:$4 sm:$0xff]  }
 0x273   :  { %4906 = vmatmul.mubr.bf16.vlgmr.msra.gmra.mrb[20].mxu1 %v8207_v37  ;;  %3524 = vmatprep.subr.bf16.mxu0 %v7451_v39  ;;  %v7510_v16 = vld [vmem:[#allocation6 + $0x28c] ss:$12 sps:$4 sm:$0xff]   ;;  %v7512_v31 = vld [vmem:[#allocation6 + $0x110] ss:$12 sps:$4 sm:$0xff]   ;;  %v7508_v32 = vld [vmem:[#allocation6 + $0x288] ss:$12 sps:$4 sm:$0xff]  }
 0x274   :  { %4917 = vmatpush1.bf16.msra.mxu1 %v7446_v23  ;;  %4948 = vmatprep.mubr.bf16.mxu1 %v8213_v41  ;;  %v7511_v17 = vld [vmem:[#allocation6 + $0x38] ss:$12 sps:$4 sm:$0xff]   ;;  %v7516_v33 = vld [vmem:[#allocation6 + $0x50] ss:$12 sps:$4 sm:$0xff]   ;;  %v7517_v36 = vld [vmem:[#allocation6 + $0x128] ss:$12 sps:$4 sm:$0xff]  }
 0x275   :  { %4918 = vmatprep.subr.bf16.mxu1 %v7454_v25  ;;  %v7513_v39 = vld [vmem:[#allocation6 + $0x2a0] ss:$12 sps:$4 sm:$0xff]   ;;  %v7520_v23 = vld [vmem:[#allocation6 + $0x2bc] ss:$12 sps:$4 sm:$0xff]  }
 0x276   :  { %3525 = vmatpush1.bf16.msra.mxu0 %v7449_v42  ;;  %v7521_v25 = vld [vmem:[#allocation6 + $0x68] ss:$12 sps:$4 sm:$0xff]   ;;  %v7522_v42 = vld [vmem:[#allocation6 + $0x140] ss:$12 sps:$4 sm:$0xff]  }
 0x277   :  { %3526 = vmatprep.subr.bf16.mxu0 %v7457_v43  ;;  %v7518_v43 = vld [vmem:[#allocation6 + $0x2b8] ss:$12 sps:$4 sm:$0xff]  }
 0x278   :  { %4919 = vmatpush1.bf16.msra.mxu1 %v7452_v44 }
 0x279   :  { %4920 = vmatprep.subr.bf16.mxu1 %v7460_v45  ;;  %v7525_v45 = vld [vmem:[#allocation6 + $0x2d4] ss:$12 sps:$4 sm:$0xff]  }
 0x27a   :  { %3527 = vmatpush1.bf16.msra.mxu0 %v7455_v46  ;;  %v7526_v46 = vld [vmem:[#allocation6 + $0x80] ss:$12 sps:$4 sm:$0xff]  }
 0x27b   :  { %3528 = vmatprep.subr.bf16.mxu0 %v7463_v47  ;;  %v7527_v47 = vld [vmem:[#allocation6 + $0x158] ss:$12 sps:$4 sm:$0xff]  }
 0x27c   :  { %4921 = vmatpush1.bf16.msra.mxu1 %v7458_v48  ;;  %v7523_v48 = vld [vmem:[#allocation6 + $0x2d0] ss:$12 sps:$4 sm:$0xff]  }
 0x27d   :  { %4922 = vmatprep.subr.bf16.mxu1 %v7466_v49 }
 0x27e   :  { %3529 = vmatpush1.bf16.msra.mxu0 %v7461_v50 }
 0x27f   :  { %3530 = vmatprep.subr.bf16.mxu0 %v7469_v51  ;;  %v7530_v51 = vld [vmem:[#allocation6 + $0x2ec] ss:$12 sps:$4 sm:$0xff]  }
 0x280   :  { %4923 = vmatpush1.bf16.msra.mxu1 %v7464_v5 }
 0x281   :  { %4924 = vmatprep.subr.bf16.mxu1 %v7472_v52  ;;  %v7531_v52 = vld [vmem:[#allocation6 + $0x98] ss:$12 sps:$4 sm:$0xff]  }
 0x282   :  { %3531 = vmatpush1.bf16.msra.mxu0 %v7467_v53 }
 0x283   :  { %3532 = vmatprep.subr.bf16.mxu0 %v7475_v55 }
 0x284   :  { %4925 = vmatpush1.bf16.msra.mxu1 %v7470_v13 }
 0x285   :  { %4926 = vmatprep.subr.bf16.mxu1 %v7478_v34  ;;  %v7532_v34 = vld [vmem:[#allocation6 + $0x170] ss:$12 sps:$4 sm:$0xff]  }
 0x286   :  { %3533 = vmatpush1.bf16.msra.mxu0 %v7473_v58 }
 0x287   :  { %3534 = vmatprep.subr.bf16.mxu0 %v7481_v59  ;;  %v7528_v59 = vld [vmem:[#allocation6 + $0x2e8] ss:$12 sps:$4 sm:$0xff]  }
 0x288   :  { %4927 = vmatpush1.bf16.msra.mxu1 %v7476_v60  ;;  %v6502_v0 = vpop.f32.mrb[4].mxu1 }
 0x289   :  { %4928 = vmatprep.subr.bf16.mxu1 %v7484_v61  ;;  %v6503_v2 = vpop.f32.mrb[5].mxu1 }
 0x28a   :  { %3535 = vmatpush1.bf16.msra.mxu0 %v7479_v18  ;;  %v8218_v4 = vadd.f32 %v6503_v2, %v6502_v0  ;;  %v6505_v6 = vpop.f32.mrb[6].mxu1  ;;  %v7552_v18 = vld [vmem:[#allocation6 + $0x304] ss:$12 sps:$4 sm:$0xff]   ;;  %v7534_v0 = vld [vmem:[#allocation6 + $0x248] ss:$12 sps:$4 sm:$0xff]  }
 0x28b   :  { %3536 = vmatprep.subr.bf16.mxu0 %v7487_v62  ;;  %v6506_v8 = vpop.f32.mrb[7].mxu1  ;;  %v7533_v62 = vld [vmem:[#allocation6 + $0xb0] ss:$12 sps:$4 sm:$0xff]  }
 0x28c   :  { %4929 = vmatpush1.bf16.msra.mxu1 %v7482_v63  ;;  %v8220_v10 = vadd.f32 %v6506_v8, %v6505_v6  ;;  %v7555_v2 = vld [vmem:[#allocation6 + $0x31c] ss:$12 sps:$4 sm:$0xff]   ;;  %v7553_v6 = vld [vmem:[#allocation6 + $0x318] ss:$12 sps:$4 sm:$0xff]   ;;  %v7537_v8 = vld [vmem:[#allocation6 + $0x1a0] ss:$12 sps:$4 sm:$0xff]  }
 0x28d   :  { %4930 = vmatprep.subr.bf16.mxu1 %v7490_v1  ;;  %v7550_v1 = vld [vmem:[#allocation6 + $0x300] ss:$12 sps:$4 sm:$0xff]  }
 0x28e   :  { %3537 = vmatpush1.bf16.msra.mxu0 %v7485_v3  ;;  %v7535_v3 = vld [vmem:[#allocation6 + $0x188] ss:$12 sps:$4 sm:$0xff]  }
 0x28f   :  { %3538 = vmatprep.subr.bf16.mxu0 %v7493_v7  ;;  %v7558_v7 = vld [vmem:[#allocation6 + $0x334] ss:$12 sps:$4 sm:$0xff]  }
 0x290   :  { %4931 = vmatpush1.bf16.msra.mxu1 %v7488_v9  ;;  %v7538_v9 = vld [vmem:[#allocation6 + $0x278] ss:$12 sps:$4 sm:$0xff]  }
 0x291   :  { %4932 = vmatprep.subr.bf16.mxu1 %v7496_v11  ;;  %v7561_v11 = vld [vmem:[#allocation6 + $0x34c] ss:$12 sps:$4 sm:$0xff]  }
 0x292   :  { %3539 = vmatpush1.bf16.msra.mxu0 %v7491_v12  ;;  %v7539_v12 = vld [vmem:[#allocation6 + $0x1b8] ss:$12 sps:$4 sm:$0xff]  }
 0x293   :  { %6574 = vmatprep.subr.bf16.mxu0 %v7497_v14  ;;  %v7540_v14 = vld [vmem:[#allocation6 + $0x290] ss:$12 sps:$4 sm:$0xff]  }
 0x294   :  { %4933 = vmatpush1.bf16.msra.mxu1 %v7494_v15  ;;  %v7559_v15 = vld [vmem:[#allocation6 + $0x348] ss:$12 sps:$4 sm:$0xff]  }
 0x295   :  { %3541 = vmatmul.mubr.bf16.vlgmr.msra.gmra.mrb[4].mxu0 %v8168_v35  ;;  %4934 = vmatprep.subr.bf16.mxu1 %v7500_v19  ;;  %v7515_v35 = vld [vmem:[#allocation6 + $0x2a4] ss:$12 sps:$4 sm:$0xff]  }
 0x296   :  { %6575 = vmatpush3.bf16.msra.mxu0 %v7501_v20  ;;  %5077 = vmatprep.mubr.bf16.mxu0 %v8211_v40  ;;  %v682_v40 = vsub.s32 6, %v8187_v54  ;;  %v7541_v19 = vld [vmem:[#allocation6 + $0x1d0] ss:$12 sps:$4 sm:$0xff]   ;;  %v7542_v20 = vld [vmem:[#allocation6 + $0x2a8] ss:$12 sps:$4 sm:$0xff]  }
 0x297   :  { %6576 = vmatprep.subr.bf16.mxu0 %v7502_v21  ;;  %v7567_v21 = vld [vmem:[#allocation6 + $0x37c] ss:$12 sps:$4 sm:$0xff]  }
 0x298   :  { %4935 = vmatpush1.bf16.msra.mxu1 %v7498_v22  ;;  %v683_v44 = vrot.slane %v8193_v30, %v682_v40  ;;  %v7543_v22 = vld [vmem:[#allocation6 + $0x1e8] ss:$12 sps:$4 sm:$0xff]   ;;  %v7548_v40 = vld [vmem:[#allocation6 + $0x2f0] ss:$12 sps:$4 sm:$0xff]  }
 0x299   :  { %4936 = vmatprep.subr.bf16.mxu1 %v7505_v26  ;;  %v7544_v26 = vld [vmem:[#allocation6 + $0x2c0] ss:$12 sps:$4 sm:$0xff]  }
 0x29a   :  { %6577 = vmatpush3.bf16.msra.mxu0 %v7506_v27  ;;  %v3586_v49 = vadd.f32 %v8218_v4, %v683_v44  ;;  %v3589_v53 = vadd.f32 %v8220_v10, %v683_v44  ;;  %v7536_v4 = vld [vmem:[#allocation6 + $0x260] ss:$12 sps:$4 sm:$0xff]   ;;  %v7556_v10 = vld [vmem:[#allocation6 + $0x330] ss:$12 sps:$4 sm:$0xff]   ;;  %v7565_v27 = vld [vmem:[#allocation6 + $0x378] ss:$12 sps:$4 sm:$0xff]  }
 0x29b   :  { %6578 = vmatprep.subr.bf16.mxu0 %v7507_v28  ;;  %v7570_v28 = vld [vmem:[#allocation6 + $0x394] ss:$12 sps:$4 sm:$0xff]   ;;  %v7576_v44 = vld [vmem:[#allocation6 + $0x3c4] ss:$12 sps:$4 sm:$0xff]  }
 0x29c   :  { %4937 = vmatpush1.bf16.msra.mxu1 %v7503_v29  ;;  %v7545_v29 = vld [vmem:[#allocation6 + $0x200] ss:$12 sps:$4 sm:$0xff]  }
 0x29d   :  { %4938 = vmatprep.subr.bf16.mxu1 %v7510_v16  ;;  %v7546_v16 = vld [vmem:[#allocation6 + $0x2d8] ss:$12 sps:$4 sm:$0xff]  }
 0x29e   :  { %6579 = vmatpush3.bf16.msra.mxu0 %v7511_v17 }
 0x29f   :  { %6580 = vmatprep.subr.bf16.mxu0 %v7512_v31  ;;  %v7568_v31 = vld [vmem:[#allocation6 + $0x390] ss:$12 sps:$4 sm:$0xff]  }
 0x2a0   :  { %4939 = vmatpush1.bf16.msra.mxu1 %v7508_v32 }
 0x2a1   :  { %4940 = vmatprep.subr.bf16.mxu1 %v7515_v35  ;;  %v7573_v35 = vld [vmem:[#allocation6 + $0x3ac] ss:$12 sps:$4 sm:$0xff]  }
 0x2a2   :  { %6581 = vmatpush3.bf16.msra.mxu0 %v7516_v33  ;;  %v7547_v33 = vld [vmem:[#allocation6 + $0x218] ss:$12 sps:$4 sm:$0xff]  }
 0x2a3   :  { %6582 = vmatprep.subr.bf16.mxu0 %v7517_v36 }
 0x2a4   :  { %4941 = vmatpush1.bf16.msra.mxu1 %v7513_v39 }
 0x2a5   :  { %4942 = vmatprep.subr.bf16.mxu1 %v7520_v23 }
 0x2a6   :  { %6583 = vmatpush3.bf16.msra.mxu0 %v7521_v25 }
 0x2a7   :  { %6584 = vmatprep.subr.bf16.mxu0 %v7522_v42 }
 0x2a8   :  { %4943 = vmatpush1.bf16.msra.mxu1 %v7518_v43  ;;  %v6524_v50 = vpop.f32.mrb[8].mxu1  ;;  %v7571_v43 = vld [vmem:[#allocation6 + $0x3a8] ss:$12 sps:$4 sm:$0xff]  }
 0x2a9   :  { %4944 = vmatprep.subr.bf16.mxu1 %v7525_v45  ;;  %v6525_v5 = vpop.f32.mrb[9].mxu1  ;;  %v7549_v45 = vld [vmem:[#allocation6 + $0x230] ss:$12 sps:$4 sm:$0xff]  }
 0x2aa   :  { %6585 = vmatpush3.bf16.msra.mxu0 %v7526_v46  ;;  %v6526_v55 = vadd.f32 %v6525_v5, %v6524_v50  ;;  %v6527_v13 = vpop.f32.mrb[10].mxu1  ;;  %v7578_v50 = vld [vmem:[#allocation6 + $0x308] ss:$12 sps:$4 sm:$0xff]   ;;  %v7579_v5 = vld [vmem:[#allocation6 + $0x3d8] ss:$12 sps:$4 sm:$0xff]  }
 0x2ab   :  { %6586 = vmatprep.subr.bf16.mxu0 %v7527_v47  ;;  %v6528_v58 = vpop.f32.mrb[11].mxu1  ;;  %v7577_v47 = vld [vmem:[#allocation6 + $0x3c8] ss:$12 sps:$4 sm:$0xff]  }
 0x2ac   :  { %4945 = vmatpush1.bf16.msra.mxu1 %v7523_v48  ;;  %v8228_v60 = vadd.f32 %v6526_v55, %v3586_v49  ;;  %v6529_v61 = vadd.f32 %v6528_v58, %v6527_v13  ;;  %v7574_v48 = vld [vmem:[#allocation6 + $0x3c0] ss:$12 sps:$4 sm:$0xff]   ;;  %v7581_v49 = vld [vmem:[#allocation6 + $0x3dc] ss:$12 sps:$4 sm:$0xff]   ;;  %v7587_v55 = vld [vmem:[#allocation6 + $0x3f8] ss:$12 sps:$4 sm:$0xff]  }
 0x2ad   :  { %4946 = vmatprep.subr.bf16.mxu1 %v7530_v51  ;;  %v7582_v51 = vld [vmem:[#allocation6 + $0x3e0] ss:$12 sps:$4 sm:$0xff]   ;;  %v7584_v13 = vld [vmem:[#allocation6 + $0x3f0] ss:$12 sps:$4 sm:$0xff]   ;;  %v7588_v58 = vld [vmem:[#allocation6 + $0x338] ss:$12 sps:$4 sm:$0xff]  }
 0x2ae   :  { %6587 = vmatpush3.bf16.msra.mxu0 %v7531_v52  ;;  %v8230_v63 = vadd.f32 %v6529_v61, %v3589_v53  ;;  %v7586_v52 = vld [vmem:[#allocation6 + $0x3f4] ss:$12 sps:$4 sm:$0xff]   ;;  %v7596_v61 = vld [vmem:[#allocation6 + $0x424] ss:$12 sps:$4 sm:$0xff]  }
 0x2af   :  { %6588 = vmatprep.subr.bf16.mxu0 %v7532_v34  ;;  %v7583_v53 = vld [vmem:[#allocation6 + $0x320] ss:$12 sps:$4 sm:$0xff]  }
 0x2b0   :  { %4947 = vmatpush1.bf16.msra.mxu1 %v7528_v59  ;;  %v7591_v34 = vld [vmem:[#allocation6 + $0x40c] ss:$12 sps:$4 sm:$0xff]   ;;  %v7592_v59 = vld [vmem:[#allocation6 + $0x410] ss:$12 sps:$4 sm:$0xff]  }
 0x2b1   :  { %4959 = vmatprep.subr.bf16.mxu1 %v7552_v18  ;;  %v7597_v18 = vld [vmem:[#allocation6 + $0x428] ss:$12 sps:$4 sm:$0xff]  }
 0x2b2   :  { %6589 = vmatpush3.bf16.msra.mxu0 %v7533_v62  ;;  %v7594_v62 = vld [vmem:[#allocation6 + $0x420] ss:$12 sps:$4 sm:$0xff]  }
 0x2b3   :  { %4949 = vmatmul.mubr.bf16.vlgmr.msra.gmra.mrb[20].mxu1 %v8209_v38  ;;  %6596 = vmatprep.subr.bf16.mxu0 %v7534_v0  ;;  %v7598_v0 = vld [vmem:[#allocation6 + $0x368] ss:$12 sps:$4 sm:$0xff]  }
 0x2b4   :  { %4960 = vmatpush1.bf16.msra.mxu1 %v7550_v1  ;;  %v7602_v1 = vld [vmem:[#allocation6 + $0x440] ss:$12 sps:$4 sm:$0xff]  }
 0x2b5   :  { %5078 = vmatmul.mubr.bf16.vlgmr.msra.gmra.mrb[8].mxu0 %v8207_v37  ;;  %4961 = vmatprep.subr.bf16.mxu1 %v7555_v2  ;;  %v7564_v37 = vld [vmem:[#allocation6 + $0x364] ss:$12 sps:$4 sm:$0xff]  }
 0x2b6   :  { %6597 = vmatpush3.bf16.msra.mxu0 %v7535_v3  ;;  %5118 = vmatprep.mubr.bf16.mxu0 %v8213_v41  ;;  %v7562_v41 = vld [vmem:[#allocation6 + $0x360] ss:$12 sps:$4 sm:$0xff]   ;;  %v7599_v2 = vld [vmem:[#allocation6 + $0x438] ss:$12 sps:$4 sm:$0xff]  }
 0x2b7   :  { %6598 = vmatprep.subr.bf16.mxu0 %v7536_v4  ;;  %v7603_v3 = vld [vmem:[#allocation6 + $0x380] ss:$12 sps:$4 sm:$0xff]  }
 0x2b8   :  { %4962 = vmatpush1.bf16.msra.mxu1 %v7553_v6 }
 0x2b9   :  { %4963 = vmatprep.subr.bf16.mxu1 %v7558_v7  ;;  %v7606_v7 = vld [vmem:[#allocation6 + $0x454] ss:$12 sps:$4 sm:$0xff]  }
 0x2ba   :  { %6599 = vmatpush3.bf16.msra.mxu0 %v7537_v8  ;;  %v7607_v8 = vld [vmem:[#allocation6 + $0x458] ss:$12 sps:$4 sm:$0xff]  }
 0x2bb   :  { %6600 = vmatprep.subr.bf16.mxu0 %v7538_v9 }
 0x2bc   :  { %4964 = vmatpush1.bf16.msra.mxu1 %v7556_v10 }
 0x2bd   :  { %4965 = vmatprep.subr.bf16.mxu1 %v7561_v11  ;;  %v7604_v11 = vld [vmem:[#allocation6 + $0x450] ss:$12 sps:$4 sm:$0xff]  }
 0x2be   :  { %6601 = vmatpush3.bf16.msra.mxu0 %v7539_v12  ;;  %v7608_v12 = vld [vmem:[#allocation6 + $0x398] ss:$12 sps:$4 sm:$0xff]  }
 0x2bf   :  { %6602 = vmatprep.subr.bf16.mxu0 %v7540_v14 }
 0x2c0   :  { %4966 = vmatpush1.bf16.msra.mxu1 %v7559_v15 }
 0x2c1   :  { %4967 = vmatprep.subr.bf16.mxu1 %v7564_v37 }
 0x2c2   :  { %6603 = vmatpush3.bf16.msra.mxu0 %v7541_v19  ;;  %v7611_v19 = vld [vmem:[#allocation6 + $0x46c] ss:$12 sps:$4 sm:$0xff]  }
 0x2c3   :  { %6604 = vmatprep.subr.bf16.mxu0 %v7542_v20  ;;  %v7612_v20 = vld [vmem:[#allocation6 + $0x470] ss:$12 sps:$4 sm:$0xff]  }
 0x2c4   :  { %4968 = vmatpush1.bf16.msra.mxu1 %v7562_v41 }
 0x2c5   :  { %4969 = vmatprep.subr.bf16.mxu1 %v7567_v21 }
 0x2c6   :  { %6605 = vmatpush3.bf16.msra.mxu0 %v7543_v22  ;;  %v7609_v22 = vld [vmem:[#allocation6 + $0x468] ss:$12 sps:$4 sm:$0xff]  }
 0x2c7   :  { %6606 = vmatprep.subr.bf16.mxu0 %v7544_v26  ;;  %v7613_v26 = vld [vmem:[#allocation6 + $0x3b0] ss:$12 sps:$4 sm:$0xff]  }
 0x2c8   :  { %v6546_v17 = vpop.f32.mrb[12].mxu1  ;;  %4970 = vmatpush1.bf16.msra.mxu1 %v7565_v27 }
 0x2c9   :  { %v6547_v32 = vpop.f32.mrb[13].mxu1  ;;  %4971 = vmatprep.subr.bf16.mxu1 %v7570_v28  ;;  %v7616_v28 = vld [vmem:[#allocation6 + $0x484] ss:$12 sps:$4 sm:$0xff]  }
 0x2ca   :  { %6607 = vmatpush3.bf16.msra.mxu0 %v7545_v29  ;;  %v6548_v36 = vadd.f32 %v6547_v32, %v6546_v17  ;;  %v6549_v39 = vpop.f32.mrb[14].mxu1  ;;  %v674_v17 = vsub.s32 4, %v8187_v54 }
 0x2cb   :  { %6608 = vmatprep.subr.bf16.mxu0 %v7546_v16  ;;  %v6550_v23 = vpop.f32.mrb[15].mxu1  ;;  %v7936_v16 = vmov 0.0  }
 0x2cc   :  { %v8236_v25 = vadd.f32 %v6548_v36, %v8228_v60  ;;  %v6551_v42 = vadd.f32 %v6550_v23, %v6549_v39  ;;  %4972 = vmatpush1.bf16.msra.mxu1 %v7568_v31  ;;  %v7589_v60 = vld [vmem:[#allocation6 + $0x408] ss:$12 sps:$4 sm:$0xff]   ;;  %v678_v31 = vsub.s32 5, %v8187_v54  ;;  %v675_v32 = vrot.slane %v8193_v30, %v674_v17  ;;  %v8262_v17 = vld [vmem:[#allocation7] sm:$0x7] }
 0x2cd   :  { %4973 = vmatprep.subr.bf16.mxu1 %v7573_v35  ;;  %v7667_v54 = vld [vmem:[#allocation9 + $0x70] ss:$8 sps:$4 sm:$0xff]  }
 0x2ce   :  { %6609 = vmatpush3.bf16.msra.mxu0 %v7547_v33  ;;  %v8239_v46 = vadd.f32 %v6551_v42, %v8230_v63  ;;  %v7601_v63 = vld [vmem:[#allocation6 + $0x43c] ss:$12 sps:$4 sm:$0xff]   ;;  %v679_v35 = vrot.slane %v8193_v30, %v678_v31  ;;  %v7618_v30 = vld [vmem:[#allocation6 + $0x498] ss:$12 sps:$4 sm:$0xff]   ;;  %v3973_v31 = vrot.slane %v8262_v17, %v666_v24 }
 0x2cf   :  { %6610 = vmatprep.subr.bf16.mxu0 %v7548_v40  ;;  %v7672_v24 = vld [vmem:[#allocation9 + $0x84] ss:$8 sps:$4 sm:$0xff]  }
 0x2d0   :  { %4974 = vmatpush1.bf16.msra.mxu1 %v7571_v43 }
 0x2d1   :  { %4975 = vmatprep.subr.bf16.mxu1 %v7576_v44 }
 0x2d2   :  { %6611 = vmatpush3.bf16.msra.mxu0 %v7549_v45 }
 0x2d3   :  { %6618 = vmatprep.subr.bf16.mxu0 %v7577_v47 }
 0x2d4   :  { %4976 = vmatpush1.bf16.msra.mxu1 %v7574_v48 }
 0x2d5   :  { %5119 = vmatmul.mubr.bf16.vlgmr.msra.gmra.mrb[12].mxu0 %v8209_v38  ;;  %4977 = vmatprep.subr.bf16.mxu1 %v7581_v49  ;;  %v7593_v38 = vld [vmem:[#allocation6 + $0x350] ss:$12 sps:$4 sm:$0xff]  }
 0x2d6   :  { %6619 = vmatpush3.bf16.msra.mxu0 %v7578_v50  ;;  %v7614_v50 = vld [vmem:[#allocation6 + $0x480] ss:$12 sps:$4 sm:$0xff]  }
 0x2d7   :  { %6620 = vmatprep.subr.bf16.mxu0 %v7582_v51  ;;  %v7617_v51 = vld [vmem:[#allocation6 + $0x488] ss:$12 sps:$4 sm:$0xff]  }
 0x2d8   :  { %4978 = vmatpush1.bf16.msra.mxu1 %v7579_v5  ;;  %v7620_v5 = vld [vmem:[#allocation6 + $0x49c] ss:$12 sps:$4 sm:$0xff]  }
 0x2d9   :  { %4979 = vmatprep.subr.bf16.mxu1 %v7586_v52  ;;  %v7621_v52 = vld [vmem:[#allocation6 + $0x4a0] ss:$12 sps:$4 sm:$0xff]  }
 0x2da   :  { %6621 = vmatpush3.bf16.msra.mxu0 %v7583_v53  ;;  %v7624_v53 = vld [vmem:[#allocation6 + $0x4b4] ss:$12 sps:$4 sm:$0xff]  }
 0x2db   :  { %6622 = vmatprep.subr.bf16.mxu0 %v7587_v55  ;;  %v7937_v55 = vmov 0  }
 0x2dc   :  { %4980 = vmatpush1.bf16.msra.mxu1 %v7584_v13  ;;  %v7622_v13 = vld [vmem:[#allocation6 + $0x4b0] ss:$12 sps:$4 sm:$0xff]  }
 0x2dd   :  { %4981 = vmatprep.subr.bf16.mxu1 %v7591_v34  ;;  %v7625_v34 = vld [vmem:[#allocation6 + $0x4b8] ss:$12 sps:$4 sm:$0xff]  }
 0x2de   :  { %6623 = vmatpush3.bf16.msra.mxu0 %v7588_v58  ;;  %v7628_v58 = vld [vmem:[#allocation6 + $0x4cc] ss:$12 sps:$4 sm:$0xff]  }
 0x2df   :  { %6624 = vmatprep.subr.bf16.mxu0 %v7592_v59  ;;  %v7626_v59 = vld [vmem:[#allocation6 + $0x4c8] ss:$12 sps:$4 sm:$0xff]  }
 0x2e0   :  { %4982 = vmatpush1.bf16.msra.mxu1 %v7589_v60  ;;  %v7629_v60 = vld [vmem:[#allocation6 + $0x4d0] ss:$12 sps:$4 sm:$0xff]  }
 0x2e1   :  { %4983 = vmatprep.subr.bf16.mxu1 %v7596_v61  ;;  %v7632_v61 = vld [vmem:[#allocation6 + $0x4e4] ss:$12 sps:$4 sm:$0xff]  }
 0x2e2   :  { %6625 = vmatpush3.bf16.msra.mxu0 %v7593_v38  ;;  %v7630_v38 = vld [vmem:[#allocation6 + $0x4e0] ss:$12 sps:$4 sm:$0xff]  }
 0x2e3   :  { %6626 = vmatprep.subr.bf16.mxu0 %v7597_v18  ;;  %v7633_v18 = vld [vmem:[#allocation6 + $0x4e8] ss:$12 sps:$4 sm:$0xff]  }
 0x2e4   :  { %4984 = vmatpush1.bf16.msra.mxu1 %v7594_v62  ;;  %v7636_v62 = vld [vmem:[#allocation6 + $0x4fc] ss:$12 sps:$4 sm:$0xff]  }
 0x2e5   :  { %4985 = vmatprep.subr.bf16.mxu1 %v7601_v63  ;;  %v7634_v63 = vld [vmem:[#allocation6 + $0x4f8] ss:$12 sps:$4 sm:$0xff]  }
 0x2e6   :  { %6627 = vmatpush3.bf16.msra.mxu0 %v7598_v0  ;;  %v7637_v0 = vld [vmem:[#allocation6 + $0x500] ss:$12 sps:$4 sm:$0xff]  }
 0x2e7   :  { %6628 = vmatprep.subr.bf16.mxu0 %v7602_v1  ;;  %v7640_v1 = vld [vmem:[#allocation6 + $0x514] ss:$12 sps:$4 sm:$0xff]  }
 0x2e8   :  { %v6568_v4 = vpop.f32.mrb[16].mxu1  ;;  %4986 = vmatpush1.bf16.msra.mxu1 %v7599_v2 }
 0x2e9   :  { %v6569_v6 = vpop.f32.mrb[17].mxu1  ;;  %4987 = vmatprep.subr.bf16.mxu1 %v7606_v7  ;;  %v7644_v7 = vld [vmem:[#allocation6 + $0x52c] ss:$12 sps:$4 sm:$0xff]  }
 0x2ea   :  { %v6570_v9 = vadd.f32 %v6569_v6, %v6568_v4  ;;  %v6571_v10 = vpop.f32.mrb[18].mxu1  ;;  %6629 = vmatpush3.bf16.msra.mxu0 %v7603_v3  ;;  %v7638_v3 = vld [vmem:[#allocation6 + $0x510] ss:$12 sps:$4 sm:$0xff]   ;;  %v7641_v4 = vld [vmem:[#allocation6 + $0x518] ss:$12 sps:$4 sm:$0xff]  }
 0x2eb   :  { %v6572_v14 = vpop.f32.mrb[19].mxu1  ;;  %6630 = vmatprep.subr.bf16.mxu0 %v7607_v8 }
 0x2ec   :  { %v3709_v15 = vadd.f32 %v6570_v9, %v8236_v25  ;;  %v6573_v37 = vadd.f32 %v6572_v14, %v6571_v10  ;;  %4988 = vmatpush1.bf16.msra.mxu1 %v7604_v11  ;;  %v7645_v14 = vld [vmem:[#allocation6 + $0x530] ss:$12 sps:$4 sm:$0xff]  }
 0x2ed   :  { %4989 = vmatprep.subr.bf16.mxu1 %v7611_v19  ;;  %v7651_v19 = vld [vmem:[#allocation9 + $0x14] ss:$8 sps:$4 sm:$0xff]  }
 0x2ee   :  { %v3721_v41 = vmax.f32 %v3709_v15, 0.0  ;;  %v3712_v21 = vadd.f32 %v6573_v37, %v8239_v46  ;;  %6631 = vmatpush3.bf16.msra.mxu0 %v7608_v12  ;;  %v7642_v12 = vld [vmem:[#allocation6 + $0x528] ss:$12 sps:$4 sm:$0xff]   ;;  %v7646_v37 = vld [vmem:[#allocation9] ss:$8 sps:$4 sm:$0xff]  }
 0x2ef   :  { %6632 = vmatprep.subr.bf16.mxu0 %v7612_v20  ;;  %v7648_v15 = vld [vmem:[#allocation9 + $0x4] ss:$8 sps:$4 sm:$0xff]   ;;  %v7649_v20 = vld [vmem:[#allocation9 + $0x10] ss:$8 sps:$4 sm:$0xff]  }
 0x2f0   :  { %v3728_v27 = vmax.f32 %v3712_v21, 0.0  ;;  %4990 = vmatpush1.bf16.msra.mxu1 %v7609_v22  ;;  %v7652_v21 = vld [vmem:[#allocation9 + $0x20] ss:$8 sps:$4 sm:$0xff]   ;;  %v7657_v22 = vld [vmem:[#allocation9 + $0x34] ss:$8 sps:$4 sm:$0xff]  }
 0x2f1   :  { %5002 = vmatprep.subr.bf16.mxu1 %v7616_v28  ;;  %v7658_v28 = vld [vmem:[#allocation9 + $0x40] ss:$8 sps:$4 sm:$0xff]  }
 0x2f2   :  { %v8244_v29 = vpack.c.bf16 %v3728_v27, %v3721_v41  ;;  %6633 = vmatpush3.bf16.msra.mxu0 %v7613_v26  ;;  %v7654_v41 = vld [vmem:[#allocation9 + $0x24] ss:$8 sps:$4 sm:$0xff]   ;;  %v7655_v26 = vld [vmem:[#allocation9 + $0x30] ss:$8 sps:$4 sm:$0xff]  }
 0x2f3   :  { %6671 = vmatprep.subr.bf16.mxu0 %v7936_v16  ;;  %v7660_v27 = vld [vmem:[#allocation9 + $0x44] ss:$8 sps:$4 sm:$0xff]  }
 0x368   :  { %v3542_v33 = vpop.f32.mrb[4].mxu0 }
 0x369   :  { %v6699_v36 = vadd.f32 %v3542_v33, %v675_v32  ;;  %v3544_v39 = vpop.f32.mrb[5].mxu0 }
 0x36a   :  { %v6700_v40 = vadd.f32 %v3544_v39, %v679_v35  ;;  %v3546_v23 = vpop.f32.mrb[6].mxu0 }
 0x36b   :  { %v6701_v25 = vadd.f32 %v3546_v23, %v675_v32  ;;  %v3548_v42 = vpop.f32.mrb[7].mxu0  ;;  %v3719_v44 = vmax.f32 %v6699_v36, 0.0 }
 0x36c   :  { %v6702_v43 = vadd.f32 %v3548_v42, %v679_v35  ;;  %v3720_v46 = vmax.f32 %v6700_v40, 0.0 }
 0x36d   :  { %v3726_v45 = vmax.f32 %v6701_v25, 0.0 }
 0x36e   :  { %v3727_v47 = vmax.f32 %v6702_v43, 0.0 }
 0x36f   :  { %v3733_v48 = vpack.c.bf16 %v3726_v45, %v3719_v44  ;;  %v7666_v44 = vld [vmem:[#allocation9 + $0x64] ss:$8 sps:$4 sm:$0xff]   ;;  %v7664_v45 = vld [vmem:[#allocation9 + $0x60] ss:$8 sps:$4 sm:$0xff]  }
 0x370   :  { %v3734_v49 = vpack.c.bf16 %v3727_v47, %v3720_v46  ;;  %v7669_v46 = vld [vmem:[#allocation9 + $0x74] ss:$8 sps:$4 sm:$0xff]   ;;  %v7670_v47 = vld [vmem:[#allocation9 + $0x80] ss:$8 sps:$4 sm:$0xff]  }
 0x372   :  { %4991 = vmatprep.mubr.bf16.mxu1 %v3734_v49  ;;  %5159 = vmatprep.mubr.bf16.mxu0 %v3734_v49  ;;  %v7673_v49 = vld [vmem:[#allocation9 + $0x90] ss:$8 sps:$4 sm:$0xff]  }
 0x373   :  { %4992 = vmatmul.mubr.bf16.vlgmr.msra.gmra.mrb[20].mxu1 %v3733_v48  ;;  %5160 = vmatmul.mubr.bf16.vlgmr.msra.gmra.mrb[16].mxu0 %v3733_v48  ;;  %v7675_v48 = vld [vmem:[#allocation9 + $0x94] ss:$8 sps:$4 sm:$0xff]  }
 0x374   :  { %5003 = vmatpush1.bf16.msra.mxu1 %v7614_v50  ;;  %6672 = vmatpush3.bf16.msra.mxu0 %v7617_v51  ;;  %v7678_v50 = vld [vmem:[#allocation9 + $0xa4] ss:$8 sps:$4 sm:$0xff]   ;;  %v7676_v51 = vld [vmem:[#allocation9 + $0xa0] ss:$8 sps:$4 sm:$0xff]  }
 0x375   :  { %5004 = vmatprep.subr.bf16.mxu1 %v7620_v5  ;;  %6673 = vmatprep.subr.bf16.mxu0 %v7936_v16  ;;  %v7681_v5 = vld [vmem:[#allocation9 + $0xb4] ss:$8 sps:$4 sm:$0xff]  }
 0x376   :  { %5034 = vmatprep.mubr.bf16.mxu1 %v7937_v55  ;;  %6687 = vmatprep.mubr.msk.bf16.mxu0 %vm7938_vm0, %v7936_v16 }
 0x378   :  { %5005 = vmatpush1.bf16.msra.mxu1 %v7618_v30  ;;  %6674 = vmatpush3.bf16.msra.mxu0 %v7621_v52  ;;  %v7679_v30 = vld [vmem:[#allocation9 + $0xb0] ss:$8 sps:$4 sm:$0xff]   ;;  %v7684_v52 = vld [vmem:[#allocation9 + $0xc4] ss:$8 sps:$4 sm:$0xff]  }
 0x379   :  { %5006 = vmatprep.subr.bf16.mxu1 %v7624_v53  ;;  %6675 = vmatprep.subr.bf16.mxu0 %v7936_v16  ;;  %v7682_v53 = vld [vmem:[#allocation9 + $0xc0] ss:$8 sps:$4 sm:$0xff]  }
 0x37c   :  { %5007 = vmatpush1.bf16.msra.mxu1 %v7622_v13  ;;  %6676 = vmatpush3.bf16.msra.mxu0 %v7625_v34  ;;  %v7687_v13 = vld [vmem:[#allocation9 + $0xd4] ss:$8 sps:$4 sm:$0xff]   ;;  %v7685_v34 = vld [vmem:[#allocation9 + $0xd0] ss:$8 sps:$4 sm:$0xff]  }
 0x37d   :  { %5008 = vmatprep.subr.bf16.mxu1 %v7628_v58  ;;  %6677 = vmatprep.subr.bf16.mxu0 %v7936_v16  ;;  %v7690_v58 = vld [vmem:[#allocation9 + $0xe4] ss:$8 sps:$4 sm:$0xff]  }
 0x380   :  { %5009 = vmatpush1.bf16.msra.mxu1 %v7626_v59  ;;  %6678 = vmatpush3.bf16.msra.mxu0 %v7629_v60  ;;  %v7688_v59 = vld [vmem:[#allocation9 + $0xe0] ss:$8 sps:$4 sm:$0xff]   ;;  %v7693_v60 = vld [vmem:[#allocation9 + $0xf4] ss:$8 sps:$4 sm:$0xff]  }
 0x381   :  { %5010 = vmatprep.subr.bf16.mxu1 %v7632_v61  ;;  %6679 = vmatprep.subr.bf16.mxu0 %v7936_v16  ;;  %v7691_v61 = vld [vmem:[#allocation9 + $0xf0] ss:$8 sps:$4 sm:$0xff]  }
 0x384   :  { %5011 = vmatpush1.bf16.msra.mxu1 %v7630_v38  ;;  %6680 = vmatpush3.bf16.msra.mxu0 %v7633_v18  ;;  %v7696_v38 = vld [vmem:[#allocation9 + $0x104] ss:$8 sps:$4 sm:$0xff]  }
 0x385   :  { %5012 = vmatprep.subr.bf16.mxu1 %v7636_v62  ;;  %6681 = vmatprep.subr.bf16.mxu0 %v7936_v16  ;;  %v7718_v18 = vld [vmem:[#allocation12 + $0x40] sm:$0xff]  }
 0x386   :  { %v7719_v62 = vld [vmem:[#allocation12] sm:$0xff]  }
 0x388   :  { %5013 = vmatpush1.bf16.msra.mxu1 %v7634_v63  ;;  %6682 = vmatpush3.bf16.msra.mxu0 %v7637_v0  ;;  %v6590_v2 = vpop.f32.mrb[8].mxu0  ;;  %v7720_v63 = vld [vmem:[#allocation12 + $0x48] sm:$0xff]  }
 0x389   :  { %v6591_v6 = vpop.f32.mrb[9].mxu0  ;;  %5014 = vmatprep.subr.bf16.mxu1 %v7640_v1  ;;  %6683 = vmatprep.subr.bf16.mxu0 %v7936_v16  ;;  %v7721_v0 = vld [vmem:[#allocation12 + $0x8] sm:$0xff]   ;;  %v7722_v1 = vld [vmem:[#allocation12 + $0x50] sm:$0xff]  }
 0x38a   :  { %v6592_v8 = vadd.f32 %v6591_v6, %v6590_v2  ;;  %v6593_v9 = vpop.f32.mrb[10].mxu0  ;;  %v7723_v2 = vld [vmem:[#allocation12 + $0x10] sm:$0xff]   ;;  %v7726_v6 = vld [vmem:[#allocation12 + $0x60] sm:$0xff]  }
 0x38b   :  { %v6594_v10 = vpop.f32.mrb[11].mxu0 }
 0x38c   :  { %5015 = vmatpush1.bf16.msra.mxu1 %v7638_v3  ;;  %v6595_v11 = vadd.f32 %v6594_v10, %v6593_v9  ;;  %6684 = vmatpush3.bf16.msra.mxu0 %v7641_v4  ;;  %v5080_v33 = vadd.f32 %v6592_v8, %v3973_v31  ;;  %v7724_v3 = vld [vmem:[#allocation12 + $0x58] sm:$0xff]   ;;  %v7728_v8 = vld [vmem:[#allocation12 + $0x68] sm:$0xff]  }
 0x38d   :  { %5016 = vmatprep.subr.bf16.mxu1 %v7644_v7  ;;  %6685 = vmatprep.subr.bf16.mxu0 %v7936_v16  ;;  %v7663_v16 = vld [vmem:[#allocation9 + $0x54] ss:$8 sps:$4 sm:$0xff]   ;;  %v7727_v7 = vld [vmem:[#allocation12 + $0x20] sm:$0xff]  }
 0x38e   :  { %v5083_v23 = vadd.f32 %v6595_v11, %v3973_v31  ;;  %v7725_v4 = vld [vmem:[#allocation12 + $0x18] sm:$0xff]  }
 0x390   :  { %5017 = vmatpush1.bf16.msra.mxu1 %v7642_v12  ;;  %6686 = vmatpush3.bf16.msra.mxu0 %v7645_v14 }
 0x391   :  { %5518 = vmatprep.subr.bf16.mxu1 %v7648_v15  ;;  %6649 = vmatprep.subr.bf16.mxu0 %v7718_v18  ;;  %v7732_v18 = vld [vmem:[#allocation12 + $0x78] sm:$0xff]  }
 0x393   :  { %5035 = vmatmul.mubr.bf16.vlgmr.msra.gmra.mrb[20].mxu1 %v8244_v29  ;;  %6688 = vmatmul.mubr.bf16.vlgmr.msra.gmra.mrb[20].mxu0 %v8244_v29  ;;  %v7661_v29 = vld [vmem:[#allocation9 + $0x50] ss:$8 sps:$4 sm:$0xff]  }
 0x394   :  { %5519 = vmatpush1.bf16.msra.mxu1 %v7646_v37  ;;  %6650 = vmatpush3.bf16.msra.mxu0 %v7719_v62  ;;  %v7733_v62 = vld [vmem:[#allocation12 + $0x38] sm:$0xff]  }
 0x395   :  { %5520 = vmatprep.subr.bf16.mxu1 %v7651_v19  ;;  %6651 = vmatprep.subr.bf16.mxu0 %v7720_v63  ;;  %v5266_v63 = vld [vmem:[#allocation10] sm:$0x3] }
 0x398   :  { %5521 = vmatpush1.bf16.msra.mxu1 %v7649_v20  ;;  %6652 = vmatpush3.bf16.msra.mxu0 %v7721_v0  ;;  %v3965_v20 = vrot.slane %v8262_v17, %v8190_v56  ;;  %v5271_v0 = vrot.slane %v5266_v63, %v8190_v56  ;;  %v6469_v56 = vld [vmem:[#allocation13] ss:$0 sm:$0xff] }
 0x399   :  { %5522 = vmatprep.subr.bf16.mxu1 %v7654_v41  ;;  %6653 = vmatprep.subr.bf16.mxu0 %v7722_v1  ;;  %v3969_v41 = vrot.slane %v8262_v17, %v8196_v57  ;;  %v5275_v1 = vrot.slane %v5266_v63, %v8196_v57 }
 0x39c   :  { %5523 = vmatpush1.bf16.msra.mxu1 %v7652_v21  ;;  %6654 = vmatpush3.bf16.msra.mxu0 %v7723_v2 }
 0x39d   :  { %5524 = vmatprep.subr.bf16.mxu1 %v7657_v22  ;;  %6655 = vmatprep.subr.bf16.mxu0 %v7724_v3 }
 0x3a0   :  { %5525 = vmatpush1.bf16.msra.mxu1 %v7655_v26  ;;  %6656 = vmatpush3.bf16.msra.mxu0 %v7725_v4 }
 0x3a1   :  { %5526 = vmatprep.subr.bf16.mxu1 %v7660_v27  ;;  %6657 = vmatprep.subr.bf16.mxu0 %v7726_v6 }
 0x3a4   :  { %5527 = vmatpush1.bf16.msra.mxu1 %v7658_v28  ;;  %6658 = vmatpush3.bf16.msra.mxu0 %v7727_v7 }
 0x3a5   :  { %5528 = vmatprep.subr.bf16.mxu1 %v7663_v16  ;;  %6659 = vmatprep.subr.bf16.mxu0 %v7728_v8 }
 0x3a8   :  { %v6612_v32 = vpop.f32.mrb[12].mxu0  ;;  %5529 = vmatpush1.bf16.msra.mxu1 %v7661_v29 }
 0x3a9   :  { %v6613_v35 = vpop.f32.mrb[13].mxu0  ;;  %5530 = vmatprep.subr.bf16.mxu1 %v7666_v44 }
 0x3aa   :  { %v6614_v36 = vadd.f32 %v6613_v35, %v6612_v32  ;;  %v6615_v39 = vpop.f32.mrb[14].mxu0 }
 0x3ab   :  { %v6616_v40 = vpop.f32.mrb[15].mxu0 }
 0x3ac   :  { %v8267_v25 = vadd.f32 %v6614_v36, %v5080_v33  ;;  %v6617_v42 = vadd.f32 %v6616_v40, %v6615_v39  ;;  %5531 = vmatpush1.bf16.msra.mxu1 %v7664_v45 }
 0x3ad   :  { %5532 = vmatprep.subr.bf16.mxu1 %v7669_v46 }
 0x3ae   :  { %v8269_v43 = vadd.f32 %v6617_v42, %v5083_v23 }
 0x3b0   :  { %5533 = vmatpush1.bf16.msra.mxu1 %v7667_v54 }
 0x3b1   :  { %5534 = vmatprep.subr.bf16.mxu1 %v7672_v24  ;;  %v7694_v24 = vld [vmem:[#allocation9 + $0x100] ss:$8 sps:$4 sm:$0xff]  }
 0x3b4   :  { %5535 = vmatpush1.bf16.msra.mxu1 %v7670_v47  ;;  %v7699_v47 = vld [vmem:[#allocation9 + $0x114] ss:$8 sps:$4 sm:$0xff]  }
 0x3b5   :  { %5536 = vmatprep.subr.bf16.mxu1 %v7675_v48  ;;  %v7697_v48 = vld [vmem:[#allocation9 + $0x110] ss:$8 sps:$4 sm:$0xff]  }
 0x3b8   :  { %5537 = vmatpush1.bf16.msra.mxu1 %v7673_v49  ;;  %v7702_v49 = vld [vmem:[#allocation9 + $0x124] ss:$8 sps:$4 sm:$0xff]  }
 0x3b9   :  { %5538 = vmatprep.subr.bf16.mxu1 %v7678_v50  ;;  %v7700_v50 = vld [vmem:[#allocation9 + $0x120] ss:$8 sps:$4 sm:$0xff]  }
 0x3bc   :  { %5539 = vmatpush1.bf16.msra.mxu1 %v7676_v51  ;;  %v7705_v51 = vld [vmem:[#allocation9 + $0x134] ss:$8 sps:$4 sm:$0xff]  }
 0x3bd   :  { %5540 = vmatprep.subr.bf16.mxu1 %v7681_v5  ;;  %v7703_v5 = vld [vmem:[#allocation9 + $0x130] ss:$8 sps:$4 sm:$0xff]  }
 0x3c0   :  { %5541 = vmatpush1.bf16.msra.mxu1 %v7679_v30  ;;  %v7708_v30 = vld [vmem:[#allocation9 + $0x144] ss:$8 sps:$4 sm:$0xff]  }
 0x3c1   :  { %5542 = vmatprep.subr.bf16.mxu1 %v7684_v52  ;;  %v7706_v52 = vld [vmem:[#allocation9 + $0x140] ss:$8 sps:$4 sm:$0xff]  }
 0x3c4   :  { %5543 = vmatpush1.bf16.msra.mxu1 %v7682_v53  ;;  %v7711_v53 = vld [vmem:[#allocation9 + $0x154] ss:$8 sps:$4 sm:$0xff]  }
 0x3c5   :  { %5544 = vmatprep.subr.bf16.mxu1 %v7687_v13  ;;  %v7709_v13 = vld [vmem:[#allocation9 + $0x150] ss:$8 sps:$4 sm:$0xff]  }
 0x3c8   :  { %5545 = vmatpush1.bf16.msra.mxu1 %v7685_v34  ;;  %v7714_v34 = vld [vmem:[#allocation9 + $0x164] ss:$8 sps:$4 sm:$0xff]  }
 0x3c9   :  { %5546 = vmatprep.subr.bf16.mxu1 %v7690_v58  ;;  %v7717_v58 = vld [vmem:[#allocation9 + $0x174] ss:$8 sps:$4 sm:$0xff]  }
 0x3cc   :  { %5547 = vmatpush1.bf16.msra.mxu1 %v7688_v59  ;;  %v7715_v59 = vld [vmem:[#allocation9 + $0x170] ss:$8 sps:$4 sm:$0xff]  }
 0x3cd   :  { %5548 = vmatprep.subr.bf16.mxu1 %v7693_v60  ;;  %v7729_v60 = vld [vmem:[#allocation12 + $0x28] sm:$0xff]  }
 0x3ce   :  { %6660 = vmatpush3.bf16.msra.mxu0 %v7729_v60 }
 0x3d0   :  { %5549 = vmatpush1.bf16.msra.mxu1 %v7691_v61  ;;  %v7730_v61 = vld [vmem:[#allocation12 + $0x70] sm:$0xff]  }
 0x3d1   :  { %5561 = vmatprep.subr.bf16.mxu1 %v7696_v38  ;;  %v7731_v38 = vld [vmem:[#allocation12 + $0x30] sm:$0xff]   ;;  %6661 = vmatprep.subr.bf16.mxu0 %v7730_v61 }
 0x3d2   :  { %6662 = vmatpush3.bf16.msra.mxu0 %v7731_v38 }
 0x3d3   :  { %6663 = vmatprep.subr.bf16.mxu0 %v7732_v18 }
 0x3d6   :  { %6664 = vmatpush3.bf16.msra.mxu0 %v7733_v62 }
 0x446   :  { %v6634_v9 = vpop.f32.mrb[16].mxu0 }
 0x447   :  { %v6635_v10 = vpop.f32.mrb[17].mxu0 }
 0x448   :  { %v6636_v11 = vadd.f32 %v6635_v10, %v6634_v9  ;;  %v6637_v12 = vpop.f32.mrb[18].mxu0 }
 0x449   :  { %v6638_v14 = vpop.f32.mrb[19].mxu0 }
 0x44a   :  { %v6639_v15 = vadd.f32 %v6638_v14, %v6637_v12  ;;  %v5162_v37 = vadd.f32 %v6636_v11, %v8267_v25 }
 0x44c   :  { %v5165_v19 = vadd.f32 %v6639_v15, %v8269_v43 }
 0x466   :  { %v5036_v21 = vpop.f32.mrb[20].mxu1  ;;  %v5202_v22 = vpop.f32.mrb[20].mxu0 }
 0x467   :  { %v6703_v26 = vadd.f32 %v5036_v21, %v3965_v20  ;;  %v5203_v27 = vadd.f32 %v5202_v22, %v5162_v37  ;;  %v5038_v28 = vpop.f32.mrb[21].mxu1  ;;  %v6689_v16 = vpop.f32.mrb[21].mxu0 }
 0x468   :  { %v6704_v29 = vadd.f32 %v5038_v28, %v3969_v41  ;;  %v5040_v31 = vpop.f32.mrb[22].mxu1  ;;  %v5205_v32 = vpop.f32.mrb[22].mxu0 }
 0x469   :  { %v6705_v35 = vadd.f32 %v5040_v31, %v3965_v20  ;;  %v5206_v33 = vadd.f32 %v5205_v32, %v5165_v19  ;;  %v5042_v36 = vpop.f32.mrb[23].mxu1  ;;  %v6690_v39 = vpop.f32.mrb[23].mxu0  ;;  %v5209_v23 = vmax.f32 %v6703_v26, 0.0  ;;  %v5211_v25 = vmax.f32 %v5203_v27, 0.0 }
 0x46a   :  { %v6706_v40 = vadd.f32 %v5042_v36, %v3969_v41  ;;  %v5210_v44 = vmax.f32 %v6704_v29, 0.0 }
 0x46b   :  { %v5212_v42 = vmax.f32 %v6705_v35, 0.0  ;;  %v5214_v43 = vmax.f32 %v5206_v33, 0.0 }
 0x46c   :  { %v5213_v17 = vmax.f32 %v6706_v40, 0.0 }
 0x46d   :  { %v5215_v45 = vpack.c.bf16 %v5212_v42, %v5209_v23  ;;  %v5217_v54 = vpack.c.bf16 %v5214_v43, %v5211_v25 }
 0x46e   :  { %v5216_v46 = vpack.c.bf16 %v5213_v17, %v5210_v44 }
 0x470   :  { %5550 = vmatprep.mubr.bf16.mxu1 %v5216_v46 }
 0x471   :  { %5551 = vmatmul.mubr.bf16.vlgmr.msra.gmra.mrb[24].mxu1 %v5215_v45 }
 0x472   :  { %5562 = vmatpush1.bf16.msra.mxu1 %v7694_v24  ;;  %5593 = vmatprep.mubr.bf16.mxu1 %v7937_v55  ;;  %v7712_v55 = vld [vmem:[#allocation9 + $0x160] ss:$8 sps:$4 sm:$0xff]  }
 0x473   :  { %5563 = vmatprep.subr.bf16.mxu1 %v7699_v47 }
 0x476   :  { %5564 = vmatpush1.bf16.msra.mxu1 %v7697_v48 }
 0x477   :  { %5565 = vmatprep.subr.bf16.mxu1 %v7702_v49 }
 0x47a   :  { %5566 = vmatpush1.bf16.msra.mxu1 %v7700_v50 }
 0x47b   :  { %5567 = vmatprep.subr.bf16.mxu1 %v7705_v51 }
 0x47e   :  { %5568 = vmatpush1.bf16.msra.mxu1 %v7703_v5 }
 0x47f   :  { %5569 = vmatprep.subr.bf16.mxu1 %v7708_v30 }
 0x482   :  { %5570 = vmatpush1.bf16.msra.mxu1 %v7706_v52 }
 0x483   :  { %5571 = vmatprep.subr.bf16.mxu1 %v7711_v53 }
 0x486   :  { %5572 = vmatpush1.bf16.msra.mxu1 %v7709_v13 }
 0x487   :  { %5573 = vmatprep.subr.bf16.mxu1 %v7714_v34 }
 0x48a   :  { %5574 = vmatpush1.bf16.msra.mxu1 %v7712_v55 }
 0x48b   :  { %5575 = vmatprep.subr.bf16.mxu1 %v7717_v58 }
 0x48e   :  { %5576 = vmatpush1.bf16.msra.mxu1 %v7715_v59 }
 0x491   :  { %5594 = vmatmul.mubr.bf16.vlgmr.msra.gmra.mrb[24].mxu1 %v5217_v54 }
 0x564   :  { %v5595_v2 = vpop.f32.mrb[24].mxu1 }
 0x565   :  { %v6707_v3 = vadd.f32 %v5595_v2, %v5271_v0  ;;  %v5597_v4 = vpop.f32.mrb[25].mxu1 }
 0x566   :  { %v6708_v6 = vadd.f32 %v5597_v4, %v5275_v1  ;;  %v5599_v7 = vpop.f32.mrb[26].mxu1 }
 0x567   :  { %v6709_v8 = vadd.f32 %v5599_v7, %v5271_v0  ;;  %v5601_v9 = vpop.f32.mrb[27].mxu1  ;;  %v5604_v11 = vmax.f32 %v6707_v3, 0.0 }
 0x568   :  { %v6710_v10 = vadd.f32 %v5601_v9, %v5275_v1  ;;  %v5605_v14 = vmax.f32 %v6708_v6, 0.0 }
 0x569   :  { %v5606_v12 = vmax.f32 %v6709_v8, 0.0 }
 0x56a   :  { %v5607_v15 = vmax.f32 %v6710_v10, 0.0 }
 0x56b   :  { %v5608_v37 = vpack.c.bf16 %v5606_v12, %v5604_v11 }
 0x56c   :  { %v5609_v19 = vpack.c.bf16 %v5607_v15, %v5605_v14 }
 0x56e   :  { %5777 = vmatprep.mubr.bf16.mxu0 %v5609_v19 }
 0x56f   :  { %5778 = vmatmul.mubr.bf16.vlgmr.msra.gmra.mrb[24].mxu0 %v5608_v37 }
 0x642   :  { %v6665_v20 = vpop.f32.mrb[24].mxu0 }
 0x643   :  { %v6666_v41 = vpop.f32.mrb[25].mxu0 }
 0x644   :  { %v6667_v57 = vadd.f32 %v6666_v41, %v6665_v20  ;;  %v6668_v21 = vpop.f32.mrb[26].mxu0 }
 0x645   :  { %v6669_v22 = vpop.f32.mrb[27].mxu0 }
 0x646   :  { %v5780_v26 = vadd.f32 %v6667_v57, %v6469_v56  ;;  %v6670_v27 = vadd.f32 %v6669_v22, %v6668_v21 }
 0x648   :  { %5786 = vst [vmem:[%s8295_s9] sm:$0xff] %v5780_v26  ;;  %v5783_v28 = vadd.f32 %v6670_v27, %v6469_v56 }
 0x64a   :  { %5787 = vst [vmem:[%s8295_s9 + $0x8] sm:$0xff] %v5783_v28 }
 0x64b   :  { %5792 = vsyncpa [#allocation3], 1 }
 0x64c   :  { %5793 = vsyncpa [#allocation5], 1 }
 0x64d   :  { %5794 = vsyncpa [#allocation8], 1 }
 0x64e   :  { %5795 = vsyncpa [#allocation11], 1 }
 0x64f   :  { %5796 = vsyncpa [#allocation14], 1 }

</bundles_post_ra>
